<compile_context>
chip_gen: v5e
topology: v5e:2x2
jax: 0.10.0
libtpu: 0.0.40
codegen_flags: <defaults>
</compile_context>

<pallas_src>
import functools

import jax
import jax.numpy as jnp
from jax.experimental import pallas as pl
from jax.experimental.pallas import tpu as pltpu

N_CLASSES = 10
IMG_SHAPE = (1, 28, 28)
IMG_FLAT = 1 * 28 * 28                       # 784
D_IN = N_CLASSES + IMG_FLAT                  # 794
D_IN_PAD = 896                               # 7 * 128
HID = 512
D_OUT_PAD = 128                              # real output dim is 1
MAX_TB = 256                                 # batch tile rows per grid step


def _disc_kernel(x_ref, w1_ref, b1_ref, w2_ref, b2_ref,
                 w3_ref, b3_ref, w4_ref, b4_ref, o_ref):
    # Layer 1: Linear(794 -> 512) + LeakyReLU(0.2)
    h = jnp.dot(x_ref[...], w1_ref[...], preferred_element_type=jnp.float32)
    h = h + b1_ref[...]
    h = jnp.maximum(h, 0.2 * h)

    # Layer 2: Linear(512 -> 512) + Dropout(identity) + LeakyReLU(0.2)
    h = jnp.dot(h.astype(jnp.bfloat16), w2_ref[...],
                preferred_element_type=jnp.float32)
    h = h + b2_ref[...]
    h = jnp.maximum(h, 0.2 * h)

    # Layer 3: Linear(512 -> 512) + Dropout(identity) + LeakyReLU(0.2)
    h = jnp.dot(h.astype(jnp.bfloat16), w3_ref[...],
                preferred_element_type=jnp.float32)
    h = h + b3_ref[...]
    h = jnp.maximum(h, 0.2 * h)

    # Layer 4: Linear(512 -> 1)  (output columns padded to 128)
    o = jnp.dot(h.astype(jnp.bfloat16), w4_ref[...],
                preferred_element_type=jnp.float32)
    o_ref[...] = o + b4_ref[...]


def prepare_params(params):
    """One-time padding + bf16 cast of the weights (hoisted out of forward)."""
    w1 = jnp.zeros((D_IN_PAD, HID), jnp.bfloat16)
    w1 = w1.at[:D_IN, :].set(params["w1"].astype(jnp.bfloat16))
    w2 = params["w2"].astype(jnp.bfloat16)
    w3 = params["w3"].astype(jnp.bfloat16)
    w4 = jnp.zeros((HID, D_OUT_PAD), jnp.bfloat16)
    w4 = w4.at[:, :1].set(params["w4"].astype(jnp.bfloat16))

    b1 = params["b1"].reshape(1, HID).astype(jnp.float32)
    b2 = params["b2"].reshape(1, HID).astype(jnp.float32)
    b3 = params["b3"].reshape(1, HID).astype(jnp.float32)
    b4 = jnp.zeros((1, D_OUT_PAD), jnp.float32)
    b4 = b4.at[:, :1].set(params["b4"].reshape(1, 1).astype(jnp.float32))

    return dict(emb=params["emb"], w1=w1, b1=b1, w2=w2, b2=b2,
                w3=w3, b3=b3, w4=w4, b4=b4)


@functools.partial(jax.jit, static_argnames=())
def discriminator_forward(img, labels, prepped):
    """img: (B, 1, 28, 28) float32, labels: (B,) int32 -> (B, 1) float32."""
    B = img.shape[0]

    # ---- glue in plain JAX (fused under jit): embedding, flatten, concat ----
    emb = prepped["emb"][labels]                                  # (B, 10)
    x = jnp.concatenate([img.reshape(B, -1), emb], axis=-1)       # (B, 794)

    # Batch tile: multiple of 8 sublanes, at most MAX_TB rows; pad B up to it.
    tb = min(MAX_TB, ((B + 7) // 8) * 8)
    b_pad = ((B + tb - 1) // tb) * tb
    x_pad = jnp.zeros((b_pad, D_IN_PAD), jnp.bfloat16)
    x_pad = x_pad.at[:B, :D_IN].set(x.astype(jnp.bfloat16))

    n_tiles = b_pad // tb

    def _x_map(i):
        return (i, 0)

    def _const_map(i):
        return (0, 0)

    out_pad = pl.pallas_call(
        _disc_kernel,
        out_shape=jax.ShapeDtypeStruct((b_pad, D_OUT_PAD), jnp.float32),
        grid=(n_tiles,),
        in_specs=[
            pl.BlockSpec((tb, D_IN_PAD), _x_map),
            pl.BlockSpec((D_IN_PAD, HID), _const_map),
            pl.BlockSpec((1, HID), _const_map),
            pl.BlockSpec((HID, HID), _const_map),
            pl.BlockSpec((1, HID), _const_map),
            pl.BlockSpec((HID, HID), _const_map),
            pl.BlockSpec((1, HID), _const_map),
            pl.BlockSpec((HID, D_OUT_PAD), _const_map),
            pl.BlockSpec((1, D_OUT_PAD), _const_map),
        ],
        out_specs=pl.BlockSpec((tb, D_OUT_PAD), _x_map),
        compiler_params=pltpu.CompilerParams(
            dimension_semantics=("parallel",),
            vmem_limit_bytes=48 << 20,
        ),
    )(x_pad, prepped["w1"], prepped["b1"], prepped["w2"], prepped["b2"],
      prepped["w3"], prepped["b3"], prepped["w4"], prepped["b4"])

    return out_pad[:B, :1]                                        # (B, 1)


def init_params(key):
    """Deterministic parameter init (shapes from the PyTorch module)."""
    ks = jax.random.split(key, 9)

    def lin(kw, kb, fan_in, fan_out):
        bound = 1.0 / jnp.sqrt(fan_in)
        w = jax.random.uniform(kw, (fan_in, fan_out), jnp.float32, -bound, bound)
        b = jax.random.uniform(kb, (fan_out,), jnp.float32, -bound, bound)
        return w, b

    emb = jax.random.normal(ks[0], (N_CLASSES, N_CLASSES), jnp.float32)
    w1, b1 = lin(ks[1], ks[2], D_IN, HID)
    w2, b2 = lin(ks[3], ks[4], HID, HID)
    w3, b3 = lin(ks[5], ks[6], HID, HID)
    w4, b4 = lin(ks[7], ks[8], HID, 1)
    return dict(emb=emb, w1=w1, b1=b1, w2=w2, b2=b2,
                w3=w3, b3=b3, w4=w4, b4=b4)


def reference_forward(img, labels, params):
    """Pure-JAX f32 reference for correctness check."""
    B = img.shape[0]
    x = jnp.concatenate([img.reshape(B, -1), params["emb"][labels]], axis=-1)
    h = x @ params["w1"] + params["b1"]
    h = jnp.maximum(h, 0.2 * h)
    h = h @ params["w2"] + params["b2"]
    h = jnp.maximum(h, 0.2 * h)
    h = h @ params["w3"] + params["b3"]
    h = jnp.maximum(h, 0.2 * h)
    return h @ params["w4"] + params["b4"]


if __name__ == "__main__":
    key = jax.random.PRNGKey(0)
    k_img, k_lbl, k_par = jax.random.split(key, 3)

    B = 2
    img = jax.random.normal(k_img, (B,) + IMG_SHAPE, jnp.float32)
    labels = jax.random.randint(k_lbl, (B,), 0, N_CLASSES, jnp.int32)
    params = init_params(k_par)
    prepped = prepare_params(params)

    out = discriminator_forward(img, labels, prepped)
    out = jax.block_until_ready(out)

    ref = reference_forward(img, labels, params)
    assert out.shape == (B, 1), out.shape
    # bf16 weights/activations -> loosen tolerance vs the f32 reference.
    rel_err = jnp.max(jnp.abs(out - ref)) / (jnp.max(jnp.abs(ref)) + 1e-6)
    assert rel_err < 5e-2, (float(rel_err), out, ref)

    print("KERNEL_OK")
</pallas_src>

<mosaic_0001>
module attributes {stable_mosaic.version = 11 : i64} {
  func.func @_disc_kernel(%arg0: i32, %arg1: memref<8x896xbf16, #tpu.memory_space<vmem>>, %arg2: memref<896x512xbf16, #tpu.memory_space<vmem>>, %arg3: memref<1x512xf32, #tpu.memory_space<vmem>>, %arg4: memref<512x512xbf16, #tpu.memory_space<vmem>>, %arg5: memref<1x512xf32, #tpu.memory_space<vmem>>, %arg6: memref<512x512xbf16, #tpu.memory_space<vmem>>, %arg7: memref<1x512xf32, #tpu.memory_space<vmem>>, %arg8: memref<512x128xbf16, #tpu.memory_space<vmem>>, %arg9: memref<1x128xf32, #tpu.memory_space<vmem>>, %arg10: memref<8x128xf32, #tpu.memory_space<vmem>>) attributes {dimension_semantics = [#tpu.dimension_semantics<parallel>], iteration_bounds = array<i64: 1>, scalar_prefetch = 0 : i64, scratch_operands = 0 : i64, tpu.core_type = #tpu.core_type<tc>, window_params = [{transform_indices = @transform_0, window_bounds = array<i64: 8, 896>}, {pipeline_mode = #tpu.pipeline_mode<synchronous>, transform_indices = @transform_1, window_bounds = array<i64: 896, 512>}, {pipeline_mode = #tpu.pipeline_mode<synchronous>, transform_indices = @transform_2, window_bounds = array<i64: 1, 512>}, {pipeline_mode = #tpu.pipeline_mode<synchronous>, transform_indices = @transform_3, window_bounds = array<i64: 512, 512>}, {pipeline_mode = #tpu.pipeline_mode<synchronous>, transform_indices = @transform_4, window_bounds = array<i64: 1, 512>}, {pipeline_mode = #tpu.pipeline_mode<synchronous>, transform_indices = @transform_5, window_bounds = array<i64: 512, 512>}, {pipeline_mode = #tpu.pipeline_mode<synchronous>, transform_indices = @transform_6, window_bounds = array<i64: 1, 512>}, {pipeline_mode = #tpu.pipeline_mode<synchronous>, transform_indices = @transform_7, window_bounds = array<i64: 512, 128>}, {pipeline_mode = #tpu.pipeline_mode<synchronous>, transform_indices = @transform_8, window_bounds = array<i64: 1, 128>}, {transform_indices = @transform_9, window_bounds = array<i64: 8, 128>}]} {
    %c0 = arith.constant 0 : index
    %c0_0 = arith.constant 0 : index
    %0 = vector.load %arg1[%c0, %c0_0] : memref<8x896xbf16, #tpu.memory_space<vmem>>, vector<8x896xbf16>
    %c0_1 = arith.constant 0 : index
    %c0_2 = arith.constant 0 : index
    %1 = vector.load %arg2[%c0_1, %c0_2] : memref<896x512xbf16, #tpu.memory_space<vmem>>, vector<896x512xbf16>
    %cst = arith.constant dense<0.000000e+00> : vector<8x512xf32>
    %2 = tpu.matmul %0, %1, %cst {dimension_numbers = #tpu.dot_dimension_numbers<[1], [0], [0], [1], [0, 0, 1, 1], [], []>} : vector<8x896xbf16>, vector<896x512xbf16>, vector<8x512xf32> -> vector<8x512xf32>
    %c0_3 = arith.constant 0 : index
    %c0_4 = arith.constant 0 : index
    %3 = vector.load %arg3[%c0_3, %c0_4] : memref<1x512xf32, #tpu.memory_space<vmem>>, vector<1x512xf32>
    %4 = vector.broadcast %3 : vector<1x512xf32> to vector<8x512xf32>
    %5 = arith.addf %2, %4 : vector<8x512xf32>
    %cst_5 = arith.constant 2.000000e-01 : f32
    %6 = vector.broadcast %cst_5 : f32 to vector<8x512xf32>
    %7 = arith.mulf %6, %5 : vector<8x512xf32>
    %8 = arith.maximumf %5, %7 : vector<8x512xf32>
    %9 = arith.truncf %8 : vector<8x512xf32> to vector<8x512xbf16>
    %c0_6 = arith.constant 0 : index
    %c0_7 = arith.constant 0 : index
    %10 = vector.load %arg4[%c0_6, %c0_7] : memref<512x512xbf16, #tpu.memory_space<vmem>>, vector<512x512xbf16>
    %cst_8 = arith.constant dense<0.000000e+00> : vector<8x512xf32>
    %11 = tpu.matmul %9, %10, %cst_8 {dimension_numbers = #tpu.dot_dimension_numbers<[1], [0], [0], [1], [0, 0, 1, 1], [], []>} : vector<8x512xbf16>, vector<512x512xbf16>, vector<8x512xf32> -> vector<8x512xf32>
    %c0_9 = arith.constant 0 : index
    %c0_10 = arith.constant 0 : index
    %12 = vector.load %arg5[%c0_9, %c0_10] : memref<1x512xf32, #tpu.memory_space<vmem>>, vector<1x512xf32>
    %13 = vector.broadcast %12 : vector<1x512xf32> to vector<8x512xf32>
    %14 = arith.addf %11, %13 : vector<8x512xf32>
    %cst_11 = arith.constant 2.000000e-01 : f32
    %15 = vector.broadcast %cst_11 : f32 to vector<8x512xf32>
    %16 = arith.mulf %15, %14 : vector<8x512xf32>
    %17 = arith.maximumf %14, %16 : vector<8x512xf32>
    %18 = arith.truncf %17 : vector<8x512xf32> to vector<8x512xbf16>
    %c0_12 = arith.constant 0 : index
    %c0_13 = arith.constant 0 : index
    %19 = vector.load %arg6[%c0_12, %c0_13] : memref<512x512xbf16, #tpu.memory_space<vmem>>, vector<512x512xbf16>
    %cst_14 = arith.constant dense<0.000000e+00> : vector<8x512xf32>
    %20 = tpu.matmul %18, %19, %cst_14 {dimension_numbers = #tpu.dot_dimension_numbers<[1], [0], [0], [1], [0, 0, 1, 1], [], []>} : vector<8x512xbf16>, vector<512x512xbf16>, vector<8x512xf32> -> vector<8x512xf32>
    %c0_15 = arith.constant 0 : index
    %c0_16 = arith.constant 0 : index
    %21 = vector.load %arg7[%c0_15, %c0_16] : memref<1x512xf32, #tpu.memory_space<vmem>>, vector<1x512xf32>
    %22 = vector.broadcast %21 : vector<1x512xf32> to vector<8x512xf32>
    %23 = arith.addf %20, %22 : vector<8x512xf32>
    %cst_17 = arith.constant 2.000000e-01 : f32
    %24 = vector.broadcast %cst_17 : f32 to vector<8x512xf32>
    %25 = arith.mulf %24, %23 : vector<8x512xf32>
    %26 = arith.maximumf %23, %25 : vector<8x512xf32>
    %27 = arith.truncf %26 : vector<8x512xf32> to vector<8x512xbf16>
    %c0_18 = arith.constant 0 : index
    %c0_19 = arith.constant 0 : index
    %28 = vector.load %arg8[%c0_18, %c0_19] : memref<512x128xbf16, #tpu.memory_space<vmem>>, vector<512x128xbf16>
    %cst_20 = arith.constant dense<0.000000e+00> : vector<8x128xf32>
    %29 = tpu.matmul %27, %28, %cst_20 {dimension_numbers = #tpu.dot_dimension_numbers<[1], [0], [0], [1], [0, 0, 1, 1], [], []>} : vector<8x512xbf16>, vector<512x128xbf16>, vector<8x128xf32> -> vector<8x128xf32>
    %c0_21 = arith.constant 0 : index
    %c0_22 = arith.constant 0 : index
    %30 = vector.load %arg9[%c0_21, %c0_22] : memref<1x128xf32, #tpu.memory_space<vmem>>, vector<1x128xf32>
    %31 = vector.broadcast %30 : vector<1x128xf32> to vector<8x128xf32>
    %32 = arith.addf %29, %31 : vector<8x128xf32>
    %c0_23 = arith.constant 0 : index
    %c0_24 = arith.constant 0 : index
    %33 = vector.load %arg10[%c0_23, %c0_24] : memref<8x128xf32, #tpu.memory_space<vmem>>, vector<8x128xf32>
    tpu.vector_store %arg10[%c0_23, %c0_24], %32 {strides = array<i32>} : memref<8x128xf32, #tpu.memory_space<vmem>>, vector<8x128xf32>,
    return
  }
  func.func @transform_0(%arg0: i32) -> (i32, i32) {
    %c0_i32 = arith.constant 0 : i32
    %c0_i32_0 = arith.constant 0 : i32
    return %arg0, %c0_i32 : i32, i32
  }
  func.func @transform_1(%arg0: i32) -> (i32, i32) {
    %c0_i32 = arith.constant 0 : i32
    %c0_i32_0 = arith.constant 0 : i32
    %c0_i32_1 = arith.constant 0 : i32
    return %c0_i32, %c0_i32_0 : i32, i32
  }
  func.func @transform_2(%arg0: i32) -> (i32, i32) {
    %c0_i32 = arith.constant 0 : i32
    %c0_i32_0 = arith.constant 0 : i32
    %c0_i32_1 = arith.constant 0 : i32
    return %c0_i32, %c0_i32_0 : i32, i32
  }
  func.func @transform_3(%arg0: i32) -> (i32, i32) {
    %c0_i32 = arith.constant 0 : i32
    %c0_i32_0 = arith.constant 0 : i32
    %c0_i32_1 = arith.constant 0 : i32
    return %c0_i32, %c0_i32_0 : i32, i32
  }
  func.func @transform_4(%arg0: i32) -> (i32, i32) {
    %c0_i32 = arith.constant 0 : i32
    %c0_i32_0 = arith.constant 0 : i32
    %c0_i32_1 = arith.constant 0 : i32
    return %c0_i32, %c0_i32_0 : i32, i32
  }
  func.func @transform_5(%arg0: i32) -> (i32, i32) {
    %c0_i32 = arith.constant 0 : i32
    %c0_i32_0 = arith.constant 0 : i32
    %c0_i32_1 = arith.constant 0 : i32
    return %c0_i32, %c0_i32_0 : i32, i32
  }
  func.func @transform_6(%arg0: i32) -> (i32, i32) {
    %c0_i32 = arith.constant 0 : i32
    %c0_i32_0 = arith.constant 0 : i32
    %c0_i32_1 = arith.constant 0 : i32
    return %c0_i32, %c0_i32_0 : i32, i32
  }
  func.func @transform_7(%arg0: i32) -> (i32, i32) {
    %c0_i32 = arith.constant 0 : i32
    %c0_i32_0 = arith.constant 0 : i32
    %c0_i32_1 = arith.constant 0 : i32
    return %c0_i32, %c0_i32_0 : i32, i32
  }
  func.func @transform_8(%arg0: i32) -> (i32, i32) {
    %c0_i32 = arith.constant 0 : i32
    %c0_i32_0 = arith.constant 0 : i32
    %c0_i32_1 = arith.constant 0 : i32
    return %c0_i32, %c0_i32_0 : i32, i32
  }
  func.func @transform_9(%arg0: i32) -> (i32, i32) {
    %c0_i32 = arith.constant 0 : i32
    %c0_i32_0 = arith.constant 0 : i32
    return %arg0, %c0_i32 : i32, i32
  }
}

</mosaic_0001>

<bundles_post_ra>
// kernel: discriminator_forward.1
= control target key start
LH: loop header
LB: loop body
LE: loop exit
PB: predicated region body
PF: predicated region fallthrough
CT: control target
= control target key end

     0   :  { %14 = vsyncpa [#allocation3], 0  ;;  %s7142_s0 = inlined_call_operand.vmem [shape: bf16[8,896], index: 0, kind: input, shape index: {}]   ;;  %s7143_s1 = inlined_call_operand.hbm [shape: bf16[896,512], index: 1, kind: input, shape index: {}]   ;;  %s7144_s2 = inlined_call_operand.vmem [shape: f32[1,512], index: 2, kind: input, shape index: {}]   ;;  %s7145_s3 = inlined_call_operand.hbm [shape: bf16[512,512], index: 3, kind: input, shape index: {}]   ;;  %s7146_s4 = inlined_call_operand.vmem [shape: f32[1,512], index: 4, kind: input, shape index: {}]   ;;  %s7147_s5 = inlined_call_operand.hbm [shape: bf16[512,512], index: 5, kind: input, shape index: {}]   ;;  %s7148_s6 = inlined_call_operand.vmem [shape: f32[1,512], index: 6, kind: input, shape index: {}]   ;;  %s7149_s7 = inlined_call_operand.hbm [shape: bf16[512,128], index: 7, kind: input, shape index: {}]   ;;  %s7150_s8 = inlined_call_operand.vmem [shape: f32[1,128], index: 8, kind: input, shape index: {}]   ;;  %s7151_s9 = inlined_call_operand.vmem [shape: f32[8,128], index: 9, kind: output, shape index: {}]  }
   0x1   :  { %15 = vsyncpa [#allocation5], 0 }
   0x2   :  { %16 = vsyncpa [#allocation8], 0  ;;  %s38_s11 = sshll.u32 %s7145_s3, 4  ;;  %s6842_s12 = smov [#allocation4]   ;;  %s39_s11 = int_to_ptr.hbm [resolvable:$true] %s38_s11 }
   0x3   :  { %s40_s13 = sshll.u32 %s6842_s12, 4  ;;  %s23_s16 = sshll.u32 %s7143_s1, 4  ;;  %s41_s13 = int_to_ptr.vmem [resolvable:$true] %s40_s13  ;;  %s24_s16 = int_to_ptr.hbm [resolvable:$true] %s23_s16 }
   0x4   :  { %s6843_s17 = smov 256   ;;  %s6844_s18 = smov 16  }
   0x5   :  { %46 = dma.hbm_to_vmem [thread:$0]  %s39_s11, 16384, %s41_s13, [#allocation5], %s6843_s17, %s6843_s17, %s6844_s18  }
   0x6   :  { %s6845_s19 = smov [#allocation2]   ;;  %s53_s23 = sshll.u32 %s7147_s5, 4  ;;  %s54_s23 = int_to_ptr.hbm [resolvable:$true] %s53_s23 }
   0x7   :  { %s25_s20 = sshll.u32 %s6845_s19, 4  ;;  %s68_s25 = sshll.u32 %s7149_s7, 4  ;;  %s26_s20 = int_to_ptr.vmem [resolvable:$true] %s25_s20  ;;  %s69_s25 = int_to_ptr.hbm [resolvable:$true] %s68_s25 }
   0x8   :  { %31 = dma.hbm_to_vmem [thread:$0]  %s24_s16, 28672, %s26_s20, [#allocation3], %s6843_s17, %s6843_s17, %s6844_s18  }
   0x9   :  { %s6846_s26 = smov [#allocation6]   ;;  %s6847_s1 = smov [#allocation7]  }
   0xa   :  { %s55_s27 = sshll.u32 %s6846_s26, 4  ;;  %s70_s28 = sshll.u32 %s6847_s1, 4  ;;  %s56_s27 = int_to_ptr.vmem [resolvable:$true] %s55_s27  ;;  %s71_s28 = int_to_ptr.vmem [resolvable:$true] %s70_s28 }
   0xb   :  { %61 = dma.hbm_to_vmem [thread:$0]  %s54_s23, 16384, %s56_s27, [#allocation5], %s6843_s17, %s6843_s17, %s6844_s18  }
   0xc   :  { %s6848_s29 = smov 64   ;;  %s6849_s30 = smov 4  }
   0xd   :  { %76 = dma.hbm_to_vmem [thread:$0]  %s69_s25, 4096, %s71_s28, [#allocation8], %s6848_s29, %s6848_s29, %s6849_s30  }
   0xe   :  { %6836 = dma.done.wait [#allocation3], 28672  }
   0xf   :  { %6837 = vsyncadd [#allocation3], 4294938624 }
  0x10   :  { %6838 = dma.done.wait [#allocation5], 32768  }
  0x11   :  { %6839 = vsyncadd [#allocation5], 4294934528 }
  0x12   :  { %6840 = dma.done.wait [#allocation8], 4096  }
  0x13   :  { %6841 = vsyncadd [#allocation8], 4294963200  ;;  %v4284_v0 = vld [vmem:[#allocation2 + $0xe0] sm:$0xf]  ;;  %v6248_v1 = vld [vmem:[#allocation2 + $0xec] sm:$0xf0] }
  0x14   :  { %v4412_v2 = vld [vmem:[#allocation2 + $0x1e0] sm:$0xf]  ;;  %v4285_v3 = vor.u32 %v6248_v1, %v4284_v0  ;;  %v6280_v4 = vld [vmem:[#allocation2 + $0x1ec] sm:$0xf0] }
  0x15   :  { %v4540_v5 = vld [vmem:[#allocation2 + $0x2e0] sm:$0xf]  ;;  %v6312_v6 = vld [vmem:[#allocation2 + $0x2ec] sm:$0xf0]  ;;  %v4413_v7 = vor.u32 %v6280_v4, %v4412_v2 }
  0x16   :  { %v4541_v8 = vor.u32 %v6312_v6, %v4540_v5  ;;  %v4668_v9 = vld [vmem:[#allocation2 + $0x3e0] sm:$0xf]  ;;  %v6344_v10 = vld [vmem:[#allocation2 + $0x3ec] sm:$0xf0]  ;;  %1478 = vmatpush.bf16.msra.mxu0 %v4285_v3 }
  0x17   :  { %v4268_v11 = vld [vmem:[#allocation2 + $0xc0] sm:$0xf]  ;;  %v4669_v12 = vor.u32 %v6344_v10, %v4668_v9  ;;  %v6244_v13 = vld [vmem:[#allocation2 + $0xcc] sm:$0xf0]  ;;  %1491 = vmatpush.bf16.msra.mxu1 %v4413_v7 }
  0x18   :  { %v4396_v14 = vld [vmem:[#allocation2 + $0x1c0] sm:$0xf]  ;;  %v6276_v15 = vld [vmem:[#allocation2 + $0x1cc] sm:$0xf0]  ;;  %1504 = vmatpush.bf16.msra.mxu2 %v4541_v8  ;;  %v4269_v16 = vor.u32 %v6244_v13, %v4268_v11 }
  0x19   :  { %v4397_v17 = vor.u32 %v6276_v15, %v4396_v14  ;;  %v4524_v18 = vld [vmem:[#allocation2 + $0x2c0] sm:$0xf]  ;;  %v6308_v19 = vld [vmem:[#allocation2 + $0x2cc] sm:$0xf0]  ;;  %1517 = vmatpush.bf16.msra.mxu3 %v4669_v12 }
  0x1a   :  { %v4652_v20 = vld [vmem:[#allocation2 + $0x3c0] sm:$0xf]  ;;  %v4525_v21 = vor.u32 %v6308_v19, %v4524_v18  ;;  %v6340_v22 = vld [vmem:[#allocation2 + $0x3cc] sm:$0xf0]  ;;  %1479 = vmatpush.bf16.msra.mxu0 %v4269_v16 }
  0x1b   :  { %v4252_v23 = vld [vmem:[#allocation2 + $0xa0] sm:$0xf]  ;;  %v6240_v24 = vld [vmem:[#allocation2 + $0xac] sm:$0xf0]  ;;  %v4653_v25 = vor.u32 %v6340_v22, %v4652_v20  ;;  %1492 = vmatpush.bf16.msra.mxu1 %v4397_v17 }
  0x1c   :  { %v4380_v26 = vld [vmem:[#allocation2 + $0x1a0] sm:$0xf]  ;;  %v6272_v27 = vld [vmem:[#allocation2 + $0x1ac] sm:$0xf0]  ;;  %v4253_v29 = vor.u32 %v6240_v24, %v4252_v23  ;;  %1505 = vmatpush.bf16.msra.mxu2 %v4525_v21 }
  0x1d   :  { %v4508_v28 = vld [vmem:[#allocation2 + $0x2a0] sm:$0xf]  ;;  %v6304_v30 = vld [vmem:[#allocation2 + $0x2ac] sm:$0xf0]  ;;  %v4381_v33 = vor.u32 %v6272_v27, %v4380_v26  ;;  %1518 = vmatpush.bf16.msra.mxu3 %v4653_v25 }
  0x1e   :  { %v4636_v31 = vld [vmem:[#allocation2 + $0x3a0] sm:$0xf]  ;;  %v6336_v32 = vld [vmem:[#allocation2 + $0x3ac] sm:$0xf0]  ;;  %v4509_v34 = vor.u32 %v6304_v30, %v4508_v28  ;;  %1480 = vmatpush.bf16.msra.mxu0 %v4253_v29 }
  0x1f   :  { %v4236_v35 = vld [vmem:[#allocation2 + $0x80] sm:$0xf]  ;;  %v6236_v36 = vld [vmem:[#allocation2 + $0x8c] sm:$0xf0]  ;;  %v4637_v38 = vor.u32 %v6336_v32, %v4636_v31  ;;  %1493 = vmatpush.bf16.msra.mxu1 %v4381_v33 }
  0x20   :  { %v4364_v37 = vld [vmem:[#allocation2 + $0x180] sm:$0xf]  ;;  %v6268_v39 = vld [vmem:[#allocation2 + $0x18c] sm:$0xf0]  ;;  %v4237_v44 = vor.u32 %v6236_v36, %v4236_v35  ;;  %1506 = vmatpush.bf16.msra.mxu2 %v4509_v34 }
  0x21   :  { %v4492_v40 = vld [vmem:[#allocation2 + $0x280] sm:$0xf]  ;;  %v6300_v41 = vld [vmem:[#allocation2 + $0x28c] sm:$0xf0]  ;;  %v4365_v45 = vor.u32 %v6268_v39, %v4364_v37  ;;  %1519 = vmatpush.bf16.msra.mxu3 %v4637_v38  ;;  %v6246_v37 = vld [vmem:[#allocation2 + $0xe4] sm:$0xf] }
  0x22   :  { %v4620_v42 = vld [vmem:[#allocation2 + $0x380] sm:$0xf]  ;;  %v6332_v43 = vld [vmem:[#allocation2 + $0x38c] sm:$0xf0]  ;;  %v4493_v46 = vor.u32 %v6300_v41, %v4492_v40  ;;  %1481 = vmatpush.bf16.msra.mxu0 %v4237_v44  ;;  %v4286_v38 = vld [vmem:[#allocation2 + $0xf0] sm:$0xf0] }
  0x23   :  { %v4220_v47 = vld [vmem:[#allocation2 + $0x60] sm:$0xf]  ;;  %v6232_v48 = vld [vmem:[#allocation2 + $0x6c] sm:$0xf0]  ;;  %v4621_v50 = vor.u32 %v6332_v43, %v4620_v42  ;;  %1494 = vmatpush.bf16.msra.mxu1 %v4365_v45 }
  0x24   :  { %v4348_v49 = vld [vmem:[#allocation2 + $0x160] sm:$0xf]  ;;  %v6264_v51 = vld [vmem:[#allocation2 + $0x16c] sm:$0xf0]  ;;  %v4221_v56 = vor.u32 %v6232_v48, %v4220_v47  ;;  %1507 = vmatpush.bf16.msra.mxu2 %v4493_v46  ;;  %v4289_v46 = vor.u32 %v6246_v37, %v4286_v38 }
  0x25   :  { %v4476_v52 = vld [vmem:[#allocation2 + $0x260] sm:$0xf]  ;;  %v6296_v53 = vld [vmem:[#allocation2 + $0x26c] sm:$0xf0]  ;;  %v4349_v57 = vor.u32 %v6264_v51, %v4348_v49  ;;  %1520 = vmatpush.bf16.msra.mxu3 %v4621_v50  ;;  %v6242_v50 = vld [vmem:[#allocation2 + $0xc4] sm:$0xf] }
  0x26   :  { %v4604_v54 = vld [vmem:[#allocation2 + $0x360] sm:$0xf]  ;;  %v6328_v55 = vld [vmem:[#allocation2 + $0x36c] sm:$0xf0]  ;;  %v4477_v58 = vor.u32 %v6296_v53, %v4476_v52  ;;  %1482 = vmatpush.bf16.msra.mxu0 %v4221_v56  ;;  %v4270_v51 = vld [vmem:[#allocation2 + $0xd0] sm:$0xf0] }
  0x27   :  { %v4204_v59 = vld [vmem:[#allocation2 + $0x40] sm:$0xf]  ;;  %v6228_v60 = vld [vmem:[#allocation2 + $0x4c] sm:$0xf0]  ;;  %v4605_v62 = vor.u32 %v6328_v55, %v4604_v54  ;;  %1495 = vmatpush.bf16.msra.mxu1 %v4349_v57 }
  0x28   :  { %v4332_v61 = vld [vmem:[#allocation2 + $0x140] sm:$0xf]  ;;  %v6260_v63 = vld [vmem:[#allocation2 + $0x14c] sm:$0xf0]  ;;  %v4205_v4 = vor.u32 %v6228_v60, %v4204_v59  ;;  %1508 = vmatpush.bf16.msra.mxu2 %v4477_v58  ;;  %v96_v58 = vld [vmem:[%s7142_s0 + $0x8] sm:$0xff]  ;;  %v4273_v59 = vor.u32 %v6242_v50, %v4270_v51 }
  0x29   :  { %v4460_v0 = vld [vmem:[#allocation2 + $0x240] sm:$0xf]  ;;  %v6292_v1 = vld [vmem:[#allocation2 + $0x24c] sm:$0xf0]  ;;  %v4333_v5 = vor.u32 %v6260_v63, %v4332_v61  ;;  %1521 = vmatpush.bf16.msra.mxu3 %v4605_v62  ;;  %v339_v63 = vunpack.c.l.b16 %v96_v58 }
  0x2a   :  { %v4588_v2 = vld [vmem:[#allocation2 + $0x340] sm:$0xf]  ;;  %v6324_v3 = vld [vmem:[#allocation2 + $0x34c] sm:$0xf0]  ;;  %v4461_v6 = vor.u32 %v6292_v1, %v4460_v0  ;;  %1483 = vmatpush.bf16.msra.mxu0 %v4205_v4  ;;  %v340_v0 = vunpack.c.h.b16 %v96_v58  ;;  %v6238_v1 = vld [vmem:[#allocation2 + $0xa4] sm:$0xf] }
  0x2b   :  { %v4188_v7 = vld [vmem:[#allocation2 + $0x20] sm:$0xf]  ;;  %v6224_v8 = vld [vmem:[#allocation2 + $0x2c] sm:$0xf0]  ;;  %v4589_v10 = vor.u32 %v6324_v3, %v4588_v2  ;;  %1496 = vmatpush.bf16.msra.mxu1 %v4333_v5  ;;  %v4254_v2 = vld [vmem:[#allocation2 + $0xb0] sm:$0xf0]  ;;  %v6915_v4 = vpack.c.b16 %v339_v63, %v339_v63 }
  0x2c   :  { %v4316_v9 = vld [vmem:[#allocation2 + $0x120] sm:$0xf]  ;;  %v6256_v11 = vld [vmem:[#allocation2 + $0x12c] sm:$0xf0]  ;;  %v4189_v16 = vor.u32 %v6224_v8, %v4188_v7  ;;  %1509 = vmatpush.bf16.msra.mxu2 %v4461_v6  ;;  %v6920_v6 = vpack.c.b16 %v340_v0, %v340_v0 }
  0x2d   :  { %v4444_v12 = vld [vmem:[#allocation2 + $0x220] sm:$0xf]  ;;  %v6288_v13 = vld [vmem:[#allocation2 + $0x22c] sm:$0xf0]  ;;  %v4317_v19 = vor.u32 %v6256_v11, %v4316_v9  ;;  %1522 = vmatpush.bf16.msra.mxu3 %v4589_v10 }
  0x2e   :  { %v4572_v14 = vld [vmem:[#allocation2 + $0x320] sm:$0xf]  ;;  %v6320_v15 = vld [vmem:[#allocation2 + $0x32c] sm:$0xf0]  ;;  %v4445_v20 = vor.u32 %v6288_v13, %v4444_v12  ;;  %1484 = vmatpush.bf16.msra.mxu0 %v4189_v16 }
  0x2f   :  { %v4172_v17 = vld [vmem:[#allocation2] sm:$0xf]  ;;  %v6220_v18 = vld [vmem:[#allocation2 + $0xc] sm:$0xf0]  ;;  %v4573_v24 = vor.u32 %v6320_v15, %v4572_v14  ;;  %1497 = vmatpush.bf16.msra.mxu1 %v4317_v19  ;;  %v4257_v14 = vor.u32 %v6238_v1, %v4254_v2  ;;  %v4238_v19 = vld [vmem:[#allocation2 + $0x90] sm:$0xf0] }
  0x30   :  { %v4300_v21 = vld [vmem:[#allocation2 + $0x100] sm:$0xf]  ;;  %v6252_v22 = vld [vmem:[#allocation2 + $0x10c] sm:$0xf0]  ;;  %v4173_v31 = vor.u32 %v6220_v18, %v4172_v17  ;;  %1510 = vmatpush.bf16.msra.mxu2 %v4445_v20  ;;  %v6234_v18 = vld [vmem:[#allocation2 + $0x84] sm:$0xf] }
  0x31   :  { %v4428_v23 = vld [vmem:[#allocation2 + $0x200] sm:$0xf]  ;;  %v6284_v25 = vld [vmem:[#allocation2 + $0x20c] sm:$0xf0]  ;;  %v4301_v35 = vor.u32 %v6252_v22, %v4300_v21  ;;  %1523 = vmatpush.bf16.msra.mxu3 %v4573_v24 }
  0x32   :  { %v4556_v26 = vld [vmem:[#allocation2 + $0x300] sm:$0xf]  ;;  %v6316_v27 = vld [vmem:[#allocation2 + $0x30c] sm:$0xf0]  ;;  %v4429_v36 = vor.u32 %v6284_v25, %v4428_v23  ;;  %1485 = vmatpush.bf16.msra.mxu0 %v4173_v31 }
  0x33   :  { %v4796_v28 = vld [vmem:[#allocation2 + $0x4e0] sm:$0xf]  ;;  %v6376_v29 = vld [vmem:[#allocation2 + $0x4ec] sm:$0xf0]  ;;  %v4557_v39 = vor.u32 %v6316_v27, %v4556_v26  ;;  %1498 = vmatpush.bf16.msra.mxu1 %v4301_v35 }
  0x34   :  { %v4924_v30 = vld [vmem:[#allocation2 + $0x5e0] sm:$0xf]  ;;  %v6408_v32 = vld [vmem:[#allocation2 + $0x5ec] sm:$0xf0]  ;;  %v4797_v40 = vor.u32 %v6376_v29, %v4796_v28  ;;  %1511 = vmatpush.bf16.msra.mxu2 %v4429_v36  ;;  %v4241_v28 = vor.u32 %v6234_v18, %v4238_v19 }
  0x35   :  { %v5052_v33 = vld [vmem:[#allocation2 + $0x6e0] sm:$0xf]  ;;  %v6440_v34 = vld [vmem:[#allocation2 + $0x6ec] sm:$0xf0]  ;;  %v4925_v41 = vor.u32 %v6408_v32, %v4924_v30  ;;  %1524 = vmatpush.bf16.msra.mxu3 %v4557_v39  ;;  %v6230_v32 = vld [vmem:[#allocation2 + $0x64] sm:$0xf] }
  0x36   :  { %v5053_v42 = vor.u32 %v6440_v34, %v5052_v33  ;;  %v4780_v43 = vld [vmem:[#allocation2 + $0x4c0] sm:$0xf]  ;;  %v6372_v44 = vld [vmem:[#allocation2 + $0x4cc] sm:$0xf0]  ;;  %1530 = vmatpush.bf16.msrb.mxu0 %v4797_v40  ;;  %v4222_v33 = vld [vmem:[#allocation2 + $0x70] sm:$0xf0] }
  0x37   :  { %v4908_v45 = vld [vmem:[#allocation2 + $0x5c0] sm:$0xf]  ;;  %v6404_v47 = vld [vmem:[#allocation2 + $0x5cc] sm:$0xf0]  ;;  %v4781_v52 = vor.u32 %v6372_v44, %v4780_v43  ;;  %1543 = vmatpush.bf16.msrb.mxu1 %v4925_v41  ;;  %1512 = vmatmul.bf16.vlgmr.msra.gmra.mxu2 %v6915_v4  ;;  %v4225_v40 = vor.u32 %v6230_v32, %v4222_v33  ;;  %v6226_v44 = vld [vmem:[#allocation2 + $0x44] sm:$0xf] }
  0x38   :  { %v5036_v48 = vld [vmem:[#allocation2 + $0x6c0] sm:$0xf]  ;;  %v6436_v49 = vld [vmem:[#allocation2 + $0x6cc] sm:$0xf0]  ;;  %1556 = vmatpush.bf16.msrb.mxu2 %v5053_v42  ;;  %v4909_v54 = vor.u32 %v6404_v47, %v4908_v45  ;;  %1525 = vmatmul.bf16.vlgmr.msra.gmra.mxu3 %v6920_v6  ;;  %v4206_v45 = vld [vmem:[#allocation2 + $0x50] sm:$0xf0] }
  0x39   :  { %v4764_v53 = vld [vmem:[#allocation2 + $0x4a0] sm:$0xf]  ;;  %v5037_v55 = vor.u32 %v6436_v49, %v5036_v48  ;;  %v6368_v56 = vld [vmem:[#allocation2 + $0x4ac] sm:$0xf0]  ;;  %1569 = vmatpush.bf16.msrb.mxu3 %v4289_v46  ;;  %v6306_v32 = vld [vmem:[#allocation2 + $0x2c4] sm:$0xf] }
  0x3a   :  { %v4892_v57 = vld [vmem:[#allocation2 + $0x5a0] sm:$0xf]  ;;  %v6400_v60 = vld [vmem:[#allocation2 + $0x5ac] sm:$0xf0]  ;;  %1531 = vmatpush.bf16.msrb.mxu0 %v4781_v52  ;;  %v4765_v3 = vor.u32 %v6368_v56, %v4764_v53  ;;  %v4209_v52 = vor.u32 %v6226_v44, %v4206_v45  ;;  %v6222_v56 = vld [vmem:[#allocation2 + $0x24] sm:$0xf] }
  0x3b   :  { %v5020_v61 = vld [vmem:[#allocation2 + $0x6a0] sm:$0xf]  ;;  %v6432_v62 = vld [vmem:[#allocation2 + $0x6ac] sm:$0xf0]  ;;  %1544 = vmatpush.bf16.msrb.mxu1 %v4909_v54  ;;  %v4893_v7 = vor.u32 %v6400_v60, %v4892_v57  ;;  %v4190_v57 = vld [vmem:[#allocation2 + $0x30] sm:$0xf0] }
  0x3c   :  { %v95_v5 = vld [vmem:[%s7142_s0] sm:$0xff]  ;;  %1557 = vmatpush.bf16.msrb.mxu2 %v5037_v55  ;;  %v5021_v8 = vor.u32 %v6432_v62, %v5020_v61  ;;  %v6364_v10 = vld [vmem:[#allocation2 + $0x48c] sm:$0xf0] }
  0x3d   :  { %v4748_v9 = vld [vmem:[#allocation2 + $0x480] sm:$0xf]  ;;  %v337_v12 = vunpack.c.l.b16 %v95_v5  ;;  %v338_v13 = vunpack.c.h.b16 %v95_v5  ;;  %1570 = vmatpush.bf16.msrb.mxu3 %v4273_v59  ;;  %v6396_v15 = vld [vmem:[#allocation2 + $0x58c] sm:$0xf0]  ;;  %v4193_v5 = vor.u32 %v6222_v56, %v4190_v57  ;;  %v6270_v45 = vld [vmem:[#allocation2 + $0x1a4] sm:$0xf] }
  0x3e   :  { %v4876_v11 = vld [vmem:[#allocation2 + $0x580] sm:$0xf]  ;;  %v6428_v17 = vld [vmem:[#allocation2 + $0x68c] sm:$0xf0]  ;;  %1532 = vmatpush.bf16.msrb.mxu0 %v4765_v3  ;;  %v4749_v22 = vor.u32 %v6364_v10, %v4748_v9  ;;  %v98_v3 = vld [vmem:[%s7142_s0 + $0x18] sm:$0xf] }
  0x3f   :  { %v5004_v16 = vld [vmem:[#allocation2 + $0x680] sm:$0xf]  ;;  %v6923_v20 = vpack.c.b16 %v337_v12, %v337_v12  ;;  %v6925_v21 = vpack.c.b16 %v338_v13, %v338_v13  ;;  %1545 = vmatpush.bf16.msrb.mxu1 %v4893_v7  ;;  %v4877_v23 = vor.u32 %v6396_v15, %v4876_v11  ;;  %v6360_v26 = vld [vmem:[#allocation2 + $0x46c] sm:$0xf0]  ;;  %v6218_v7 = vld [vmem:[#allocation2 + $0x4] sm:$0xf] }
  0x40   :  { %1558 = vmatpush.bf16.msrb.mxu2 %v5021_v8  ;;  %v5005_v24 = vor.u32 %v6428_v17, %v5004_v16  ;;  %v4732_v25 = vld [vmem:[#allocation2 + $0x460] sm:$0xf]  ;;  %v6392_v29 = vld [vmem:[#allocation2 + $0x56c] sm:$0xf0]  ;;  %v4174_v8 = vld [vmem:[#allocation2 + $0x10] sm:$0xf0]  ;;  %v343_v17 = vunpack.c.l.b16 %v98_v3 }
  0x41   :  { %v4860_v27 = vld [vmem:[#allocation2 + $0x560] sm:$0xf]  ;;  %1571 = vmatpush.bf16.msrb.mxu3 %v4257_v14  ;;  %v6424_v31 = vld [vmem:[#allocation2 + $0x66c] sm:$0xf0]  ;;  %1486 = vmatmul.bf16.vlgmr.msra.gmra.mxu0 %v6923_v20  ;;  %v4733_v34 = vor.u32 %v6360_v26, %v4732_v25  ;;  %v6278_v10 = vld [vmem:[#allocation2 + $0x1e4] sm:$0xf]  ;;  %v4177_v26 = vor.u32 %v6218_v7, %v4174_v8 }
  0x42   :  { %v4988_v30 = vld [vmem:[#allocation2 + $0x660] sm:$0xf]  ;;  %1499 = vmatmul.bf16.vlgmr.msra.gmra.mxu1 %v6925_v21  ;;  %1533 = vmatpush.bf16.msrb.mxu0 %v4749_v22  ;;  %v4861_v35 = vor.u32 %v6392_v29, %v4860_v27  ;;  %v6356_v38 = vld [vmem:[#allocation2 + $0x44c] sm:$0xf0]  ;;  %v4414_v11 = vld [vmem:[#allocation2 + $0x1f0] sm:$0xf0] }
  0x43   :  { %1546 = vmatpush.bf16.msrb.mxu1 %v4877_v23  ;;  %v4989_v36 = vor.u32 %v6424_v31, %v4988_v30  ;;  %v4716_v37 = vld [vmem:[#allocation2 + $0x440] sm:$0xf]  ;;  %v6388_v41 = vld [vmem:[#allocation2 + $0x54c] sm:$0xf0]  ;;  %v6310_v12 = vld [vmem:[#allocation2 + $0x2e4] sm:$0xf]  ;;  %v4417_v27 = vor.u32 %v6278_v10, %v4414_v11 }
  0x44   :  { %1559 = vmatpush.bf16.msrb.mxu2 %v5005_v24  ;;  %v4844_v39 = vld [vmem:[#allocation2 + $0x540] sm:$0xf]  ;;  %v6420_v43 = vld [vmem:[#allocation2 + $0x64c] sm:$0xf0]  ;;  %v4717_v46 = vor.u32 %v6356_v38, %v4716_v37  ;;  %v4542_v14 = vld [vmem:[#allocation2 + $0x2f0] sm:$0xf0]  ;;  %v6936_v37 = vpack.c.b16 %v343_v17, %v343_v17 }
  0x45   :  { %1572 = vmatpush.bf16.msrb.mxu3 %v4241_v28  ;;  %v4972_v42 = vld [vmem:[#allocation2 + $0x640] sm:$0xf]  ;;  %v4845_v47 = vor.u32 %v6388_v41, %v4844_v39  ;;  %v6352_v50 = vld [vmem:[#allocation2 + $0x42c] sm:$0xf0]  ;;  %v6342_v15 = vld [vmem:[#allocation2 + $0x3e4] sm:$0xf]  ;;  %v4545_v28 = vor.u32 %v6310_v12, %v4542_v14 }
  0x46   :  { %1534 = vmatpush.bf16.msrb.mxu0 %v4733_v34  ;;  %v4973_v48 = vor.u32 %v6420_v43, %v4972_v42  ;;  %v4700_v49 = vld [vmem:[#allocation2 + $0x420] sm:$0xf]  ;;  %v6384_v53 = vld [vmem:[#allocation2 + $0x52c] sm:$0xf0]  ;;  %v4670_v16 = vld [vmem:[#allocation2 + $0x3f0] sm:$0xf0] }
  0x47   :  { %1547 = vmatpush.bf16.msrb.mxu1 %v4861_v35  ;;  %v4828_v51 = vld [vmem:[#allocation2 + $0x520] sm:$0xf]  ;;  %v6416_v55 = vld [vmem:[#allocation2 + $0x62c] sm:$0xf0]  ;;  %v4701_v59 = vor.u32 %v6352_v50, %v4700_v49  ;;  %v6374_v22 = vld [vmem:[#allocation2 + $0x4e4] sm:$0xf]  ;;  %v4673_v29 = vor.u32 %v6342_v15, %v4670_v16 }
  0x48   :  { %1560 = vmatpush.bf16.msrb.mxu2 %v4989_v36  ;;  %v4956_v54 = vld [vmem:[#allocation2 + $0x620] sm:$0xf]  ;;  %v6348_v60 = vld [vmem:[#allocation2 + $0x40c] sm:$0xf0]  ;;  %v4829_v63 = vor.u32 %v6384_v53, %v4828_v51  ;;  %v4798_v23 = vld [vmem:[#allocation2 + $0x4f0] sm:$0xf0] }
  0x49   :  { %1573 = vmatpush.bf16.msrb.mxu3 %v4225_v40  ;;  %v4684_v58 = vld [vmem:[#allocation2 + $0x400] sm:$0xf]  ;;  %v6380_v62 = vld [vmem:[#allocation2 + $0x50c] sm:$0xf0]  ;;  %v4957_v0 = vor.u32 %v6416_v55, %v4956_v54  ;;  %v6274_v30 = vld [vmem:[#allocation2 + $0x1c4] sm:$0xf]  ;;  %v4801_v33 = vor.u32 %v6374_v22, %v4798_v23 }
  0x4a   :  { %1535 = vmatpush.bf16.msrb.mxu0 %v4717_v46  ;;  %v4812_v61 = vld [vmem:[#allocation2 + $0x500] sm:$0xf]  ;;  %v6412_v2 = vld [vmem:[#allocation2 + $0x60c] sm:$0xf0]  ;;  %v4685_v13 = vor.u32 %v6348_v60, %v4684_v58  ;;  %v4398_v31 = vld [vmem:[#allocation2 + $0x1d0] sm:$0xf0] }
  0x4b   :  { %1548 = vmatpush.bf16.msrb.mxu1 %v4845_v47  ;;  %v4940_v1 = vld [vmem:[#allocation2 + $0x600] sm:$0xf]  ;;  %v97_v9 = vld [vmem:[%s7142_s0 + $0x10] sm:$0xff]  ;;  %v4813_v18 = vor.u32 %v6380_v62, %v4812_v61  ;;  %v6338_v35 = vld [vmem:[#allocation2 + $0x3c4] sm:$0xf]  ;;  %v4401_v42 = vor.u32 %v6274_v30, %v4398_v31 }
  0x4c   :  { %1561 = vmatpush.bf16.msrb.mxu2 %v4973_v48  ;;  %v4941_v19 = vor.u32 %v6412_v2, %v4940_v1  ;;  %v341_v24 = vunpack.c.l.b16 %v97_v9  ;;  %v342_v25 = vunpack.c.h.b16 %v97_v9  ;;  %v4526_v34 = vld [vmem:[#allocation2 + $0x2d0] sm:$0xf0]  ;;  %v6370_v38 = vld [vmem:[#allocation2 + $0x4c4] sm:$0xf] }
  0x4d   :  { %1574 = vmatpush.bf16.msrb.mxu3 %v4209_v52  ;;  %v4654_v36 = vld [vmem:[#allocation2 + $0x3d0] sm:$0xf0]  ;;  %v4529_v43 = vor.u32 %v6306_v32, %v4526_v34  ;;  %v6302_v47 = vld [vmem:[#allocation2 + $0x2a4] sm:$0xf] }
  0x4e   :  { %1536 = vmatpush.bf16.msrb.mxu0 %v4701_v59  ;;  %v4782_v39 = vld [vmem:[#allocation2 + $0x4d0] sm:$0xf0]  ;;  %v6938_v40 = vpack.c.b16 %v341_v24, %v341_v24  ;;  %v6940_v41 = vpack.c.b16 %v342_v25, %v342_v25  ;;  %v4657_v44 = vor.u32 %v6338_v35, %v4654_v36  ;;  %v6334_v50 = vld [vmem:[#allocation2 + $0x3a4] sm:$0xf] }
  0x4f   :  { %1549 = vmatpush.bf16.msrb.mxu1 %v4829_v63  ;;  %v4382_v46 = vld [vmem:[#allocation2 + $0x1b0] sm:$0xf0]  ;;  %v4785_v48 = vor.u32 %v6370_v38, %v4782_v39  ;;  %v6366_v52 = vld [vmem:[#allocation2 + $0x4a4] sm:$0xf] }
  0x50   :  { %1562 = vmatpush.bf16.msrb.mxu2 %v4957_v0  ;;  %v4510_v49 = vld [vmem:[#allocation2 + $0x2b0] sm:$0xf0]  ;;  %v4385_v54 = vor.u32 %v6270_v45, %v4382_v46  ;;  %v6266_v57 = vld [vmem:[#allocation2 + $0x184] sm:$0xf] }
  0x51   :  { %1575 = vmatpush.bf16.msrb.mxu3 %v4193_v5  ;;  %v4638_v51 = vld [vmem:[#allocation2 + $0x3b0] sm:$0xf0]  ;;  %v4513_v55 = vor.u32 %v6302_v47, %v4510_v49  ;;  %v6298_v59 = vld [vmem:[#allocation2 + $0x284] sm:$0xf] }
  0x52   :  { %1537 = vmatpush.bf16.msrb.mxu0 %v4685_v13  ;;  %v4766_v53 = vld [vmem:[#allocation2 + $0x4b0] sm:$0xf0]  ;;  %v4641_v56 = vor.u32 %v6334_v50, %v4638_v51  ;;  %v6330_v62 = vld [vmem:[#allocation2 + $0x384] sm:$0xf] }
  0x53   :  { %1550 = vmatpush.bf16.msrb.mxu1 %v4813_v18  ;;  %v4366_v58 = vld [vmem:[#allocation2 + $0x190] sm:$0xf0]  ;;  %v4769_v60 = vor.u32 %v6366_v52, %v4766_v53  ;;  %v6362_v0 = vld [vmem:[#allocation2 + $0x484] sm:$0xf] }
  0x54   :  { %1563 = vmatpush.bf16.msrb.mxu2 %v4941_v19  ;;  %v4494_v61 = vld [vmem:[#allocation2 + $0x290] sm:$0xf0]  ;;  %v4369_v2 = vor.u32 %v6266_v57, %v4366_v58  ;;  %v6262_v7 = vld [vmem:[#allocation2 + $0x164] sm:$0xf] }
  0x55   :  { %1576 = vmatpush.bf16.msrb.mxu3 %v4177_v26  ;;  %1538 = vmatmul.bf16.vlgmr.msrb.gmra.mxu0 %v6938_v40  ;;  %v4622_v63 = vld [vmem:[#allocation2 + $0x390] sm:$0xf0]  ;;  %v4497_v3 = vor.u32 %v6298_v59, %v4494_v61  ;;  %v6294_v9 = vld [vmem:[#allocation2 + $0x264] sm:$0xf] }
  0x56   :  { %1582 = vmatpush.bf16.msra.mxu0 %v4417_v27  ;;  %1551 = vmatmul.bf16.vlgmr.msrb.gmra.mxu1 %v6940_v41  ;;  %v4750_v1 = vld [vmem:[#allocation2 + $0x490] sm:$0xf0]  ;;  %v4625_v5 = vor.u32 %v6330_v62, %v4622_v63  ;;  %v6326_v12 = vld [vmem:[#allocation2 + $0x364] sm:$0xf]  ;;  %v4292_v62 = vld [vmem:[#allocation2 + $0xe8] sm:$0xf] }
  0x57   :  { %1595 = vmatpush.bf16.msra.mxu1 %v4545_v28  ;;  %1564 = vmatmul.bf16.vlgmr.msrb.gmra.mxu2 %v6936_v37  ;;  %v4350_v8 = vld [vmem:[#allocation2 + $0x170] sm:$0xf0]  ;;  %v4753_v10 = vor.u32 %v6362_v0, %v4750_v1  ;;  %v6358_v14 = vld [vmem:[#allocation2 + $0x464] sm:$0xf]  ;;  %v6249_v63 = vld [vmem:[#allocation2 + $0xf4] sm:$0xf0] }
  0x58   :  { %1608 = vmatpush.bf16.msra.mxu2 %v4673_v29  ;;  %1577 = vmatmul.bf16.vlgmr.msrb.gmra.mxu3 %v6923_v20  ;;  %v4478_v11 = vld [vmem:[#allocation2 + $0x270] sm:$0xf0]  ;;  %v4353_v16 = vor.u32 %v6262_v7, %v4350_v8  ;;  %v6258_v19 = vld [vmem:[#allocation2 + $0x144] sm:$0xf] }
  0x59   :  { %1621 = vmatpush.bf16.msra.mxu3 %v4801_v33  ;;  %v4606_v13 = vld [vmem:[#allocation2 + $0x370] sm:$0xf0]  ;;  %v4481_v17 = vor.u32 %v6294_v9, %v4478_v11  ;;  %v6290_v23 = vld [vmem:[#allocation2 + $0x244] sm:$0xf]  ;;  %v4293_v9 = vor.u32 %v6249_v63, %v4292_v62 }
  0x5a   :  { %1583 = vmatpush.bf16.msra.mxu0 %v4401_v42  ;;  %v4734_v15 = vld [vmem:[#allocation2 + $0x470] sm:$0xf0]  ;;  %v4609_v18 = vor.u32 %v6326_v12, %v4606_v13  ;;  %v6322_v26 = vld [vmem:[#allocation2 + $0x344] sm:$0xf] }
  0x5b   :  { %1596 = vmatpush.bf16.msra.mxu1 %v4529_v43  ;;  %v4334_v22 = vld [vmem:[#allocation2 + $0x150] sm:$0xf0]  ;;  %v4737_v24 = vor.u32 %v6358_v14, %v4734_v15  ;;  %v6354_v28 = vld [vmem:[#allocation2 + $0x444] sm:$0xf]  ;;  %v4276_v15 = vld [vmem:[#allocation2 + $0xc8] sm:$0xf] }
  0x5c   :  { %1609 = vmatpush.bf16.msra.mxu2 %v4657_v44  ;;  %v4462_v25 = vld [vmem:[#allocation2 + $0x250] sm:$0xf0]  ;;  %v4337_v30 = vor.u32 %v6258_v19, %v4334_v22  ;;  %v6254_v33 = vld [vmem:[#allocation2 + $0x124] sm:$0xf] }
  0x5d   :  { %1622 = vmatpush.bf16.msra.mxu3 %v4785_v48  ;;  %v4590_v27 = vld [vmem:[#allocation2 + $0x350] sm:$0xf0]  ;;  %v4465_v31 = vor.u32 %v6290_v23, %v4462_v25  ;;  %v6286_v35 = vld [vmem:[#allocation2 + $0x224] sm:$0xf] }
  0x5e   :  { %1584 = vmatpush.bf16.msra.mxu0 %v4385_v54  ;;  %v4718_v29 = vld [vmem:[#allocation2 + $0x450] sm:$0xf0]  ;;  %v4593_v32 = vor.u32 %v6322_v26, %v4590_v27  ;;  %v6318_v39 = vld [vmem:[#allocation2 + $0x324] sm:$0xf] }
  0x5f   :  { %1597 = vmatpush.bf16.msra.mxu1 %v4513_v55  ;;  %v4318_v34 = vld [vmem:[#allocation2 + $0x130] sm:$0xf0]  ;;  %v4721_v36 = vor.u32 %v6354_v28, %v4718_v29  ;;  %v6350_v43 = vld [vmem:[#allocation2 + $0x424] sm:$0xf]  ;;  %v4260_v29 = vld [vmem:[#allocation2 + $0xa8] sm:$0xf] }
  0x60   :  { %1610 = vmatpush.bf16.msra.mxu2 %v4641_v56  ;;  %v4446_v38 = vld [vmem:[#allocation2 + $0x230] sm:$0xf0]  ;;  %v4321_v45 = vor.u32 %v6254_v33, %v4318_v34  ;;  %v6250_v46 = vld [vmem:[#allocation2 + $0x104] sm:$0xf] }
  0x61   :  { %1623 = vmatpush.bf16.msra.mxu3 %v4769_v60  ;;  %v4574_v42 = vld [vmem:[#allocation2 + $0x330] sm:$0xf0]  ;;  %v4449_v48 = vor.u32 %v6286_v35, %v4446_v38  ;;  %v6282_v50 = vld [vmem:[#allocation2 + $0x204] sm:$0xf] }
  0x62   :  { %1585 = vmatpush.bf16.msra.mxu0 %v4369_v2  ;;  %v4702_v44 = vld [vmem:[#allocation2 + $0x430] sm:$0xf0]  ;;  %v4577_v49 = vor.u32 %v6318_v39, %v4574_v42  ;;  %v6314_v52 = vld [vmem:[#allocation2 + $0x304] sm:$0xf]  ;;  %v4420_v2 = vld [vmem:[#allocation2 + $0x1e8] sm:$0xf] }
  0x63   :  { %1598 = vmatpush.bf16.msra.mxu1 %v4497_v3  ;;  %v4302_v47 = vld [vmem:[#allocation2 + $0x110] sm:$0xf0]  ;;  %v4705_v53 = vor.u32 %v6350_v43, %v4702_v44  ;;  %v6346_v55 = vld [vmem:[#allocation2 + $0x404] sm:$0xf]  ;;  %v6281_v3 = vld [vmem:[#allocation2 + $0x1f4] sm:$0xf0] }
  0x64   :  { %1611 = vmatpush.bf16.msra.mxu2 %v4625_v5  ;;  %v4430_v51 = vld [vmem:[#allocation2 + $0x210] sm:$0xf0]  ;;  %v6406_v57 = vld [vmem:[#allocation2 + $0x5e4] sm:$0xf]  ;;  %v4305_v60 = vor.u32 %v6250_v46, %v4302_v47  ;;  %v4421_v13 = vor.u32 %v6281_v3, %v4420_v2  ;;  %v4244_v44 = vld [vmem:[#allocation2 + $0x88] sm:$0xf] }
  0x65   :  { %1624 = vmatpush.bf16.msra.mxu3 %v4753_v10  ;;  %v4558_v54 = vld [vmem:[#allocation2 + $0x310] sm:$0xf0]  ;;  %v6438_v59 = vld [vmem:[#allocation2 + $0x6e4] sm:$0xf]  ;;  %v4433_v0 = vor.u32 %v6282_v50, %v4430_v51  ;;  %v4372_v46 = vld [vmem:[#allocation2 + $0x188] sm:$0xf] }
  0x66   :  { %1586 = vmatpush.bf16.msra.mxu0 %v4353_v16  ;;  %v4686_v56 = vld [vmem:[#allocation2 + $0x410] sm:$0xf0]  ;;  %v4561_v1 = vor.u32 %v6314_v52, %v4558_v54  ;;  %v6402_v10 = vld [vmem:[#allocation2 + $0x5c4] sm:$0xf]  ;;  %v6245_v16 = vld [vmem:[#allocation2 + $0xd4] sm:$0xf0] }
  0x67   :  { %1599 = vmatpush.bf16.msra.mxu1 %v4481_v17  ;;  %v4926_v58 = vld [vmem:[#allocation2 + $0x5f0] sm:$0xf0]  ;;  %v4689_v5 = vor.u32 %v6346_v55, %v4686_v56  ;;  %v6434_v12 = vld [vmem:[#allocation2 + $0x6c4] sm:$0xf]  ;;  %v4404_v17 = vld [vmem:[#allocation2 + $0x1c8] sm:$0xf]  ;;  %v4277_v23 = vor.u32 %v6245_v16, %v4276_v15 }
  0x68   :  { %1612 = vmatpush.bf16.msra.mxu2 %v4609_v18  ;;  %v5054_v61 = vld [vmem:[#allocation2 + $0x6f0] sm:$0xf0]  ;;  %v4929_v7 = vor.u32 %v6406_v57, %v4926_v58  ;;  %v6277_v18 = vld [vmem:[#allocation2 + $0x1d4] sm:$0xf0]  ;;  %v6430_v26 = vld [vmem:[#allocation2 + $0x6a4] sm:$0xf] }
  0x69   :  { %1625 = vmatpush.bf16.msra.mxu3 %v4737_v24  ;;  %v5057_v8 = vor.u32 %v6438_v59, %v5054_v61  ;;  %v4910_v11 = vld [vmem:[#allocation2 + $0x5d0] sm:$0xf0]  ;;  %v6398_v24 = vld [vmem:[#allocation2 + $0x5a4] sm:$0xf]  ;;  %v4405_v27 = vor.u32 %v6277_v18, %v4404_v17  ;;  %v6269_v47 = vld [vmem:[#allocation2 + $0x194] sm:$0xf0] }
  0x6a   :  { %1587 = vmatpush.bf16.msra.mxu0 %v4337_v30  ;;  %v5038_v14 = vld [vmem:[#allocation2 + $0x6d0] sm:$0xf0]  ;;  %v4913_v19 = vor.u32 %v6402_v10, %v4910_v11  ;;  %v6241_v30 = vld [vmem:[#allocation2 + $0xb4] sm:$0xf0]  ;;  %v6426_v39 = vld [vmem:[#allocation2 + $0x684] sm:$0xf]  ;;  %v4373_v54 = vor.u32 %v6269_v47, %v4372_v46 }
  0x6b   :  { %1600 = vmatpush.bf16.msra.mxu1 %v4465_v31  ;;  %v5041_v22 = vor.u32 %v6434_v12, %v5038_v14  ;;  %v4894_v25 = vld [vmem:[#allocation2 + $0x5b0] sm:$0xf0]  ;;  %v4388_v31 = vld [vmem:[#allocation2 + $0x1a8] sm:$0xf]  ;;  %v4261_v35 = vor.u32 %v6241_v30, %v4260_v29  ;;  %v6390_v51 = vld [vmem:[#allocation2 + $0x564] sm:$0xf] }
  0x6c   :  { %1613 = vmatpush.bf16.msra.mxu2 %v4593_v32  ;;  %v5022_v28 = vld [vmem:[#allocation2 + $0x6b0] sm:$0xf0]  ;;  %v6273_v32 = vld [vmem:[#allocation2 + $0x1b4] sm:$0xf0]  ;;  %v4897_v33 = vor.u32 %v6398_v24, %v4894_v25  ;;  %v4228_v56 = vld [vmem:[#allocation2 + $0x68] sm:$0xf] }
  0x6d   :  { %1626 = vmatpush.bf16.msra.mxu3 %v4721_v36  ;;  %v5025_v34 = vor.u32 %v6430_v26, %v5022_v28  ;;  %v6394_v36 = vld [vmem:[#allocation2 + $0x584] sm:$0xf]  ;;  %v4878_v38 = vld [vmem:[#allocation2 + $0x590] sm:$0xf0]  ;;  %v4389_v42 = vor.u32 %v6273_v32, %v4388_v31  ;;  %v6233_v57 = vld [vmem:[#allocation2 + $0x74] sm:$0xf0] }
  0x6e   :  { %1588 = vmatpush.bf16.msra.mxu0 %v4321_v45  ;;  %v5006_v43 = vld [vmem:[#allocation2 + $0x690] sm:$0xf0]  ;;  %v6237_v45 = vld [vmem:[#allocation2 + $0x94] sm:$0xf0]  ;;  %v4356_v58 = vld [vmem:[#allocation2 + $0x168] sm:$0xf]  ;;  %v4229_v62 = vor.u32 %v6233_v57, %v4228_v56 }
  0x6f   :  { %1601 = vmatpush.bf16.msra.mxu1 %v4449_v48  ;;  %v4881_v48 = vor.u32 %v6394_v36, %v4878_v38  ;;  %v4245_v50 = vor.u32 %v6237_v45, %v4244_v44  ;;  %v4862_v52 = vld [vmem:[#allocation2 + $0x570] sm:$0xf0]  ;;  %v6265_v59 = vld [vmem:[#allocation2 + $0x174] sm:$0xf0]  ;;  %v6386_v63 = vld [vmem:[#allocation2 + $0x544] sm:$0xf] }
  0x70   :  { %1614 = vmatpush.bf16.msra.mxu2 %v4577_v49  ;;  %v5009_v49 = vor.u32 %v6426_v39, %v5006_v43  ;;  %v4990_v55 = vld [vmem:[#allocation2 + $0x670] sm:$0xf0]  ;;  %v4357_v2 = vor.u32 %v6265_v59, %v4356_v58  ;;  %v6414_v15 = vld [vmem:[#allocation2 + $0x624] sm:$0xf]  ;;  %v4196_v18 = vld [vmem:[#allocation2 + $0x28] sm:$0xf] }
  0x71   :  { %1627 = vmatpush.bf16.msra.mxu3 %v4705_v53  ;;  %v6422_v53 = vld [vmem:[#allocation2 + $0x664] sm:$0xf]  ;;  %v4974_v3 = vld [vmem:[#allocation2 + $0x650] sm:$0xf0]  ;;  %v4180_v31 = vld [vmem:[#allocation2 + $0x8] sm:$0xf] }
  0x72   :  { %1589 = vmatpush.bf16.msra.mxu0 %v4305_v60  ;;  %v4865_v60 = vor.u32 %v6390_v51, %v4862_v52  ;;  %v4993_v61 = vor.u32 %v6422_v53, %v4990_v55  ;;  %v4830_v14 = vld [vmem:[#allocation2 + $0x530] sm:$0xf0]  ;;  %v6378_v25 = vld [vmem:[#allocation2 + $0x504] sm:$0xf]  ;;  %v4548_v36 = vld [vmem:[#allocation2 + $0x2e8] sm:$0xf] }
  0x73   :  { %1602 = vmatpush.bf16.msra.mxu1 %v4433_v0  ;;  %v4846_v0 = vld [vmem:[#allocation2 + $0x550] sm:$0xf0]  ;;  %v6410_v29 = vld [vmem:[#allocation2 + $0x604] sm:$0xf]  ;;  %v6313_v38 = vld [vmem:[#allocation2 + $0x2f4] sm:$0xf0] }
  0x74   :  { %1615 = vmatpush.bf16.msra.mxu2 %v4561_v1  ;;  %v6418_v1 = vld [vmem:[#allocation2 + $0x644] sm:$0xf]  ;;  %v4849_v10 = vor.u32 %v6386_v63, %v4846_v0  ;;  %v4958_v17 = vld [vmem:[#allocation2 + $0x630] sm:$0xf0]  ;;  %v4676_v39 = vld [vmem:[#allocation2 + $0x3e8] sm:$0xf]  ;;  %v4549_v51 = vor.u32 %v6313_v38, %v4548_v36 }
  0x75   :  { %1628 = vmatpush.bf16.msra.mxu3 %v4689_v5  ;;  %1590 = vmatmul.bf16.vlgmr.msra.gmra.mxu0 %v6925_v21  ;;  %v4212_v5 = vld [vmem:[#allocation2 + $0x48] sm:$0xf]  ;;  %v4977_v11 = vor.u32 %v6418_v1, %v4974_v3  ;;  %v4814_v26 = vld [vmem:[#allocation2 + $0x510] sm:$0xf0]  ;;  %v6345_v43 = vld [vmem:[#allocation2 + $0x3f4] sm:$0xf0] }
  0x76   :  { %1634 = vmatpush.bf16.msrb.mxu0 %v4929_v7  ;;  %1603 = vmatmul.bf16.vlgmr.msra.gmra.mxu1 %v6915_v4  ;;  %v6229_v7 = vld [vmem:[#allocation2 + $0x54] sm:$0xf0]  ;;  %v4942_v30 = vld [vmem:[#allocation2 + $0x610] sm:$0xf0]  ;;  %v4804_v44 = vld [vmem:[#allocation2 + $0x4e8] sm:$0xf]  ;;  %v4677_v52 = vor.u32 %v6345_v43, %v4676_v39 }
  0x77   :  { %1647 = vmatpush.bf16.msrb.mxu1 %v5057_v8  ;;  %1616 = vmatmul.bf16.vlgmr.msra.gmra.mxu2 %v6920_v6  ;;  %v4340_v8 = vld [vmem:[#allocation2 + $0x148] sm:$0xf]  ;;  %v4213_v12 = vor.u32 %v6229_v7, %v4212_v5  ;;  %v6377_v45 = vld [vmem:[#allocation2 + $0x4f4] sm:$0xf0]  ;;  %v4945_v46 = vor.u32 %v6410_v29, %v4942_v30 }
  0x78   :  { %1660 = vmatpush.bf16.msrb.mxu2 %v4293_v9  ;;  %1629 = vmatmul.bf16.vlgmr.msra.gmra.mxu3 %v6938_v40  ;;  %v6261_v9 = vld [vmem:[#allocation2 + $0x154] sm:$0xf0]  ;;  %v4805_v53 = vor.u32 %v6377_v45, %v4804_v44  ;;  %v4660_v56 = vld [vmem:[#allocation2 + $0x3c8] sm:$0xf] }
  0x79   :  { %1673 = vmatpush.bf16.msrb.mxu3 %v4421_v13  ;;  %v6382_v13 = vld [vmem:[#allocation2 + $0x524] sm:$0xf]  ;;  %v4341_v16 = vor.u32 %v6261_v9, %v4340_v8  ;;  %v6309_v55 = vld [vmem:[#allocation2 + $0x2d4] sm:$0xf0]  ;;  %v4788_v59 = vld [vmem:[#allocation2 + $0x4c8] sm:$0xf] }
  0x7a   :  { %1635 = vmatpush.bf16.msrb.mxu0 %v4913_v19  ;;  %v6225_v19 = vld [vmem:[#allocation2 + $0x34] sm:$0xf0]  ;;  %v4833_v24 = vor.u32 %v6382_v13, %v4830_v14  ;;  %v4644_v5 = vld [vmem:[#allocation2 + $0x3a8] sm:$0xf] }
  0x7b   :  { %1648 = vmatpush.bf16.msrb.mxu1 %v5041_v22  ;;  %v4324_v22 = vld [vmem:[#allocation2 + $0x128] sm:$0xf]  ;;  %v4197_v28 = vor.u32 %v6225_v19, %v4196_v18  ;;  %v6341_v58 = vld [vmem:[#allocation2 + $0x3d4] sm:$0xf0] }
  0x7c   :  { %1661 = vmatpush.bf16.msrb.mxu2 %v4277_v23  ;;  %v6257_v23 = vld [vmem:[#allocation2 + $0x134] sm:$0xf0]  ;;  %v4661_v0 = vor.u32 %v6341_v58, %v4660_v56  ;;  %v4772_v9 = vld [vmem:[#allocation2 + $0x4a8] sm:$0xf] }
  0x7d   :  { %1674 = vmatpush.bf16.msrb.mxu3 %v4405_v27  ;;  %v4961_v27 = vor.u32 %v6414_v15, %v4958_v17  ;;  %v4325_v32 = vor.u32 %v6257_v23, %v4324_v22  ;;  %v6305_v3 = vld [vmem:[#allocation2 + $0x2b4] sm:$0xf0]  ;;  %v4628_v18 = vld [vmem:[#allocation2 + $0x388] sm:$0xf] }
  0x7e   :  { %1636 = vmatpush.bf16.msrb.mxu0 %v4897_v33  ;;  %v6221_v33 = vld [vmem:[#allocation2 + $0x14] sm:$0xf0]  ;;  %v4756_v23 = vld [vmem:[#allocation2 + $0x488] sm:$0xf] }
  0x7f   :  { %1649 = vmatpush.bf16.msrb.mxu1 %v5025_v34  ;;  %v4308_v34 = vld [vmem:[#allocation2 + $0x108] sm:$0xf]  ;;  %v4181_v47 = vor.u32 %v6221_v33, %v4180_v31  ;;  %v6337_v8 = vld [vmem:[#allocation2 + $0x3b4] sm:$0xf0] }
  0x80   :  { %1662 = vmatpush.bf16.msrb.mxu2 %v4261_v35  ;;  %v6253_v35 = vld [vmem:[#allocation2 + $0x114] sm:$0xf0]  ;;  %v4645_v14 = vor.u32 %v6337_v8, %v4644_v5  ;;  %v4484_v30 = vld [vmem:[#allocation2 + $0x268] sm:$0xf] }
  0x81   :  { %1675 = vmatpush.bf16.msrb.mxu3 %v4389_v42  ;;  %v4817_v42 = vor.u32 %v6378_v25, %v4814_v26  ;;  %v6301_v17 = vld [vmem:[#allocation2 + $0x294] sm:$0xf0]  ;;  %v4884_v25 = vld [vmem:[#allocation2 + $0x588] sm:$0xf] }
  0x82   :  { %1637 = vmatpush.bf16.msrb.mxu0 %v4881_v48  ;;  %v4932_v48 = vld [vmem:[#allocation2 + $0x5e8] sm:$0xf]  ;;  %v6333_v22 = vld [vmem:[#allocation2 + $0x394] sm:$0xf0] }
  0x83   :  { %1650 = vmatpush.bf16.msrb.mxu1 %v5009_v49  ;;  %v6409_v49 = vld [vmem:[#allocation2 + $0x5f4] sm:$0xf0]  ;;  %v4868_v38 = vld [vmem:[#allocation2 + $0x568] sm:$0xf] }
  0x84   :  { %1663 = vmatpush.bf16.msrb.mxu2 %v4245_v50  ;;  %v4309_v50 = vor.u32 %v6253_v35, %v4308_v34  ;;  %v4933_v57 = vor.u32 %v6409_v49, %v4932_v48  ;;  %v6397_v26 = vld [vmem:[#allocation2 + $0x594] sm:$0xf0]  ;;  %v4740_v35 = vld [vmem:[#allocation2 + $0x468] sm:$0xf] }
  0x85   :  { %1676 = vmatpush.bf16.msrb.mxu3 %v4373_v54  ;;  %v4532_v54 = vld [vmem:[#allocation2 + $0x2c8] sm:$0xf]  ;;  %v6297_v31 = vld [vmem:[#allocation2 + $0x274] sm:$0xf0]  ;;  %v4885_v33 = vor.u32 %v6397_v26, %v4884_v25 }
  0x86   :  { %1638 = vmatpush.bf16.msrb.mxu0 %v4865_v60  ;;  %v6373_v60 = vld [vmem:[#allocation2 + $0x4d4] sm:$0xf0]  ;;  %v4533_v63 = vor.u32 %v6309_v55, %v4532_v54  ;;  %v4468_v45 = vld [vmem:[#allocation2 + $0x248] sm:$0xf] }
  0x87   :  { %1651 = vmatpush.bf16.msrb.mxu1 %v4993_v61  ;;  %v4916_v61 = vld [vmem:[#allocation2 + $0x5c8] sm:$0xf]  ;;  %v4789_v1 = vor.u32 %v6373_v60, %v4788_v59  ;;  %v6329_v34 = vld [vmem:[#allocation2 + $0x374] sm:$0xf0] }
  0x88   :  { %1664 = vmatpush.bf16.msrb.mxu2 %v4229_v62  ;;  %v6405_v62 = vld [vmem:[#allocation2 + $0x5d4] sm:$0xf0]  ;;  %v4580_v59 = vld [vmem:[#allocation2 + $0x328] sm:$0xf] }
  0x89   :  { %1677 = vmatpush.bf16.msrb.mxu3 %v4357_v2  ;;  %v4516_v2 = vld [vmem:[#allocation2 + $0x2a8] sm:$0xf]  ;;  %v4917_v7 = vor.u32 %v6405_v62, %v4916_v61  ;;  %v6361_v36 = vld [vmem:[#allocation2 + $0x474] sm:$0xf0] }
  0x8a   :  { %1639 = vmatpush.bf16.msrb.mxu0 %v4849_v10  ;;  %v6369_v10 = vld [vmem:[#allocation2 + $0x4b4] sm:$0xf0]  ;;  %v4517_v13 = vor.u32 %v6305_v3, %v4516_v2  ;;  %v4741_v44 = vor.u32 %v6361_v36, %v4740_v35  ;;  %v4708_v62 = vld [vmem:[#allocation2 + $0x428] sm:$0xf]  ;;  %v6243_v35 = vld [vmem:[#allocation2 + $0xcc] sm:$0xf] }
  0x8b   :  { %1652 = vmatpush.bf16.msrb.mxu1 %v4977_v11  ;;  %v4900_v11 = vld [vmem:[#allocation2 + $0x5a8] sm:$0xf]  ;;  %v4773_v15 = vor.u32 %v6369_v10, %v4772_v9  ;;  %v6393_v39 = vld [vmem:[#allocation2 + $0x574] sm:$0xf0] }
  0x8c   :  { %1665 = vmatpush.bf16.msrb.mxu2 %v4213_v12  ;;  %v6401_v12 = vld [vmem:[#allocation2 + $0x5b4] sm:$0xf0]  ;;  %v4869_v48 = vor.u32 %v6393_v39, %v4868_v38  ;;  %v4436_v3 = vld [vmem:[#allocation2 + $0x208] sm:$0xf]  ;;  %v4278_v38 = vld [vmem:[#allocation2 + $0xd8] sm:$0xf0] }
  0x8d   :  { %1678 = vmatpush.bf16.msrb.mxu3 %v4341_v16  ;;  %v4500_v16 = vld [vmem:[#allocation2 + $0x288] sm:$0xf]  ;;  %v4901_v19 = vor.u32 %v6401_v12, %v4900_v11  ;;  %v6325_v49 = vld [vmem:[#allocation2 + $0x354] sm:$0xf0]  ;;  %v6275_v39 = vld [vmem:[#allocation2 + $0x1cc] sm:$0xf] }
  0x8e   :  { %1640 = vmatpush.bf16.msrb.mxu0 %v4833_v24  ;;  %v6365_v24 = vld [vmem:[#allocation2 + $0x494] sm:$0xf0]  ;;  %v4564_v9 = vld [vmem:[#allocation2 + $0x308] sm:$0xf] }
  0x8f   :  { %1653 = vmatpush.bf16.msrb.mxu1 %v4961_v27  ;;  %v4501_v27 = vor.u32 %v6301_v17, %v4500_v16  ;;  %v4757_v29 = vor.u32 %v6365_v24, %v4756_v23  ;;  %v6289_v58 = vld [vmem:[#allocation2 + $0x234] sm:$0xf0]  ;;  %v4692_v11 = vld [vmem:[#allocation2 + $0x408] sm:$0xf]  ;;  %v6279_v23 = vld [vmem:[#allocation2 + $0x1ec] sm:$0xf] }
  0x90   :  { %1666 = vmatpush.bf16.msrb.mxu2 %v4197_v28  ;;  %v4629_v28 = vor.u32 %v6333_v22, %v4628_v18  ;;  %v6321_v61 = vld [vmem:[#allocation2 + $0x334] sm:$0xf0]  ;;  %v5060_v16 = vld [vmem:[#allocation2 + $0x6e8] sm:$0xf]  ;;  %v6247_v18 = vld [vmem:[#allocation2 + $0xec] sm:$0xf] }
  0x91   :  { %1679 = vmatpush.bf16.msrb.mxu3 %v4325_v32  ;;  %v4612_v32 = vld [vmem:[#allocation2 + $0x368] sm:$0xf]  ;;  %v6285_v5 = vld [vmem:[#allocation2 + $0x214] sm:$0xf0]  ;;  %v4294_v22 = vld [vmem:[#allocation2 + $0xf8] sm:$0xf0] }
  0x92   :  { %1641 = vmatpush.bf16.msrb.mxu0 %v4817_v42  ;;  %v4485_v42 = vor.u32 %v6297_v31, %v4484_v30  ;;  %v4613_v43 = vor.u32 %v6329_v34, %v4612_v32  ;;  %v6317_v10 = vld [vmem:[#allocation2 + $0x314] sm:$0xf0]  ;;  %v4422_v24 = vld [vmem:[#allocation2 + $0x1f8] sm:$0xf0]  ;;  %v4297_v31 = vor.u32 %v6247_v18, %v4294_v22 }
  0x93   :  { %1654 = vmatpush.bf16.msrb.mxu1 %v4945_v46  ;;  %v6293_v46 = vld [vmem:[#allocation2 + $0x254] sm:$0xf0]  ;;  %v4565_v25 = vor.u32 %v6317_v10, %v4564_v9  ;;  %v4425_v32 = vor.u32 %v6279_v23, %v4422_v24  ;;  %v4996_v10 = vld [vmem:[#allocation2 + $0x668] sm:$0xf]  ;;  %v4486_v18 = vld [vmem:[#allocation2 + $0x278] sm:$0xf0] }
  0x94   :  { %1667 = vmatpush.bf16.msrb.mxu2 %v4181_v47  ;;  %v4596_v47 = vld [vmem:[#allocation2 + $0x348] sm:$0xf]  ;;  %v4469_v54 = vor.u32 %v6293_v46, %v4468_v45  ;;  %v6441_v17 = vld [vmem:[#allocation2 + $0x6f4] sm:$0xf0]  ;;  %v4281_v46 = vor.u32 %v6243_v35, %v4278_v38 }
  0x95   :  { %1680 = vmatpush.bf16.msrb.mxu3 %v4309_v50  ;;  %1642 = vmatmul.bf16.vlgmr.msrb.gmra.mxu0 %v6940_v41  ;;  %v4724_v50 = vld [vmem:[#allocation2 + $0x448] sm:$0xf]  ;;  %v4597_v55 = vor.u32 %v6325_v49, %v4596_v47  ;;  %v5061_v30 = vor.u32 %v6441_v17, %v5060_v16  ;;  %v6437_v34 = vld [vmem:[#allocation2 + $0x6d4] sm:$0xf0]  ;;  %v4358_v16 = vld [vmem:[#allocation2 + $0x178] sm:$0xf0] }
  0x96   :  { %1686 = vmatpush.bf16.msra.mxu0 %v4549_v51  ;;  %1655 = vmatmul.bf16.vlgmr.msrb.gmra.mxu1 %v6936_v37  ;;  %v6357_v51 = vld [vmem:[#allocation2 + $0x454] sm:$0xf0]  ;;  %v6295_v17 = vld [vmem:[#allocation2 + $0x26c] sm:$0xf]  ;;  %v4980_v24 = vld [vmem:[#allocation2 + $0x648] sm:$0xf] }
  0x97   :  { %1699 = vmatpush.bf16.msra.mxu1 %v4677_v52  ;;  %1668 = vmatmul.bf16.vlgmr.msrb.gmra.mxu2 %v6923_v20  ;;  %v4852_v52 = vld [vmem:[#allocation2 + $0x548] sm:$0xf]  ;;  %v4725_v56 = vor.u32 %v6357_v51, %v4724_v50  ;;  %v6433_v49 = vld [vmem:[#allocation2 + $0x6b4] sm:$0xf0]  ;;  %v6239_v50 = vld [vmem:[#allocation2 + $0xac] sm:$0xf] }
  0x98   :  { %1712 = vmatpush.bf16.msra.mxu2 %v4805_v53  ;;  %1681 = vmatmul.bf16.vlgmr.msrb.gmra.mxu3 %v6925_v21  ;;  %v6389_v53 = vld [vmem:[#allocation2 + $0x554] sm:$0xf0] }
  0x99   :  { %1725 = vmatpush.bf16.msra.mxu3 %v4933_v57  ;;  %v4452_v57 = vld [vmem:[#allocation2 + $0x228] sm:$0xf]  ;;  %v4853_v60 = vor.u32 %v6389_v53, %v4852_v52  ;;  %v4262_v52 = vld [vmem:[#allocation2 + $0xb8] sm:$0xf0]  ;;  %v6271_v53 = vld [vmem:[#allocation2 + $0x1ac] sm:$0xf] }
  0x9a   :  { %1687 = vmatpush.bf16.msra.mxu0 %v4533_v63  ;;  %v6353_v63 = vld [vmem:[#allocation2 + $0x434] sm:$0xf0]  ;;  %v4453_v2 = vor.u32 %v6289_v58, %v4452_v57  ;;  %v4265_v58 = vor.u32 %v6239_v50, %v4262_v52  ;;  %v6287_v50 = vld [vmem:[#allocation2 + $0x22c] sm:$0xf] }
  0x9b   :  { %1700 = vmatpush.bf16.msra.mxu1 %v4661_v0  ;;  %v4836_v0 = vld [vmem:[#allocation2 + $0x528] sm:$0xf]  ;;  %v4709_v8 = vor.u32 %v6353_v63, %v4708_v62  ;;  %v6235_v62 = vld [vmem:[#allocation2 + $0x8c] sm:$0xf] }
  0x9c   :  { %1713 = vmatpush.bf16.msra.mxu2 %v4789_v1  ;;  %v6385_v1 = vld [vmem:[#allocation2 + $0x534] sm:$0xf0] }
  0x9d   :  { %1726 = vmatpush.bf16.msra.mxu3 %v4917_v7  ;;  %v4581_v7 = vor.u32 %v6321_v61, %v4580_v59  ;;  %v4837_v12 = vor.u32 %v6385_v1, %v4836_v0  ;;  %v6429_v61 = vld [vmem:[#allocation2 + $0x694] sm:$0xf0]  ;;  %v4246_v0 = vld [vmem:[#allocation2 + $0x98] sm:$0xf0]  ;;  %v6267_v1 = vld [vmem:[#allocation2 + $0x18c] sm:$0xf] }
  0x9e   :  { %1688 = vmatpush.bf16.msra.mxu0 %v4517_v13  ;;  %v6349_v13 = vld [vmem:[#allocation2 + $0x414] sm:$0xf0] }
  0x9f   :  { %1701 = vmatpush.bf16.msra.mxu1 %v4645_v14  ;;  %v4820_v14 = vld [vmem:[#allocation2 + $0x508] sm:$0xf]  ;;  %v4693_v26 = vor.u32 %v6349_v13, %v4692_v11  ;;  %v6425_v11 = vld [vmem:[#allocation2 + $0x674] sm:$0xf0] }
  0xa0   :  { %1714 = vmatpush.bf16.msra.mxu2 %v4773_v15  ;;  %v6381_v15 = vld [vmem:[#allocation2 + $0x514] sm:$0xf0] }
  0xa1   :  { %1727 = vmatpush.bf16.msra.mxu3 %v4901_v19  ;;  %v4437_v19 = vor.u32 %v6285_v5, %v4436_v3  ;;  %v6299_v3 = vld [vmem:[#allocation2 + $0x28c] sm:$0xf]  ;;  %v4502_v5 = vld [vmem:[#allocation2 + $0x298] sm:$0xf0] }
  0xa2   :  { %1689 = vmatpush.bf16.msra.mxu0 %v4501_v27  ;;  %v6311_v27 = vld [vmem:[#allocation2 + $0x2ec] sm:$0xf]  ;;  %v4505_v13 = vor.u32 %v6299_v3, %v4502_v5 }
  0xa3   :  { %1702 = vmatpush.bf16.msra.mxu1 %v4629_v28  ;;  %v4550_v28 = vld [vmem:[#allocation2 + $0x2f8] sm:$0xf0] }
  0xa4   :  { %1715 = vmatpush.bf16.msra.mxu2 %v4757_v29  ;;  %v4821_v29 = vor.u32 %v6381_v15, %v4820_v14  ;;  %v4553_v36 = vor.u32 %v6311_v27, %v4550_v28  ;;  %v4230_v14 = vld [vmem:[#allocation2 + $0x78] sm:$0xf0]  ;;  %v6263_v15 = vld [vmem:[#allocation2 + $0x16c] sm:$0xf]  ;;  %v4489_v27 = vor.u32 %v6295_v17, %v4486_v18 }
  0xa5   :  { %1728 = vmatpush.bf16.msra.mxu3 %v4885_v33  ;;  %v5044_v33 = vld [vmem:[#allocation2 + $0x6c8] sm:$0xf]  ;;  %v4361_v23 = vor.u32 %v6263_v15, %v4358_v16  ;;  %v4214_v28 = vld [vmem:[#allocation2 + $0x58] sm:$0xf0] }
  0xa6   :  { %1690 = vmatpush.bf16.msra.mxu0 %v4485_v42  ;;  %v4406_v42 = vld [vmem:[#allocation2 + $0x1d8] sm:$0xf0]  ;;  %v5045_v45 = vor.u32 %v6437_v34, %v5044_v33 }
  0xa7   :  { %1703 = vmatpush.bf16.msra.mxu1 %v4613_v43  ;;  %v6307_v43 = vld [vmem:[#allocation2 + $0x2cc] sm:$0xf]  ;;  %v4409_v47 = vor.u32 %v6275_v39, %v4406_v42  ;;  %v4964_v39 = vld [vmem:[#allocation2 + $0x628] sm:$0xf]  ;;  %v6417_v42 = vld [vmem:[#allocation2 + $0x634] sm:$0xf0] }
  0xa8   :  { %1716 = vmatpush.bf16.msra.mxu2 %v4741_v44  ;;  %v4534_v44 = vld [vmem:[#allocation2 + $0x2d8] sm:$0xf0]  ;;  %v4965_v52 = vor.u32 %v6417_v42, %v4964_v39  ;;  %v6367_v42 = vld [vmem:[#allocation2 + $0x4ac] sm:$0xf] }
  0xa9   :  { %1729 = vmatpush.bf16.msra.mxu3 %v4869_v48  ;;  %v5028_v48 = vld [vmem:[#allocation2 + $0x6a8] sm:$0xf]  ;;  %v4537_v51 = vor.u32 %v6307_v43, %v4534_v44  ;;  %v6223_v43 = vld [vmem:[#allocation2 + $0x2c] sm:$0xf]  ;;  %v4646_v39 = vld [vmem:[#allocation2 + $0x3b8] sm:$0xf0] }
  0xaa   :  { %1691 = vmatpush.bf16.msra.mxu0 %v4469_v54  ;;  %v4390_v54 = vld [vmem:[#allocation2 + $0x1b8] sm:$0xf0]  ;;  %v5029_v57 = vor.u32 %v6433_v49, %v5028_v48 }
  0xab   :  { %1704 = vmatpush.bf16.msra.mxu1 %v4597_v55  ;;  %v6303_v55 = vld [vmem:[#allocation2 + $0x2ac] sm:$0xf]  ;;  %v4393_v59 = vor.u32 %v6271_v53, %v4390_v54  ;;  %v4326_v48 = vld [vmem:[#allocation2 + $0x138] sm:$0xf0]  ;;  %v4948_v53 = vld [vmem:[#allocation2 + $0x608] sm:$0xf] }
  0xac   :  { %1717 = vmatpush.bf16.msra.mxu2 %v4725_v56  ;;  %v4518_v56 = vld [vmem:[#allocation2 + $0x2b8] sm:$0xf0]  ;;  %v6413_v54 = vld [vmem:[#allocation2 + $0x614] sm:$0xf0] }
  0xad   :  { %1730 = vmatpush.bf16.msra.mxu3 %v4853_v60  ;;  %v5012_v60 = vld [vmem:[#allocation2 + $0x688] sm:$0xf]  ;;  %v4521_v63 = vor.u32 %v6303_v55, %v4518_v56  ;;  %v4949_v5 = vor.u32 %v6413_v54, %v4948_v53  ;;  %v6331_v54 = vld [vmem:[#allocation2 + $0x38c] sm:$0xf] }
  0xae   :  { %1692 = vmatpush.bf16.msra.mxu0 %v4453_v2  ;;  %v4374_v2 = vld [vmem:[#allocation2 + $0x198] sm:$0xf0] }
  0xaf   :  { %1705 = vmatpush.bf16.msra.mxu1 %v4581_v7  ;;  %v5013_v7 = vor.u32 %v6429_v61, %v5012_v60  ;;  %v4377_v9 = vor.u32 %v6267_v1, %v4374_v2  ;;  %v4310_v61 = vld [vmem:[#allocation2 + $0x118] sm:$0xf0]  ;;  %v6375_v2 = vld [vmem:[#allocation2 + $0x4ec] sm:$0xf] }
  0xb0   :  { %1718 = vmatpush.bf16.msra.mxu2 %v4709_v8  ;;  %v4249_v8 = vor.u32 %v6235_v62, %v4246_v0  ;;  %v6283_v62 = vld [vmem:[#allocation2 + $0x20c] sm:$0xf]  ;;  %v4678_v1 = vld [vmem:[#allocation2 + $0x3f8] sm:$0xf0] }
  0xb1   :  { %1731 = vmatpush.bf16.msra.mxu3 %v4837_v12  ;;  %v6231_v12 = vld [vmem:[#allocation2 + $0x6c] sm:$0xf] }
  0xb2   :  { %1693 = vmatpush.bf16.msra.mxu0 %v4437_v19  ;;  %v4997_v19 = vor.u32 %v6425_v11, %v4996_v10  ;;  %v4233_v22 = vor.u32 %v6231_v12, %v4230_v14  ;;  %v6343_v0 = vld [vmem:[#allocation2 + $0x3ec] sm:$0xf]  ;;  %v5062_v14 = vld [vmem:[#allocation2 + $0x6f8] sm:$0xf0] }
  0xb3   :  { %1706 = vmatpush.bf16.msra.mxu1 %v4565_v25  ;;  %v6421_v25 = vld [vmem:[#allocation2 + $0x654] sm:$0xf0]  ;;  %v4681_v17 = vor.u32 %v6343_v0, %v4678_v1  ;;  %v6327_v1 = vld [vmem:[#allocation2 + $0x36c] sm:$0xf] }
  0xb4   :  { %1719 = vmatpush.bf16.msra.mxu2 %v4693_v26  ;;  %v6227_v26 = vld [vmem:[#allocation2 + $0x4c] sm:$0xf]  ;;  %v4981_v34 = vor.u32 %v6421_v25, %v4980_v24  ;;  %v4662_v24 = vld [vmem:[#allocation2 + $0x3d8] sm:$0xf0] }
  0xb5   :  { %1732 = vmatpush.bf16.msra.mxu3 %v4821_v29  ;;  %1694 = vmatmul.bf16.vlgmr.msra.gmra.mxu0 %v6915_v4  ;;  %v6259_v29 = vld [vmem:[#allocation2 + $0x14c] sm:$0xf] }
  0xb6   :  { %1738 = vmatpush.bf16.msrb.mxu0 %v5061_v30  ;;  %1707 = vmatmul.bf16.vlgmr.msra.gmra.mxu1 %v6920_v6  ;;  %v4342_v30 = vld [vmem:[#allocation2 + $0x158] sm:$0xf0]  ;;  %v6371_v25 = vld [vmem:[#allocation2 + $0x4cc] sm:$0xf] }
  0xb7   :  { %1751 = vmatpush.bf16.msrb.mxu1 %v4297_v31  ;;  %1720 = vmatmul.bf16.vlgmr.msra.gmra.mxu2 %v6938_v40  ;;  %v6291_v31 = vld [vmem:[#allocation2 + $0x24c] sm:$0xf]  ;;  %v4345_v38 = vor.u32 %v6259_v29, %v4342_v30  ;;  %v4918_v29 = vld [vmem:[#allocation2 + $0x5d8] sm:$0xf0] }
  0xb8   :  { %1764 = vmatpush.bf16.msrb.mxu2 %v4425_v32  ;;  %1733 = vmatmul.bf16.vlgmr.msra.gmra.mxu3 %v6940_v41  ;;  %v4470_v32 = vld [vmem:[#allocation2 + $0x258] sm:$0xf0]  ;;  %v6435_v30 = vld [vmem:[#allocation2 + $0x6cc] sm:$0xf] }
  0xb9   :  { %1777 = vmatpush.bf16.msrb.mxu3 %v4553_v36  ;;  %v4217_v36 = vor.u32 %v6227_v26, %v4214_v28  ;;  %v6403_v28 = vld [vmem:[#allocation2 + $0x5cc] sm:$0xf] }
  0xba   :  { %1739 = vmatpush.bf16.msrb.mxu0 %v5045_v45  ;;  %v6962_v44 = vpop.f32.mrf.mxu2  ;;  %v4473_v45 = vor.u32 %v6291_v31, %v4470_v32  ;;  %v5046_v31 = vld [vmem:[#allocation2 + $0x6d8] sm:$0xf0] }
  0xbb   :  { %1752 = vmatpush.bf16.msrb.mxu1 %v4281_v46  ;;  %v4198_v46 = vld [vmem:[#allocation2 + $0x38] sm:$0xf0]  ;;  %v6964_v49 = vpop.f32.mrf.mxu3 }
  0xbc   :  { %1765 = vmatpush.bf16.msrb.mxu2 %v4409_v47  ;;  %v6255_v47 = vld [vmem:[#allocation2 + $0x12c] sm:$0xf]  ;;  %v4201_v55 = vor.u32 %v6223_v43, %v4198_v46  ;;  %v5049_v43 = vor.u32 %v6435_v30, %v5046_v31 }
  0xbd   :  { %1778 = vmatpush.bf16.msrb.mxu3 %v4537_v51  ;;  %v4454_v51 = vld [vmem:[#allocation2 + $0x238] sm:$0xf0]  ;;  %v4329_v56 = vor.u32 %v6255_v47, %v4326_v48  ;;  %v6399_v46 = vld [vmem:[#allocation2 + $0x5ac] sm:$0xf] }
  0xbe   :  { %1740 = vmatpush.bf16.msrb.mxu0 %v5029_v57  ;;  %v6958_v33 = vpop.f32.mrf.mxu0  ;;  %v6219_v57 = vld [vmem:[#allocation2 + $0xc] sm:$0xf]  ;;  %v4457_v60 = vor.u32 %v6287_v50, %v4454_v51  ;;  %v4902_v47 = vld [vmem:[#allocation2 + $0x5b8] sm:$0xf0] }
  0xbf   :  { %1753 = vmatpush.bf16.msrb.mxu1 %v4265_v58  ;;  %v6960_v35 = vpop.f32.mrf.mxu1  ;;  %v4182_v58 = vld [vmem:[#allocation2 + $0x18] sm:$0xf0]  ;;  %v6431_v48 = vld [vmem:[#allocation2 + $0x6ac] sm:$0xf]  ;;  %v4905_v53 = vor.u32 %v6399_v46, %v4902_v47 }
  0xc0   :  { %1766 = vmatpush.bf16.msrb.mxu2 %v4393_v59  ;;  %v6251_v59 = vld [vmem:[#allocation2 + $0x10c] sm:$0xf]  ;;  %v4185_v11 = vor.u32 %v6219_v57, %v4182_v58  ;;  %v5030_v50 = vld [vmem:[#allocation2 + $0x6b8] sm:$0xf0] }
  0xc1   :  { %1779 = vmatpush.bf16.msrb.mxu3 %v4521_v63  ;;  %v4438_v63 = vld [vmem:[#allocation2 + $0x218] sm:$0xf0]  ;;  %v4313_v12 = vor.u32 %v6251_v59, %v4310_v61  ;;  %v5033_v57 = vor.u32 %v6431_v48, %v5030_v50  ;;  %v6395_v59 = vld [vmem:[#allocation2 + $0x58c] sm:$0xf] }
  0xc2   :  { %1741 = vmatpush.bf16.msrb.mxu0 %v5013_v7  ;;  %v4806_v7 = vld [vmem:[#allocation2 + $0x4f8] sm:$0xf0]  ;;  %v1515_v15 = vpop.f32.mrf.mxu2  ;;  %v4441_v16 = vor.u32 %v6283_v62, %v4438_v63  ;;  %v6383_v46 = vld [vmem:[#allocation2 + $0x52c] sm:$0xf] }
  0xc3   :  { %1754 = vmatpush.bf16.msrb.mxu1 %v4249_v8  ;;  %v6407_v8 = vld [vmem:[#allocation2 + $0x5ec] sm:$0xf]  ;;  %v1528_v18 = vpop.f32.mrf.mxu3  ;;  %v4758_v58 = vld [vmem:[#allocation2 + $0x498] sm:$0xf0] }
  0xc4   :  { %1767 = vmatpush.bf16.msrb.mxu2 %v4377_v9  ;;  %v4934_v9 = vld [vmem:[#allocation2 + $0x5f8] sm:$0xf0]  ;;  %v6355_v18 = vld [vmem:[#allocation2 + $0x44c] sm:$0xf] }
  0xc5   :  { %1780 = vmatpush.bf16.msrb.mxu3 %v4505_v13  ;;  %v6439_v13 = vld [vmem:[#allocation2 + $0x6ec] sm:$0xf]  ;;  %v5014_v61 = vld [vmem:[#allocation2 + $0x698] sm:$0xf0] }
  0xc6   :  { %1742 = vmatpush.bf16.msrb.mxu0 %v4997_v19  ;;  %v1489_v3 = vpop.f32.mrf.mxu0  ;;  %v4809_v19 = vor.u32 %v6375_v2, %v4806_v7  ;;  %v5065_v26 = vor.u32 %v6439_v13, %v5062_v14  ;;  %v4614_v2 = vld [vmem:[#allocation2 + $0x378] sm:$0xf0]  ;;  %v6415_v48 = vld [vmem:[#allocation2 + $0x62c] sm:$0xf] }
  0xc7   :  { %1755 = vmatpush.bf16.msrb.mxu1 %v4233_v22  ;;  %v1502_v10 = vpop.f32.mrf.mxu1  ;;  %v4937_v22 = vor.u32 %v6407_v8, %v4934_v9  ;;  %v6359_v3 = vld [vmem:[#allocation2 + $0x46c] sm:$0xf]  ;;  %v4742_v7 = vld [vmem:[#allocation2 + $0x478] sm:$0xf0]  ;;  %v4617_v13 = vor.u32 %v6327_v1, %v4614_v2  ;;  %v6472_v1 = vld [vmem:[#allocation4 + $0xec] sm:$0xf0] }
  0xc8   :  { %1768 = vmatpush.bf16.msrb.mxu2 %v4361_v23  ;;  %v6339_v23 = vld [vmem:[#allocation2 + $0x3cc] sm:$0xf]  ;;  %v4870_v9 = vld [vmem:[#allocation2 + $0x578] sm:$0xf0]  ;;  %v4745_v14 = vor.u32 %v6359_v3, %v4742_v7  ;;  %v6504_v7 = vld [vmem:[#allocation4 + $0x1ec] sm:$0xf0] }
  0xc9   :  { %1781 = vmatpush.bf16.msrb.mxu3 %v4489_v27  ;;  %v4790_v27 = vld [vmem:[#allocation2 + $0x4d8] sm:$0xf0]  ;;  %v4665_v32 = vor.u32 %v6339_v23, %v4662_v24  ;;  %v6391_v8 = vld [vmem:[#allocation2 + $0x56c] sm:$0xf] }
  0xca   :  { %1743 = vmatpush.bf16.msrb.mxu0 %v4981_v34  ;;  %v4793_v34 = vor.u32 %v6371_v25, %v4790_v27  ;;  %v6423_v10 = vld [vmem:[#allocation2 + $0x66c] sm:$0xf]  ;;  %v4873_v15 = vor.u32 %v6391_v8, %v4870_v9  ;;  %v4726_v23 = vld [vmem:[#allocation2 + $0x458] sm:$0xf0] }
  0xcb   :  { %1756 = vmatpush.bf16.msrb.mxu1 %v4217_v36  ;;  %v4921_v36 = vor.u32 %v6403_v28, %v4918_v29  ;;  %v6387_v24 = vld [vmem:[#allocation2 + $0x54c] sm:$0xf]  ;;  %v4854_v25 = vld [vmem:[#allocation2 + $0x558] sm:$0xf0] }
  0xcc   :  { %1769 = vmatpush.bf16.msrb.mxu2 %v4345_v38  ;;  %v6335_v38 = vld [vmem:[#allocation2 + $0x3ac] sm:$0xf]  ;;  %v4982_v27 = vld [vmem:[#allocation2 + $0x658] sm:$0xf0] }
  0xcd   :  { %1782 = vmatpush.bf16.msrb.mxu3 %v4473_v45  ;;  %v4774_v45 = vld [vmem:[#allocation2 + $0x4b8] sm:$0xf0]  ;;  %v4649_v51 = vor.u32 %v6335_v38, %v4646_v39  ;;  %v6319_v38 = vld [vmem:[#allocation2 + $0x32c] sm:$0xf] }
  0xce   :  { %1744 = vmatpush.bf16.msrb.mxu0 %v4965_v52  ;;  %v4777_v52 = vor.u32 %v6367_v42, %v4774_v45  ;;  %v4582_v39 = vld [vmem:[#allocation2 + $0x338] sm:$0xf0]  ;;  %v6351_v42 = vld [vmem:[#allocation2 + $0x42c] sm:$0xf] }
  0xcf   :  { %1757 = vmatpush.bf16.msrb.mxu1 %v4201_v55  ;;  %v4630_v55 = vld [vmem:[#allocation2 + $0x398] sm:$0xf0] }
  0xd0   :  { %1770 = vmatpush.bf16.msrb.mxu2 %v4329_v56  ;;  %v6363_v56 = vld [vmem:[#allocation2 + $0x48c] sm:$0xf]  ;;  %v4710_v45 = vld [vmem:[#allocation2 + $0x438] sm:$0xf0] }
  0xd1   :  { %1783 = vmatpush.bf16.msrb.mxu3 %v4457_v60  ;;  %v6427_v60 = vld [vmem:[#allocation2 + $0x68c] sm:$0xf]  ;;  %v4838_v47 = vld [vmem:[#allocation2 + $0x538] sm:$0xf0] }
  0xd2   :  { %1745 = vmatpush.bf16.msrb.mxu0 %v4949_v5  ;;  %v6970_v62 = vpop.f32.mrf.mxu0  ;;  %v5017_v5 = vor.u32 %v6427_v60, %v5014_v61  ;;  %v4966_v50 = vld [vmem:[#allocation2 + $0x638] sm:$0xf0]  ;;  %v6379_v60 = vld [vmem:[#allocation2 + $0x50c] sm:$0xf] }
  0xd3   :  { %1758 = vmatpush.bf16.msrb.mxu1 %v4185_v11  ;;  %v6972_v63 = vpop.f32.mrf.mxu1  ;;  %v4998_v11 = vld [vmem:[#allocation2 + $0x678] sm:$0xf0] }
  0xd4   :  { %1771 = vmatpush.bf16.msrb.mxu2 %v4313_v12  ;;  %v6977_v12 = vld [vmem:[%s7144_s2] sm:$0xf]  ;;  %v4822_v61 = vld [vmem:[#allocation2 + $0x518] sm:$0xf0] }
  0xd5   :  { %1784 = vmatpush.bf16.msrb.mxu3 %v4441_v16  ;;  %1746 = vmatmul.bf16.vlgmr.msrb.gmra.mxu0 %v6936_v37  ;;  %v6323_v16 = vld [vmem:[#allocation2 + $0x34c] sm:$0xf]  ;;  %v325_v29 = vperm.slane %v6977_v12, 0  ;;  %v4825_v9 = vor.u32 %v6379_v60, %v4822_v61  ;;  %v6448_v60 = vld [vmem:[#allocation4 + $0x2c] sm:$0xf0] }
  0xd6   :  { %1790 = vmatpush.bf16.msra.mxu0 %v4681_v17  ;;  %1759 = vmatmul.bf16.vlgmr.msrb.gmra.mxu1 %v6923_v20  ;;  %v4761_v20 = vor.u32 %v6363_v56, %v4758_v58  ;;  %v4598_v17 = vld [vmem:[#allocation2 + $0x358] sm:$0xf0]  ;;  %v6347_v56 = vld [vmem:[#allocation2 + $0x40c] sm:$0xf]  ;;  %v5212_v61 = vld [vmem:[#allocation4 + $0x120] sm:$0xf] }
  0xd7   :  { %1803 = vmatpush.bf16.msra.mxu1 %v4809_v19  ;;  %1772 = vmatmul.bf16.vlgmr.msrb.gmra.mxu2 %v6925_v21  ;;  %v4886_v21 = vld [vmem:[#allocation2 + $0x598] sm:$0xf0]  ;;  %v4601_v30 = vor.u32 %v6323_v16, %v4598_v17  ;;  %v5292_v16 = vld [vmem:[#allocation4 + $0x1c0] sm:$0xf]  ;;  %v6500_v17 = vld [vmem:[#allocation4 + $0x1cc] sm:$0xf0] }
  0xd8   :  { %1816 = vmatpush.bf16.msra.mxu2 %v4937_v22  ;;  %1785 = vmatmul.bf16.vlgmr.msrb.gmra.mxu3 %v6915_v4  ;;  %v4633_v4 = vor.u32 %v6331_v54, %v4630_v55  ;;  %v4889_v0 = vor.u32 %v6395_v59, %v4886_v21  ;;  %v5001_v22 = vor.u32 %v6423_v10, %v4998_v11  ;;  %v4566_v55 = vld [vmem:[#allocation2 + $0x318] sm:$0xf0] }
  0xd9   :  { %1829 = vmatpush.bf16.msra.mxu3 %v5065_v26  ;;  %v6419_v26 = vld [vmem:[#allocation2 + $0x64c] sm:$0xf]  ;;  %v4841_v54 = vor.u32 %v6383_v46, %v4838_v47  ;;  %v1488_v59 = vadd.f32 %v6958_v33, %v325_v29  ;;  %v4969_v21 = vor.u32 %v6415_v48, %v4966_v50  ;;  %v5100_v47 = vld [vmem:[#allocation4 + $0x40] sm:$0xf]  ;;  %v6452_v48 = vld [vmem:[#allocation4 + $0x4c] sm:$0xf0] }
  0xda   :  { %1791 = vmatpush.bf16.msra.mxu0 %v4665_v32  ;;  %v6979_v19 = vpop.f32.mrf.mxu2  ;;  %v1541_v31 = vpop.f32.mrf.mxu0 }
  0xdb   :  { %1804 = vmatpush.bf16.msra.mxu1 %v4793_v34  ;;  %v6981_v28 = vpop.f32.mrf.mxu3  ;;  %v1554_v32 = vpop.f32.mrf.mxu1  ;;  %v4729_v34 = vor.u32 %v6355_v18, %v4726_v23  ;;  %v1501_v10 = vadd.f32 %v6960_v35, %v1488_v59  ;;  %v5293_v35 = vor.u32 %v6500_v17, %v5292_v16  ;;  %v5148_v23 = vld [vmem:[#allocation4 + $0xa0] sm:$0xf]  ;;  %v6460_v31 = vld [vmem:[#allocation4 + $0x8c] sm:$0xf0] }
  0xdc   :  { %1817 = vmatpush.bf16.msra.mxu2 %v4921_v36  ;;  %v4857_v36 = vor.u32 %v6387_v24, %v4854_v25  ;;  %v6464_v24 = vld [vmem:[#allocation4 + $0xac] sm:$0xf0]  ;;  %v5276_v25 = vld [vmem:[#allocation4 + $0x1a0] sm:$0xf] }
  0xdd   :  { %1830 = vmatpush.bf16.msra.mxu3 %v5049_v43  ;;  %v4985_v43 = vor.u32 %v6419_v26, %v4982_v27  ;;  %v1514_v18 = vadd.f32 %v6962_v44, %v1501_v10  ;;  %v6496_v26 = vld [vmem:[#allocation4 + $0x1ac] sm:$0xf0]  ;;  %v5149_v44 = vor.u32 %v6464_v24, %v5148_v23  ;;  %v5196_v10 = vld [vmem:[#allocation4 + $0x100] sm:$0xf] }
  0xde   :  { %1792 = vmatpush.bf16.msra.mxu0 %v4649_v51  ;;  %v4585_v51 = vor.u32 %v6319_v38, %v4582_v39  ;;  %v5277_v29 = vor.u32 %v6496_v26, %v5276_v25  ;;  %v6492_v32 = vld [vmem:[#allocation4 + $0x18c] sm:$0xf0]  ;;  %v5116_v38 = vld [vmem:[#allocation4 + $0x60] sm:$0xf] }
  0xdf   :  { %1805 = vmatpush.bf16.msra.mxu1 %v4777_v52  ;;  %v6315_v52 = vld [vmem:[#allocation2 + $0x30c] sm:$0xf]  ;;  %v1527_v27 = vadd.f32 %v6964_v49, %v1514_v18  ;;  %v6456_v39 = vld [vmem:[#allocation4 + $0x6c] sm:$0xf0]  ;;  %v5244_v49 = vld [vmem:[#allocation4 + $0x160] sm:$0xf] }
  0xe0   :  { %1818 = vmatpush.bf16.msra.mxu2 %v4905_v53  ;;  %v4713_v53 = vor.u32 %v6351_v42, %v4710_v45  ;;  %v4569_v3 = vor.u32 %v6315_v52, %v4566_v55  ;;  %v6488_v42 = vld [vmem:[#allocation4 + $0x16c] sm:$0xf0]  ;;  %v5117_v45 = vor.u32 %v6456_v39, %v5116_v38  ;;  %v5404_v16 = vld [vmem:[#allocation4 + $0x2a0] sm:$0xf]  ;;  %v6502_v18 = vld [vmem:[#allocation4 + $0x1e4] sm:$0xf] }
  0xe1   :  { %1831 = vmatpush.bf16.msra.mxu3 %v5033_v57  ;;  %v4694_v57 = vld [vmem:[#allocation2 + $0x418] sm:$0xf0]  ;;  %v5245_v46 = vor.u32 %v6488_v42, %v5244_v49  ;;  %v6528_v17 = vld [vmem:[#allocation4 + $0x2ac] sm:$0xf0]  ;;  %v6462_v39 = vld [vmem:[#allocation4 + $0xa4] sm:$0xf] }
  0xe2   :  { %1793 = vmatpush.bf16.msra.mxu0 %v4633_v4  ;;  %v1567_v58 = vpop.f32.mrf.mxu2  ;;  %v6411_v4 = vld [vmem:[#allocation2 + $0x60c] sm:$0xf]  ;;  %v4697_v8 = vor.u32 %v6347_v56, %v4694_v57  ;;  %v326_v57 = vperm.slane %v6977_v12, 1  ;;  %v5150_v49 = vld [vmem:[#allocation4 + $0xb0] sm:$0xf0] }
  0xe3   :  { %1806 = vmatpush.bf16.msra.mxu1 %v4761_v20  ;;  %v4950_v20 = vld [vmem:[#allocation2 + $0x618] sm:$0xf0]  ;;  %v1580_v2 = vpop.f32.mrf.mxu3  ;;  %v6494_v42 = vld [vmem:[#allocation4 + $0x1a4] sm:$0xf] }
  0xe4   :  { %1819 = vmatpush.bf16.msra.mxu2 %v4889_v0  ;;  %v5180_v0 = vld [vmem:[#allocation4 + $0xe0] sm:$0xf]  ;;  %v4953_v33 = vor.u32 %v6411_v4, %v4950_v20  ;;  %v6480_v20 = vld [vmem:[#allocation4 + $0x12c] sm:$0xf0] }
  0xe5   :  { %1832 = vmatpush.bf16.msra.mxu3 %v5017_v5  ;;  %v5308_v5 = vld [vmem:[#allocation4 + $0x1e0] sm:$0xf]  ;;  %v5181_v11 = vor.u32 %v6472_v1, %v5180_v0  ;;  %v6532_v1 = vld [vmem:[#allocation4 + $0x2cc] sm:$0xf0] }
  0xe6   :  { %1794 = vmatpush.bf16.msra.mxu0 %v4617_v13  ;;  %v5309_v13 = vor.u32 %v6504_v7, %v5308_v5  ;;  %v5420_v0 = vld [vmem:[#allocation4 + $0x2c0] sm:$0xf]  ;;  %v1579_v5 = vadd.f32 %v6981_v28, %v326_v57  ;;  %v6516_v57 = vld [vmem:[#allocation4 + $0x24c] sm:$0xf0] }
  0xe7   :  { %1807 = vmatpush.bf16.msra.mxu1 %v4745_v14  ;;  %v5164_v14 = vld [vmem:[#allocation4 + $0xc0] sm:$0xf]  ;;  %v5421_v2 = vor.u32 %v6532_v1, %v5420_v0  ;;  %v6486_v0 = vld [vmem:[#allocation4 + $0x164] sm:$0xf]  ;;  %v5246_v1 = vld [vmem:[#allocation4 + $0x170] sm:$0xf0] }
  0xe8   :  { %1820 = vmatpush.bf16.msra.mxu2 %v4873_v15  ;;  %v6468_v15 = vld [vmem:[#allocation4 + $0xcc] sm:$0xf0]  ;;  %v5068_v7 = vld [vmem:[#allocation4] sm:$0xf] }
  0xe9   :  { %1833 = vmatpush.bf16.msra.mxu3 %v5001_v22  ;;  %v5165_v22 = vor.u32 %v6468_v15, %v5164_v14  ;;  %v5182_v14 = vld [vmem:[#allocation4 + $0xf0] sm:$0xf0] }
  0xea   :  { %1795 = vmatpush.bf16.msra.mxu0 %v4601_v30  ;;  %v5132_v30 = vld [vmem:[#allocation4 + $0x80] sm:$0xf] }
  0xeb   :  { %1808 = vmatpush.bf16.msra.mxu1 %v4729_v34  ;;  %v1540_v34 = vadd.f32 %v6970_v62, %v1527_v27  ;;  %v5228_v62 = vld [vmem:[#allocation4 + $0x140] sm:$0xf] }
  0xec   :  { %1821 = vmatpush.bf16.msra.mxu2 %v4857_v36 }
  0xed   :  { %1834 = vmatpush.bf16.msra.mxu3 %v4985_v43  ;;  %v1553_v43 = vadd.f32 %v6972_v63, %v1540_v34  ;;  %v5101_v63 = vor.u32 %v6452_v48, %v5100_v47  ;;  %v5153_v48 = vor.u32 %v6462_v39, %v5150_v49  ;;  %v6474_v39 = vld [vmem:[#allocation4 + $0x104] sm:$0xf] }
  0xee   :  { %1796 = vmatpush.bf16.msra.mxu0 %v4585_v51  ;;  %v6484_v51 = vld [vmem:[#allocation4 + $0x14c] sm:$0xf0] }
  0xef   :  { %1809 = vmatpush.bf16.msra.mxu1 %v4713_v53  ;;  %v5436_v53 = vld [vmem:[#allocation4 + $0x2e0] sm:$0xf]  ;;  %v1566_v56 = vadd.f32 %v6979_v19, %v1553_v43  ;;  %v5229_v59 = vor.u32 %v6484_v51, %v5228_v62  ;;  %v5278_v43 = vld [vmem:[#allocation4 + $0x1b0] sm:$0xf0]  ;;  %v6458_v51 = vld [vmem:[#allocation4 + $0x84] sm:$0xf] }
  0xf0   :  { %1822 = vmatpush.bf16.msra.mxu2 %v4841_v54  ;;  %v6536_v54 = vld [vmem:[#allocation4 + $0x2ec] sm:$0xf0]  ;;  %v5281_v62 = vor.u32 %v6494_v42, %v5278_v43  ;;  %v5198_v42 = vld [vmem:[#allocation4 + $0x110] sm:$0xf0]  ;;  %v5188_v43 = vld [vmem:[#allocation4 + $0xe8] sm:$0xf] }
  0xf1   :  { %1835 = vmatpush.bf16.msra.mxu3 %v4969_v21  ;;  %v5437_v55 = vor.u32 %v6536_v54, %v5436_v53  ;;  %v5084_v21 = vld [vmem:[#allocation4 + $0x20] sm:$0xf]  ;;  %v5134_v53 = vld [vmem:[#allocation4 + $0x90] sm:$0xf0]  ;;  %v6490_v54 = vld [vmem:[#allocation4 + $0x184] sm:$0xf] }
  0xf2   :  { %1797 = vmatpush.bf16.msra.mxu0 %v4569_v3  ;;  %v1591_v36 = vpop.f32.mrf.mxu0  ;;  %v1842_v3 = vmul.f32 0.2, %v1566_v56  ;;  %v5085_v19 = vor.u32 %v6448_v60, %v5084_v21  ;;  %v5137_v21 = vor.u32 %v6458_v51, %v5134_v53 }
  0xf3   :  { %1810 = vmatpush.bf16.msra.mxu1 %v4697_v8  ;;  %v6444_v8 = vld [vmem:[#allocation4 + $0xc] sm:$0xf0]  ;;  %v1592_v23 = vadd.f32 %v1591_v36, %v1579_v5 }
  0xf4   :  { %1823 = vmatpush.bf16.msra.mxu2 %v4825_v9  ;;  %v5213_v9 = vor.u32 %v6480_v20, %v5212_v61  ;;  %v5069_v28 = vor.u32 %v6444_v8, %v5068_v7  ;;  %v1846_v24 = vmax.f32 %v1566_v56, %v1842_v3  ;;  %v5356_v56 = vld [vmem:[#allocation4 + $0x240] sm:$0xf]  ;;  %v5118_v20 = vld [vmem:[#allocation4 + $0x70] sm:$0xf0]  ;;  %v6512_v3 = vld [vmem:[#allocation4 + $0x22c] sm:$0xf0] }
  0xf5   :  { %1836 = vmatpush.bf16.msra.mxu3 %v4953_v33  ;;  %1798 = vmatmul.bf16.vlgmr.msra.gmra.mxu0 %v6920_v6  ;;  %v5260_v6 = vld [vmem:[#allocation4 + $0x180] sm:$0xf]  ;;  %v6476_v33 = vld [vmem:[#allocation4 + $0x10c] sm:$0xf0]  ;;  %v5102_v8 = vld [vmem:[#allocation4 + $0x50] sm:$0xf0] }
  0xf6   :  { %2632 = vmatpush.bf16.msrb.mxu0 %v5181_v11  ;;  %1811 = vmatmul.bf16.vlgmr.msra.gmra.mxu1 %v6938_v40  ;;  %v5133_v40 = vor.u32 %v6460_v31, %v5132_v30  ;;  %v6470_v11 = vld [vmem:[#allocation4 + $0xe4] sm:$0xf]  ;;  %v5197_v25 = vor.u32 %v6476_v33, %v5196_v10  ;;  %v5294_v31 = vld [vmem:[#allocation4 + $0x1d0] sm:$0xf0]  ;;  %v5249_v10 = vor.u32 %v6486_v0, %v5246_v1 }
  0xf7   :  { %2645 = vmatpush.bf16.msrb.mxu1 %v5309_v13  ;;  %1824 = vmatmul.bf16.vlgmr.msra.gmra.mxu2 %v6940_v41  ;;  %v5261_v41 = vor.u32 %v6492_v32, %v5260_v6  ;;  %v5185_v26 = vor.u32 %v6470_v11, %v5182_v14  ;;  %v6498_v30 = vld [vmem:[#allocation4 + $0x1c4] sm:$0xf]  ;;  %v5388_v6 = vld [vmem:[#allocation4 + $0x280] sm:$0xf]  ;;  %v6524_v32 = vld [vmem:[#allocation4 + $0x28c] sm:$0xf0] }
  0xf8   :  { %1837 = vmatmul.bf16.vlgmr.msra.gmra.mxu3 %v6936_v37  ;;  %v6993_v37 = vpop.f32.mrf.mxu1  ;;  %2658 = vmatpush.bf16.msrb.mxu2 %v5437_v55  ;;  %v5297_v38 = vor.u32 %v6498_v30, %v5294_v31  ;;  %v5262_v55 = vld [vmem:[#allocation4 + $0x190] sm:$0xf0]  ;;  %v6482_v33 = vld [vmem:[#allocation4 + $0x144] sm:$0xf]  ;;  %v6508_v14 = vld [vmem:[#allocation4 + $0x20c] sm:$0xf0] }
  0xf9   :  { %v1605_v34 = vadd.f32 %v6993_v37, %v1592_v23  ;;  %v5265_v60 = vor.u32 %v6490_v54, %v5262_v55  ;;  %v5230_v11 = vld [vmem:[#allocation4 + $0x150] sm:$0xf0]  ;;  %v6522_v0 = vld [vmem:[#allocation4 + $0x284] sm:$0xf] }
  0xfa   :  { %2633 = vmatpush.bf16.msrb.mxu0 %v5165_v22  ;;  %v6996_v50 = vpop.f32.mrf.mxu2  ;;  %v1593_v58 = vpop.f32.mrf.mxu0  ;;  %v5310_v22 = vld [vmem:[#allocation4 + $0x1f0] sm:$0xf0] }
  0xfb   :  { %2646 = vmatpush.bf16.msrb.mxu1 %v5293_v35  ;;  %v6998_v52 = vpop.f32.mrf.mxu3  ;;  %v5405_v35 = vor.u32 %v6528_v17, %v5404_v16  ;;  %v5313_v27 = vor.u32 %v6502_v18, %v5310_v22  ;;  %v1618_v37 = vadd.f32 %v6996_v50, %v1605_v34  ;;  %v5357_v58 = vor.u32 %v6516_v57, %v5356_v56  ;;  %v5438_v22 = vld [vmem:[#allocation4 + $0x2f0] sm:$0xf0] }
  0xfc   :  { %2659 = vmatpush.bf16.msrb.mxu2 %v5421_v2  ;;  %v5340_v2 = vld [vmem:[#allocation4 + $0x220] sm:$0xf]  ;;  %v5214_v31 = vld [vmem:[#allocation4 + $0x130] sm:$0xf0] }
  0xfd   :  { %v5406_v54 = vld [vmem:[#allocation4 + $0x2b0] sm:$0xf0] }
  0xfe   :  { %2634 = vmatpush.bf16.msrb.mxu0 %v5149_v44  ;;  %v6466_v44 = vld [vmem:[#allocation4 + $0xc4] sm:$0xf] }
  0xff   :  { %2647 = vmatpush.bf16.msrb.mxu1 %v5277_v29  ;;  %v5166_v29 = vld [vmem:[#allocation4 + $0xd0] sm:$0xf0] }
 0x100   :  { %v1606_v4 = vpop.f32.mrf.mxu1  ;;  %2660 = vmatpush.bf16.msrb.mxu2 %v5405_v35  ;;  %v5169_v36 = vor.u32 %v6466_v44, %v5166_v29  ;;  %v5086_v44 = vld [vmem:[#allocation4 + $0x30] sm:$0xf0]  ;;  %v6478_v29 = vld [vmem:[#allocation4 + $0x124] sm:$0xf] }
 0x101   :  { %v6454_v4 = vld [vmem:[#allocation4 + $0x64] sm:$0xf]  ;;  %v5217_v49 = vor.u32 %v6478_v29, %v5214_v31 }
 0x102   :  { %2635 = vmatpush.bf16.msrb.mxu0 %v5133_v40  ;;  %v1619_v13 = vpop.f32.mrf.mxu2  ;;  %v5389_v40 = vor.u32 %v6524_v32, %v5388_v6  ;;  %v5121_v7 = vor.u32 %v6454_v4, %v5118_v20  ;;  %v6530_v6 = vld [vmem:[#allocation4 + $0x2c4] sm:$0xf]  ;;  %v5422_v32 = vld [vmem:[#allocation4 + $0x2d0] sm:$0xf0]  ;;  %v5548_v4 = vld [vmem:[#allocation4 + $0x3c0] sm:$0xf] }
 0x103   :  { %2648 = vmatpush.bf16.msrb.mxu1 %v5261_v41  ;;  %v1632_v15 = vpop.f32.mrf.mxu3  ;;  %v7004_v41 = vpack.c.bf16 %v1846_v24, %v1846_v24  ;;  %v5324_v13 = vld [vmem:[#allocation4 + $0x200] sm:$0xf]  ;;  %v5425_v34 = vor.u32 %v6530_v6, %v5422_v32  ;;  %v6564_v20 = vld [vmem:[#allocation4 + $0x3cc] sm:$0xf0]  ;;  %v5124_v6 = vld [vmem:[#allocation4 + $0x68] sm:$0xf] }
 0x104   :  { %2661 = vmatpush.bf16.msrb.mxu2 %v5389_v40  ;;  %v6534_v15 = vld [vmem:[#allocation4 + $0x2e4] sm:$0xf]  ;;  %v5325_v18 = vor.u32 %v6508_v14, %v5324_v13  ;;  %v5549_v1 = vor.u32 %v6564_v20, %v5548_v4  ;;  %v5374_v14 = vld [vmem:[#allocation4 + $0x270] sm:$0xf0]  ;;  %v5092_v20 = vld [vmem:[#allocation4 + $0x28] sm:$0xf] }
 0x105   :  { %v5441_v24 = vor.u32 %v6534_v15, %v5438_v22 }
 0x106   :  { %2636 = vmatpush.bf16.msrb.mxu0 %v5117_v45  ;;  %v5372_v45 = vld [vmem:[#allocation4 + $0x260] sm:$0xf] }
 0x107   :  { %2649 = vmatpush.bf16.msrb.mxu1 %v5245_v46  ;;  %v6520_v46 = vld [vmem:[#allocation4 + $0x26c] sm:$0xf0] }
 0x108   :  { %v5373_v47 = vor.u32 %v6520_v46, %v5372_v45  ;;  %v6473_v45 = vld [vmem:[#allocation4 + $0xf4] sm:$0xf0]  ;;  %v5564_v46 = vld [vmem:[#allocation4 + $0x3e0] sm:$0xf] }
 0x10a   :  { %2637 = vmatpush.bf16.msrb.mxu0 %v5101_v63  ;;  %2662 = vmatpush.bf16.msrb.mxu2 %v5373_v47  ;;  %v1631_v63 = vadd.f32 %v6998_v52, %v1618_v37  ;;  %v6450_v52 = vld [vmem:[#allocation4 + $0x44] sm:$0xf]  ;;  %v6568_v37 = vld [vmem:[#allocation4 + $0x3ec] sm:$0xf0] }
 0x10b   :  { %2650 = vmatpush.bf16.msrb.mxu1 %v5229_v59  ;;  %v5105_v35 = vor.u32 %v6450_v52, %v5102_v8  ;;  %v6526_v47 = vld [vmem:[#allocation4 + $0x2a4] sm:$0xf]  ;;  %v5565_v53 = vor.u32 %v6568_v37, %v5564_v46  ;;  %v6465_v52 = vld [vmem:[#allocation4 + $0xb4] sm:$0xf0]  ;;  %v5284_v8 = vld [vmem:[#allocation4 + $0x1a8] sm:$0xf] }
 0x10c   :  { %v5409_v57 = vor.u32 %v6526_v47, %v5406_v54  ;;  %v5342_v37 = vld [vmem:[#allocation4 + $0x230] sm:$0xf0]  ;;  %v327_v47 = vperm.slane %v6977_v12, 2  ;;  %v6453_v54 = vld [vmem:[#allocation4 + $0x54] sm:$0xf0] }
 0x10d   :  { %2671 = vmatpush.bf16.msrb.mxu3 %v5565_v53 }
 0x10e   :  { %2638 = vmatpush.bf16.msrb.mxu0 %v5085_v19  ;;  %2663 = vmatpush.bf16.msrb.mxu2 %v5357_v58  ;;  %v5341_v19 = vor.u32 %v6512_v3, %v5340_v2  ;;  %v5189_v58 = vor.u32 %v6473_v45, %v5188_v43  ;;  %v5390_v2 = vld [vmem:[#allocation4 + $0x290] sm:$0xf0]  ;;  %v6510_v43 = vld [vmem:[#allocation4 + $0x224] sm:$0xf] }
 0x10f   :  { %2651 = vmatpush.bf16.msrb.mxu1 %v5213_v9 }
 0x111   :  { %2672 = vmatpush.bf16.msrb.mxu3 %v5549_v1  ;;  %v5220_v1 = vld [vmem:[#allocation4 + $0x128] sm:$0xf] }
 0x112   :  { %2639 = vmatpush.bf16.msrb.mxu0 %v5069_v28  ;;  %v1643_v59 = vpop.f32.mrf.mxu0  ;;  %2664 = vmatpush.bf16.msrb.mxu2 %v5341_v19  ;;  %v5393_v19 = vor.u32 %v6522_v0, %v5390_v2  ;;  %v6449_v0 = vld [vmem:[#allocation4 + $0x34] sm:$0xf0] }
 0x113   :  { %2652 = vmatpush.bf16.msrb.mxu1 %v5197_v25  ;;  %v1644_v50 = vadd.f32 %v1643_v59, %v1631_v63  ;;  %v1656_v61 = vpop.f32.mrf.mxu1  ;;  %v5201_v63 = vor.u32 %v6474_v39, %v5198_v42  ;;  %v5172_v59 = vld [vmem:[#allocation4 + $0xc8] sm:$0xf]  ;;  %v6552_v42 = vld [vmem:[#allocation4 + $0x36c] sm:$0xf0] }
 0x115   :  { %2640 = vmatmul.bf16.vlgmr.msrb.gmra.mxu0 %v7004_v41  ;;  %v1657_v5 = vadd.f32 %v1656_v61, %v1644_v50  ;;  %v6469_v50 = vld [vmem:[#allocation4 + $0xd4] sm:$0xf0] }
 0x116   :  { %2684 = vmatpush.bf16.msra.mxu0 %v5185_v26  ;;  %v5233_v26 = vor.u32 %v6482_v33, %v5230_v11  ;;  %2665 = vmatpush.bf16.msrb.mxu2 %v5325_v18  ;;  %v6501_v61 = vld [vmem:[#allocation4 + $0x1d4] sm:$0xf0]  ;;  %v5173_v3 = vor.u32 %v6469_v50, %v5172_v59  ;;  %v6560_v33 = vld [vmem:[#allocation4 + $0x3ac] sm:$0xf0]  ;;  %v6518_v11 = vld [vmem:[#allocation4 + $0x264] sm:$0xf] }
 0x117   :  { %2697 = vmatpush.bf16.msra.mxu1 %v5313_v27  ;;  %v1843_v9 = vmul.f32 0.2, %v1657_v5  ;;  %v6446_v27 = vld [vmem:[#allocation4 + $0x24] sm:$0xf]  ;;  %v5377_v18 = vor.u32 %v6518_v11, %v5374_v14  ;;  %v5326_v50 = vld [vmem:[#allocation4 + $0x210] sm:$0xf0] }
 0x118   :  { %v5089_v40 = vor.u32 %v6446_v27, %v5086_v44  ;;  %v6556_v27 = vld [vmem:[#allocation4 + $0x38c] sm:$0xf0]  ;;  %v6514_v44 = vld [vmem:[#allocation4 + $0x244] sm:$0xf]  ;;  %v5204_v11 = vld [vmem:[#allocation4 + $0x108] sm:$0xf] }
 0x119   :  { %v1847_v16 = vmax.f32 %v1657_v5, %v1843_v9  ;;  %v5156_v5 = vld [vmem:[#allocation4 + $0xa8] sm:$0xf]  ;;  %v6497_v9 = vld [vmem:[#allocation4 + $0x1b4] sm:$0xf0] }
 0x11a   :  { %2685 = vmatpush.bf16.msra.mxu0 %v5169_v36  ;;  %v7009_v17 = vpop.f32.mrf.mxu2  ;;  %v1645_v28 = vpop.f32.mrf.mxu0  ;;  %2710 = vmatpush.bf16.msra.mxu2 %v5441_v24  ;;  %v6442_v36 = vld [vmem:[#allocation4 + $0x4] sm:$0xf]  ;;  %v5157_v15 = vor.u32 %v6465_v52, %v5156_v5  ;;  %v5285_v22 = vor.u32 %v6497_v9, %v5284_v8  ;;  %v6493_v24 = vld [vmem:[#allocation4 + $0x194] sm:$0xf0]  ;;  %v5093_v9 = vor.u32 %v6449_v0, %v5092_v20 }
 0x11b   :  { %2698 = vmatpush.bf16.msra.mxu1 %v5297_v38  ;;  %v7011_v23 = vpop.f32.mrf.mxu3  ;;  %v7013_v25 = vpack.c.bf16 %v1847_v16, %v1847_v16  ;;  %v1658_v30 = vpop.f32.mrf.mxu1  ;;  %v5070_v38 = vld [vmem:[#allocation4 + $0x10] sm:$0xf0]  ;;  %v5140_v16 = vld [vmem:[#allocation4 + $0x88] sm:$0xf]  ;;  %v1670_v2 = vadd.f32 %v7009_v17, %v327_v47  ;;  %v6477_v14 = vld [vmem:[#allocation4 + $0x114] sm:$0xf0] }
 0x11c   :  { %v5073_v55 = vor.u32 %v6442_v36, %v5070_v38  ;;  %v5268_v28 = vld [vmem:[#allocation4 + $0x188] sm:$0xf]  ;;  %v5358_v30 = vld [vmem:[#allocation4 + $0x250] sm:$0xf0]  ;;  %v6489_v38 = vld [vmem:[#allocation4 + $0x174] sm:$0xf0] }
 0x11d   :  { %2653 = vmatmul.bf16.vlgmr.msrb.gmra.mxu1 %v7013_v25  ;;  %v5361_v32 = vor.u32 %v6514_v44, %v5358_v30  ;;  %v5252_v36 = vld [vmem:[#allocation4 + $0x168] sm:$0xf]  ;;  %v1683_v17 = vadd.f32 %v7011_v23, %v1670_v2  ;;  %v5566_v44 = vld [vmem:[#allocation4 + $0x3f0] sm:$0xf0]  ;;  %v6467_v23 = vld [vmem:[#allocation4 + $0xcc] sm:$0xf] }
 0x11e   :  { %2686 = vmatpush.bf16.msra.mxu0 %v5153_v48  ;;  %2711 = vmatpush.bf16.msra.mxu2 %v5425_v34  ;;  %v5316_v48 = vld [vmem:[#allocation4 + $0x1e8] sm:$0xf]  ;;  %v5269_v34 = vor.u32 %v6493_v24, %v5268_v28  ;;  %v5253_v53 = vor.u32 %v6489_v38, %v5252_v36  ;;  %v6503_v28 = vld [vmem:[#allocation4 + $0x1ec] sm:$0xf]  ;;  %v5318_v24 = vld [vmem:[#allocation4 + $0x1f8] sm:$0xf0] }
 0x11f   :  { %2699 = vmatpush.bf16.msra.mxu1 %v5281_v62  ;;  %v6505_v62 = vld [vmem:[#allocation4 + $0x1f4] sm:$0xf0]  ;;  %v5174_v36 = vld [vmem:[#allocation4 + $0xd8] sm:$0xf0]  ;;  %v6499_v38 = vld [vmem:[#allocation4 + $0x1cc] sm:$0xf] }
 0x122   :  { %2687 = vmatpush.bf16.msra.mxu0 %v5137_v21  ;;  %v1671_v51 = vpop.f32.mrf.mxu2  ;;  %v5317_v21 = vor.u32 %v6505_v62, %v5316_v48  ;;  %2712 = vmatpush.bf16.msra.mxu2 %v5409_v57  ;;  %v5108_v62 = vld [vmem:[#allocation4 + $0x48] sm:$0xf]  ;;  %v5484_v57 = vld [vmem:[#allocation4 + $0x340] sm:$0xf] }
 0x123   :  { %2700 = vmatpush.bf16.msra.mxu1 %v5265_v60  ;;  %v1684_v56 = vpop.f32.mrf.mxu3  ;;  %v5300_v60 = vld [vmem:[#allocation4 + $0x1c8] sm:$0xf]  ;;  %v5345_v51 = vor.u32 %v6510_v43, %v5342_v37  ;;  %v5109_v12 = vor.u32 %v6453_v54, %v5108_v62  ;;  %v5550_v43 = vld [vmem:[#allocation4 + $0x3d0] sm:$0xf0]  ;;  %v5177_v37 = vor.u32 %v6467_v23, %v5174_v36  ;;  %v6463_v62 = vld [vmem:[#allocation4 + $0xac] sm:$0xf] }
 0x124   :  { %v6485_v56 = vld [vmem:[#allocation4 + $0x154] sm:$0xf0]  ;;  %v6558_v54 = vld [vmem:[#allocation4 + $0x3a4] sm:$0xf]  ;;  %v5094_v23 = vld [vmem:[#allocation4 + $0x38] sm:$0xf0] }
 0x125   :  { %v6479_v36 = vld [vmem:[#allocation4 + $0x12c] sm:$0xf] }
 0x126   :  { %2688 = vmatpush.bf16.msra.mxu0 %v5121_v7  ;;  %v5301_v7 = vor.u32 %v6501_v61, %v5300_v60  ;;  %2713 = vmatpush.bf16.msra.mxu2 %v5393_v19  ;;  %v5468_v19 = vld [vmem:[#allocation4 + $0x320] sm:$0xf] }
 0x127   :  { %2701 = vmatpush.bf16.msra.mxu1 %v5249_v10  ;;  %v5532_v10 = vld [vmem:[#allocation4 + $0x3a0] sm:$0xf] }
 0x128   :  { %v5533_v13 = vor.u32 %v6560_v33, %v5532_v10  ;;  %v5076_v10 = vld [vmem:[#allocation4 + $0x8] sm:$0xf]  ;;  %v6445_v33 = vld [vmem:[#allocation4 + $0x14] sm:$0xf0] }
 0x12a   :  { %2689 = vmatpush.bf16.msra.mxu0 %v5105_v35  ;;  %v6461_v35 = vld [vmem:[#allocation4 + $0x94] sm:$0xf0]  ;;  %2673 = vmatpush.bf16.msrb.mxu3 %v5533_v13 }
 0x12b   :  { %2702 = vmatpush.bf16.msra.mxu1 %v5233_v26  ;;  %2714 = vmatpush.bf16.msra.mxu2 %v5377_v18  ;;  %v5516_v26 = vld [vmem:[#allocation4 + $0x380] sm:$0xf]  ;;  %v5141_v31 = vor.u32 %v6461_v35, %v5140_v16  ;;  %v5190_v16 = vld [vmem:[#allocation4 + $0xf8] sm:$0xf0]  ;;  %v6566_v35 = vld [vmem:[#allocation4 + $0x3e4] sm:$0xf] }
 0x12c   :  { %v5517_v29 = vor.u32 %v6556_v27, %v5516_v26  ;;  %v5452_v18 = vld [vmem:[#allocation4 + $0x300] sm:$0xf] }
 0x12e   :  { %2690 = vmatpush.bf16.msra.mxu0 %v5089_v40  ;;  %v6457_v40 = vld [vmem:[#allocation4 + $0x74] sm:$0xf0]  ;;  %2674 = vmatpush.bf16.msrb.mxu3 %v5517_v29  ;;  %v5077_v29 = vor.u32 %v6445_v33, %v5076_v10 }
 0x12f   :  { %2703 = vmatpush.bf16.msra.mxu1 %v5217_v49  ;;  %2715 = vmatpush.bf16.msra.mxu2 %v5361_v32  ;;  %v5500_v49 = vld [vmem:[#allocation4 + $0x360] sm:$0xf]  ;;  %v5125_v48 = vor.u32 %v6457_v40, %v5124_v6  ;;  %v5205_v6 = vor.u32 %v6477_v14, %v5204_v11  ;;  %v5321_v40 = vor.u32 %v6503_v28, %v5318_v24  ;;  %v6537_v14 = vld [vmem:[#allocation4 + $0x2f4] sm:$0xf0]  ;;  %v5486_v28 = vld [vmem:[#allocation4 + $0x350] sm:$0xf0] }
 0x130   :  { %v5501_v46 = vor.u32 %v6552_v42, %v5500_v49  ;;  %v5302_v49 = vld [vmem:[#allocation4 + $0x1d8] sm:$0xf0]  ;;  %v6562_v42 = vld [vmem:[#allocation4 + $0x3c4] sm:$0xf] }
 0x132   :  { %2691 = vmatpush.bf16.msra.mxu0 %v5073_v55  ;;  %v7018_v39 = vpop.f32.mrf.mxu0  ;;  %v5236_v55 = vld [vmem:[#allocation4 + $0x148] sm:$0xf]  ;;  %2675 = vmatpush.bf16.msrb.mxu3 %v5501_v46  ;;  %v5553_v46 = vor.u32 %v6562_v42, %v5550_v43  ;;  %v6542_v42 = vld [vmem:[#allocation4 + $0x324] sm:$0xf]  ;;  %v5470_v43 = vld [vmem:[#allocation4 + $0x330] sm:$0xf0] }
 0x133   :  { %2704 = vmatpush.bf16.msra.mxu1 %v5201_v63  ;;  %v7020_v45 = vpop.f32.mrf.mxu1  ;;  %2716 = vmatpush.bf16.msra.mxu2 %v5345_v51  ;;  %v6548_v63 = vld [vmem:[#allocation4 + $0x34c] sm:$0xf0]  ;;  %v5237_v4 = vor.u32 %v6485_v56, %v5236_v55  ;;  %v5158_v51 = vld [vmem:[#allocation4 + $0xb8] sm:$0xf0]  ;;  %v5534_v55 = vld [vmem:[#allocation4 + $0x3b0] sm:$0xf0] }
 0x134   :  { %v5537_v56 = vor.u32 %v6558_v54, %v5534_v55  ;;  %v5078_v54 = vld [vmem:[#allocation4 + $0x18] sm:$0xf0]  ;;  %v6475_v55 = vld [vmem:[#allocation4 + $0x10c] sm:$0xf] }
 0x135   :  { %2692 = vmatmul.bf16.vlgmr.msra.gmra.mxu0 %v7004_v41 }
 0x136   :  { %2736 = vmatpush.bf16.msrb.mxu0 %v5189_v58  ;;  %2705 = vmatmul.bf16.vlgmr.msra.gmra.mxu1 %v7013_v25  ;;  %v6506_v58 = vld [vmem:[#allocation4 + $0x204] sm:$0xf] }
 0x137   :  { %2749 = vmatpush.bf16.msrb.mxu1 %v5317_v21  ;;  %v5485_v21 = vor.u32 %v6548_v63, %v5484_v57  ;;  %v5329_v61 = vor.u32 %v6506_v58, %v5326_v50  ;;  %v5161_v57 = vor.u32 %v6463_v62, %v5158_v51  ;;  %v6459_v58 = vld [vmem:[#allocation4 + $0x8c] sm:$0xf]  ;;  %v5412_v62 = vld [vmem:[#allocation4 + $0x2a8] sm:$0xf]  ;;  %v6529_v51 = vld [vmem:[#allocation4 + $0x2b4] sm:$0xf0] }
 0x138   :  { %v6491_v50 = vld [vmem:[#allocation4 + $0x18c] sm:$0xf] }
 0x139   :  { %2676 = vmatpush.bf16.msrb.mxu3 %v5485_v21  ;;  %2717 = vmatpush.bf16.msra.mxu2 %v5329_v61  ;;  %v5142_v21 = vld [vmem:[#allocation4 + $0x98] sm:$0xf0]  ;;  %v6554_v61 = vld [vmem:[#allocation4 + $0x384] sm:$0xf] }
 0x13a   :  { %2737 = vmatpush.bf16.msrb.mxu0 %v5173_v3  ;;  %v7023_v59 = vpop.f32.mrf.mxu2  ;;  %v6481_v3 = vld [vmem:[#allocation4 + $0x134] sm:$0xf0]  ;;  %v1697_v5 = vpop.f32.mrf.mxu0  ;;  %v5145_v0 = vor.u32 %v6459_v58, %v5142_v21  ;;  %v5413_v58 = vor.u32 %v6529_v51, %v5412_v62  ;;  %v5556_v51 = vld [vmem:[#allocation4 + $0x3c8] sm:$0xf] }
 0x13b   :  { %2750 = vmatpush.bf16.msrb.mxu1 %v5301_v7  ;;  %v7025_v60 = vpop.f32.mrf.mxu3  ;;  %v6544_v7 = vld [vmem:[#allocation4 + $0x32c] sm:$0xf0]  ;;  %v1710_v52 = vpop.f32.mrf.mxu1  ;;  %v5221_v13 = vor.u32 %v6481_v3, %v5220_v1  ;;  %v6455_v3 = vld [vmem:[#allocation4 + $0x6c] sm:$0xf]  ;;  %v5126_v5 = vld [vmem:[#allocation4 + $0x78] sm:$0xf0] }
 0x13c   :  { %v5469_v8 = vor.u32 %v6544_v7, %v5468_v19  ;;  %v6487_v19 = vld [vmem:[#allocation4 + $0x16c] sm:$0xf]  ;;  %v5254_v7 = vld [vmem:[#allocation4 + $0x178] sm:$0xf0]  ;;  %v6550_v52 = vld [vmem:[#allocation4 + $0x364] sm:$0xf]  ;;  %v5129_v33 = vor.u32 %v6455_v3, %v5126_v5 }
 0x13d   :  { %v5380_v3 = vld [vmem:[#allocation4 + $0x268] sm:$0xf]  ;;  %v6521_v5 = vld [vmem:[#allocation4 + $0x274] sm:$0xf0] }
 0x13e   :  { %2738 = vmatpush.bf16.msrb.mxu0 %v5157_v15  ;;  %v6471_v15 = vld [vmem:[#allocation4 + $0xec] sm:$0xf]  ;;  %2677 = vmatpush.bf16.msrb.mxu3 %v5469_v8  ;;  %v5502_v8 = vld [vmem:[#allocation4 + $0x370] sm:$0xf0] }
 0x13f   :  { %2751 = vmatpush.bf16.msrb.mxu1 %v5285_v22  ;;  %v6540_v22 = vld [vmem:[#allocation4 + $0x30c] sm:$0xf0]  ;;  %v5193_v32 = vor.u32 %v6471_v15, %v5190_v16  ;;  %v5505_v10 = vor.u32 %v6550_v52, %v5502_v8  ;;  %v6451_v15 = vld [vmem:[#allocation4 + $0x4c] sm:$0xf]  ;;  %v5257_v16 = vor.u32 %v6487_v19, %v5254_v7  ;;  %v5364_v7 = vld [vmem:[#allocation4 + $0x248] sm:$0xf] }
 0x140   :  { %v5453_v27 = vor.u32 %v6540_v22, %v5452_v18  ;;  %v6483_v18 = vld [vmem:[#allocation4 + $0x14c] sm:$0xf]  ;;  %v5238_v22 = vld [vmem:[#allocation4 + $0x158] sm:$0xf0]  ;;  %v6517_v52 = vld [vmem:[#allocation4 + $0x254] sm:$0xf0] }
 0x142   :  { %2739 = vmatpush.bf16.msrb.mxu0 %v5141_v31  ;;  %v1723_v26 = vpop.f32.mrf.mxu2  ;;  %v5569_v31 = vor.u32 %v6566_v35, %v5566_v44  ;;  %2678 = vmatpush.bf16.msrb.mxu3 %v5453_v27  ;;  %v6546_v35 = vld [vmem:[#allocation4 + $0x344] sm:$0xf] }
 0x143   :  { %2752 = vmatpush.bf16.msrb.mxu1 %v5269_v34  ;;  %v1736_v30 = vpop.f32.mrf.mxu3  ;;  %v1696_v34 = vadd.f32 %v7018_v39, %v1683_v17  ;;  %v6495_v39 = vld [vmem:[#allocation4 + $0x1ac] sm:$0xf]  ;;  %v5110_v17 = vld [vmem:[#allocation4 + $0x58] sm:$0xf0]  ;;  %v5489_v26 = vor.u32 %v6546_v35, %v5486_v28 }
 0x144   :  { %v5113_v44 = vor.u32 %v6451_v15, %v5110_v17  ;;  %v6533_v30 = vld [vmem:[#allocation4 + $0x2d4] sm:$0xf0]  ;;  %v5446_v17 = vld [vmem:[#allocation4 + $0x2f8] sm:$0xf0] }
 0x145   :  { %v1709_v47 = vadd.f32 %v7020_v45, %v1696_v34 }
 0x146   :  { %2740 = vmatpush.bf16.msrb.mxu0 %v5125_v48  ;;  %2723 = vmatpush.bf16.msra.mxu3 %v5569_v31  ;;  %v5305_v48 = vor.u32 %v6499_v38, %v5302_v49  ;;  %v5222_v38 = vld [vmem:[#allocation4 + $0x138] sm:$0xf0] }
 0x147   :  { %2753 = vmatpush.bf16.msrb.mxu1 %v5253_v53  ;;  %v5286_v53 = vld [vmem:[#allocation4 + $0x1b8] sm:$0xf0]  ;;  %v1722_v63 = vadd.f32 %v7023_v59, %v1709_v47 }
 0x148   :  { %v5289_v45 = vor.u32 %v6495_v39, %v5286_v53  ;;  %v5225_v39 = vor.u32 %v6479_v36, %v5222_v38  ;;  %v6443_v53 = vld [vmem:[#allocation4 + $0xc] sm:$0xf]  ;;  %v5572_v36 = vld [vmem:[#allocation4 + $0x3e8] sm:$0xf]  ;;  %v6569_v38 = vld [vmem:[#allocation4 + $0x3f4] sm:$0xf0] }
 0x149   :  { %v1735_v1 = vadd.f32 %v7025_v60, %v1722_v63  ;;  %v5454_v63 = vld [vmem:[#allocation4 + $0x310] sm:$0xf0]  ;;  %v5081_v21 = vor.u32 %v6443_v53, %v5078_v54 }
 0x14a   :  { %2741 = vmatpush.bf16.msrb.mxu0 %v5109_v12  ;;  %2724 = vmatpush.bf16.msra.mxu3 %v5553_v46  ;;  %v5270_v12 = vld [vmem:[#allocation4 + $0x198] sm:$0xf0]  ;;  %v5473_v46 = vor.u32 %v6542_v42, %v5470_v43 }
 0x14b   :  { %2754 = vmatpush.bf16.msrb.mxu1 %v5237_v4  ;;  %v5518_v4 = vld [vmem:[#allocation4 + $0x390] sm:$0xf0]  ;;  %v5273_v2 = vor.u32 %v6491_v50, %v5270_v12 }
 0x14c   :  { %v5521_v20 = vor.u32 %v6554_v61, %v5518_v4  ;;  %v5396_v4 = vld [vmem:[#allocation4 + $0x288] sm:$0xf] }
 0x14e   :  { %2742 = vmatpush.bf16.msrb.mxu0 %v5093_v9  ;;  %2725 = vmatpush.bf16.msra.mxu3 %v5537_v56  ;;  %v5206_v56 = vld [vmem:[#allocation4 + $0x118] sm:$0xf0] }
 0x14f   :  { %2755 = vmatpush.bf16.msrb.mxu1 %v5221_v13  ;;  %v5444_v13 = vld [vmem:[#allocation4 + $0x2e8] sm:$0xf]  ;;  %v5209_v50 = vor.u32 %v6475_v55, %v5206_v56  ;;  %v6519_v55 = vld [vmem:[#allocation4 + $0x26c] sm:$0xf]  ;;  %v5382_v56 = vld [vmem:[#allocation4 + $0x278] sm:$0xf0] }
 0x150   :  { %v5445_v27 = vor.u32 %v6537_v14, %v5444_v13 }
 0x152   :  { %2743 = vmatpush.bf16.msrb.mxu0 %v5077_v29  ;;  %2726 = vmatpush.bf16.msra.mxu3 %v5521_v20  ;;  %v1747_v59 = vpop.f32.mrf.mxu0  ;;  %v5428_v29 = vld [vmem:[#allocation4 + $0x2c8] sm:$0xf]  ;;  %v6525_v20 = vld [vmem:[#allocation4 + $0x294] sm:$0xf0] }
 0x153   :  { %2756 = vmatpush.bf16.msrb.mxu1 %v5205_v6  ;;  %v1748_v9 = vadd.f32 %v1747_v59, %v1735_v1  ;;  %v7035_v11 = vpop.f32.mrf.mxu1  ;;  %v5241_v6 = vor.u32 %v6483_v18, %v5238_v22  ;;  %v5381_v59 = vor.u32 %v6521_v5, %v5380_v3  ;;  %v6553_v3 = vld [vmem:[#allocation4 + $0x374] sm:$0xf0] }
 0x155   :  { %2744 = vmatmul.bf16.vlgmr.msrb.gmra.mxu0 %v7004_v41  ;;  %v1844_v60 = vmul.f32 0.2, %v1748_v9 }
 0x156   :  { %2788 = vmatpush.bf16.msra.mxu0 %v5193_v32  ;;  %2757 = vmatmul.bf16.vlgmr.msrb.gmra.mxu1 %v7013_v25 }
 0x157   :  { %2801 = vmatpush.bf16.msra.mxu1 %v5321_v40  ;;  %2727 = vmatpush.bf16.msra.mxu3 %v5505_v10  ;;  %v1848_v24 = vmax.f32 %v1748_v9, %v1844_v60  ;;  %v6447_v40 = vld [vmem:[#allocation4 + $0x2c] sm:$0xf]  ;;  %v5365_v9 = vor.u32 %v6517_v52, %v5364_v7  ;;  %v5348_v10 = vld [vmem:[#allocation4 + $0x228] sm:$0xf]  ;;  %v5334_v52 = vld [vmem:[#allocation4 + $0x218] sm:$0xf0] }
 0x158   :  { %v5097_v47 = vor.u32 %v6447_v40, %v5094_v23  ;;  %v5414_v40 = vld [vmem:[#allocation4 + $0x2b8] sm:$0xf0]  ;;  %v6507_v7 = vld [vmem:[#allocation4 + $0x20c] sm:$0xf] }
 0x159   :  { %v7037_v31 = vpack.c.bf16 %v1848_v24, %v1848_v24  ;;  %v6531_v24 = vld [vmem:[#allocation4 + $0x2cc] sm:$0xf] }
 0x15a   :  { %2789 = vmatpush.bf16.msra.mxu0 %v5177_v37  ;;  %v1773_v32 = vpop.f32.mrf.mxu2  ;;  %v1749_v49 = vpop.f32.mrf.mxu0  ;;  %v5429_v37 = vor.u32 %v6533_v30, %v5428_v29 }
 0x15b   :  { %2802 = vmatpush.bf16.msra.mxu1 %v5305_v48  ;;  %v1786_v34 = vpop.f32.mrf.mxu3  ;;  %2728 = vmatpush.bf16.msra.mxu3 %v5489_v26  ;;  %v1762_v48 = vpop.f32.mrf.mxu1  ;;  %v5430_v26 = vld [vmem:[#allocation4 + $0x2d8] sm:$0xf0] }
 0x15c   :  { %2666 = vmatmul.bf16.vlgmr.msrb.gmra.mxu2 %v7037_v31 }
 0x15d   :  { %2762 = vmatpush.bf16.msrb.mxu2 %v5445_v27 }
 0x15e   :  { %2790 = vmatpush.bf16.msra.mxu0 %v5161_v57  ;;  %v6538_v57 = vld [vmem:[#allocation4 + $0x304] sm:$0xf] }
 0x15f   :  { %2803 = vmatpush.bf16.msra.mxu1 %v5289_v45  ;;  %2729 = vmatpush.bf16.msra.mxu3 %v5473_v46  ;;  %v5457_v45 = vor.u32 %v6538_v57, %v5454_v63  ;;  %v5573_v46 = vor.u32 %v6569_v38, %v5572_v36  ;;  %v5540_v57 = vld [vmem:[#allocation4 + $0x3a8] sm:$0xf]  ;;  %v6561_v63 = vld [vmem:[#allocation4 + $0x3b4] sm:$0xf0]  ;;  %v6551_v36 = vld [vmem:[#allocation4 + $0x36c] sm:$0xf] }
 0x160   :  { %v5510_v38 = vld [vmem:[#allocation4 + $0x378] sm:$0xf0] }
 0x161   :  { %2763 = vmatpush.bf16.msrb.mxu2 %v5429_v37  ;;  %v6523_v37 = vld [vmem:[#allocation4 + $0x28c] sm:$0xf] }
 0x162   :  { %2791 = vmatpush.bf16.msra.mxu0 %v5145_v0  ;;  %v1775_v12 = vpop.f32.mrf.mxu2  ;;  %v6739_v0 = vld [vmem:[%s7144_s2] sm:$0xf] }
 0x163   :  { %2804 = vmatpush.bf16.msra.mxu1 %v5273_v2  ;;  %v1788_v61 = vpop.f32.mrf.mxu3  ;;  %2730 = vmatpush.bf16.msra.mxu3 %v5457_v45  ;;  %v328_v1 = vperm.slane %v6739_v0, 3  ;;  %v5397_v2 = vor.u32 %v6525_v20, %v5396_v4  ;;  %v5385_v45 = vor.u32 %v6519_v55, %v5382_v56  ;;  %v5524_v12 = vld [vmem:[#allocation4 + $0x388] sm:$0xf]  ;;  %v6511_v0 = vld [vmem:[#allocation4 + $0x22c] sm:$0xf] }
 0x164   :  { %v6557_v61 = vld [vmem:[#allocation4 + $0x394] sm:$0xf0]  ;;  %v5692_v55 = vld [vmem:[#allocation6 + $0xe0] sm:$0xf]  ;;  %v6600_v56 = vld [vmem:[#allocation6 + $0xec] sm:$0xf0] }
 0x165   :  { %2764 = vmatpush.bf16.msrb.mxu2 %v5413_v58  ;;  %v1761_v19 = vadd.f32 %v7035_v11, %v328_v1  ;;  %v5541_v58 = vor.u32 %v6561_v63, %v5540_v57  ;;  %v5525_v20 = vor.u32 %v6557_v61, %v5524_v12  ;;  %v5350_v1 = vld [vmem:[#allocation4 + $0x238] sm:$0xf0]  ;;  %v5676_v57 = vld [vmem:[#allocation6 + $0xc0] sm:$0xf]  ;;  %v5693_v63 = vor.u32 %v6600_v56, %v5692_v55  ;;  %v6612_v56 = vld [vmem:[#allocation6 + $0x14c] sm:$0xf0] }
 0x166   :  { %2792 = vmatpush.bf16.msra.mxu0 %v5129_v33  ;;  %v6513_v33 = vld [vmem:[#allocation4 + $0x234] sm:$0xf0]  ;;  %v5462_v61 = vld [vmem:[#allocation4 + $0x318] sm:$0xf0]  ;;  %v5740_v55 = vld [vmem:[#allocation6 + $0x140] sm:$0xf] }
 0x167   :  { %2805 = vmatpush.bf16.msra.mxu1 %v5257_v16  ;;  %v1774_v8 = vadd.f32 %v1773_v32, %v1761_v19  ;;  %v5349_v11 = vor.u32 %v6513_v33, %v5348_v10  ;;  %v6509_v16 = vld [vmem:[#allocation4 + $0x214] sm:$0xf0]  ;;  %v5433_v32 = vor.u32 %v6531_v24, %v5430_v26  ;;  %v5353_v19 = vor.u32 %v6511_v0, %v5350_v1  ;;  %v5558_v24 = vld [vmem:[#allocation4 + $0x3d8] sm:$0xf0] }
 0x168   :  { %v5337_v10 = vor.u32 %v6507_v7, %v5334_v52  ;;  %v6584_v7 = vld [vmem:[#allocation6 + $0x6c] sm:$0xf0]  ;;  %v5820_v52 = vld [vmem:[#allocation6 + $0x1e0] sm:$0xf] }
 0x169   :  { %2765 = vmatpush.bf16.msrb.mxu2 %v5397_v2  ;;  %v1787_v13 = vadd.f32 %v1786_v34, %v1774_v8  ;;  %v6527_v34 = vld [vmem:[#allocation4 + $0x2ac] sm:$0xf]  ;;  %v5508_v2 = vld [vmem:[#allocation4 + $0x368] sm:$0xf] }
 0x16a   :  { %2793 = vmatpush.bf16.msra.mxu0 %v5113_v44  ;;  %v5417_v42 = vor.u32 %v6527_v34, %v5414_v40  ;;  %v5492_v8 = vld [vmem:[#allocation4 + $0x348] sm:$0xf]  ;;  %v5526_v34 = vld [vmem:[#allocation4 + $0x398] sm:$0xf0] }
 0x16b   :  { %2806 = vmatpush.bf16.msra.mxu1 %v5241_v6 }
 0x16c   :  { %2718 = vmatmul.bf16.vlgmr.msra.gmra.mxu2 %v7037_v31 }
 0x16d   :  { %2766 = vmatpush.bf16.msrb.mxu2 %v5381_v59  ;;  %v5509_v59 = vor.u32 %v6553_v3, %v5508_v2  ;;  %v5644_v3 = vld [vmem:[#allocation6 + $0x80] sm:$0xf] }
 0x16e   :  { %2794 = vmatpush.bf16.msra.mxu0 %v5097_v47  ;;  %v5398_v47 = vld [vmem:[#allocation4 + $0x298] sm:$0xf0] }
 0x16f   :  { %2807 = vmatpush.bf16.msra.mxu1 %v5225_v39  ;;  %v6565_v39 = vld [vmem:[#allocation4 + $0x3d4] sm:$0xf0]  ;;  %v5401_v53 = vor.u32 %v6523_v37, %v5398_v47  ;;  %v5494_v37 = vld [vmem:[#allocation4 + $0x358] sm:$0xf0] }
 0x170   :  { %v5557_v54 = vor.u32 %v6565_v39, %v5556_v51 }
 0x171   :  { %2767 = vmatpush.bf16.msrb.mxu2 %v5365_v9  ;;  %v6549_v9 = vld [vmem:[#allocation4 + $0x354] sm:$0xf0] }
 0x172   :  { %2795 = vmatpush.bf16.msra.mxu0 %v5081_v21  ;;  %v1799_v14 = vpop.f32.mrf.mxu0  ;;  %v6515_v21 = vld [vmem:[#allocation4 + $0x24c] sm:$0xf]  ;;  %v5493_v33 = vor.u32 %v6549_v9, %v5492_v8  ;;  %v6632_v9 = vld [vmem:[#allocation6 + $0x1ec] sm:$0xf0] }
 0x173   :  { %2808 = vmatpush.bf16.msra.mxu1 %v5209_v50  ;;  %v1812_v15 = vpop.f32.mrf.mxu1  ;;  %v1800_v60 = vadd.f32 %v1799_v14, %v1787_v13  ;;  %v5366_v50 = vld [vmem:[#allocation4 + $0x258] sm:$0xf0]  ;;  %v5476_v13 = vld [vmem:[#allocation4 + $0x328] sm:$0xf]  ;;  %v6545_v14 = vld [vmem:[#allocation4 + $0x334] sm:$0xf0] }
 0x174   :  { %v5369_v4 = vor.u32 %v6515_v21, %v5366_v50  ;;  %v6539_v50 = vld [vmem:[#allocation4 + $0x30c] sm:$0xf] }
 0x175   :  { %2796 = vmatmul.bf16.vlgmr.msra.gmra.mxu0 %v7004_v41  ;;  %v5332_v41 = vld [vmem:[#allocation4 + $0x208] sm:$0xf]  ;;  %2768 = vmatpush.bf16.msrb.mxu2 %v5349_v11  ;;  %v1813_v22 = vadd.f32 %v1812_v15, %v1800_v60  ;;  %v7055_v11 = vld [vmem:[%s7146_s4] sm:$0xf]  ;;  %v5477_v60 = vor.u32 %v6545_v14, %v5476_v13  ;;  %v5465_v1 = vor.u32 %v6539_v50, %v5462_v61  ;;  %v6580_v14 = vld [vmem:[#allocation6 + $0x4c] sm:$0xf0] }
 0x176   :  { %2809 = vmatmul.bf16.vlgmr.msra.gmra.mxu1 %v7013_v25  ;;  %v6535_v25 = vld [vmem:[#allocation4 + $0x2ec] sm:$0xf]  ;;  %v5333_v18 = vor.u32 %v6509_v16, %v5332_v41  ;;  %v5460_v41 = vld [vmem:[#allocation4 + $0x308] sm:$0xf]  ;;  %v6541_v16 = vld [vmem:[#allocation4 + $0x314] sm:$0xf0]  ;;  %3630 = vmatpush.bf16.msrb.mxu0 %v5693_v63  ;;  %v5741_v63 = vor.u32 %v6612_v56, %v5740_v55 }
 0x177   :  { %v5449_v35 = vor.u32 %v6535_v25, %v5446_v17  ;;  %v6567_v25 = vld [vmem:[#allocation4 + $0x3ec] sm:$0xf]  ;;  %v5574_v17 = vld [vmem:[#allocation4 + $0x3f8] sm:$0xf0]  ;;  %v5612_v13 = vld [vmem:[#allocation6 + $0x40] sm:$0xf] }
 0x178   :  { %v5724_v61 = vld [vmem:[#allocation6 + $0x120] sm:$0xf]  ;;  %v5774_v56 = vld [vmem:[#allocation6 + $0x190] sm:$0xf0] }
 0x179   :  { %2769 = vmatpush.bf16.msrb.mxu2 %v5333_v18  ;;  %v1984_v18 = vperm.slane %v7055_v11, 0 }
 0x17a   :  { %v1825_v28 = vpop.f32.mrf.mxu2  ;;  %v1801_v29 = vpop.f32.mrf.mxu0 }
 0x17b   :  { %v1826_v27 = vadd.f32 %v1825_v28, %v1813_v22  ;;  %v1838_v44 = vpop.f32.mrf.mxu3  ;;  %v1814_v30 = vpop.f32.mrf.mxu1  ;;  %v5461_v22 = vor.u32 %v6541_v16, %v5460_v41  ;;  %v6563_v28 = vld [vmem:[#allocation4 + $0x3cc] sm:$0xf]  ;;  %v6628_v41 = vld [vmem:[#allocation6 + $0x1cc] sm:$0xf0] }
 0x17c   :  { %2770 = vmatmul.bf16.vlgmr.msrb.gmra.mxu2 %v7037_v31  ;;  %v5561_v29 = vor.u32 %v6563_v28, %v5558_v24  ;;  %v6559_v30 = vld [vmem:[#allocation4 + $0x3ac] sm:$0xf]  ;;  %v6624_v24 = vld [vmem:[#allocation6 + $0x1ac] sm:$0xf0] }
 0x17d   :  { %v1839_v6 = vadd.f32 %v1838_v44, %v1826_v27  ;;  %2814 = vmatpush.bf16.msra.mxu2 %v5449_v35  ;;  %v5577_v35 = vor.u32 %v6567_v25, %v5574_v17  ;;  %v6576_v17 = vld [vmem:[#allocation6 + $0x2c] sm:$0xf0] }
 0x17f   :  { %v1845_v23 = vmul.f32 0.2, %v1839_v6 }
 0x181   :  { %v1849_v49 = vmax.f32 %v1839_v6, %v1845_v23  ;;  %2815 = vmatpush.bf16.msra.mxu2 %v5433_v32  ;;  %v5542_v6 = vld [vmem:[#allocation4 + $0x3b8] sm:$0xf0]  ;;  %v6555_v32 = vld [vmem:[#allocation4 + $0x38c] sm:$0xf] }
 0x182   :  { %v1827_v43 = vpop.f32.mrf.mxu2  ;;  %v5529_v23 = vor.u32 %v6555_v32, %v5526_v34  ;;  %v6620_v32 = vld [vmem:[#allocation6 + $0x18c] sm:$0xf0]  ;;  %v6598_v34 = vld [vmem:[#allocation6 + $0xe4] sm:$0xf] }
 0x183   :  { %v7048_v48 = vpack.c.bf16 %v1849_v49, %v1849_v49  ;;  %v1840_v62 = vpop.f32.mrf.mxu3  ;;  %v1985_v49 = vperm.slane %v7055_v11, 1  ;;  %v5513_v43 = vor.u32 %v6551_v36, %v5510_v38 }
 0x185   :  { %2679 = vmatmul.bf16.vlgmr.msrb.gmra.mxu3 %v7048_v48  ;;  %2816 = vmatpush.bf16.msra.mxu2 %v5417_v42 }
 0x186   :  { %2775 = vmatpush.bf16.msrb.mxu3 %v5573_v46  ;;  %v6547_v46 = vld [vmem:[#allocation4 + $0x34c] sm:$0xf] }
 0x187   :  { %v5497_v39 = vor.u32 %v6547_v46, %v5494_v37  ;;  %v6664_v37 = vld [vmem:[#allocation6 + $0x2ec] sm:$0xf0] }
 0x189   :  { %2817 = vmatpush.bf16.msra.mxu2 %v5401_v53  ;;  %v6543_v53 = vld [vmem:[#allocation4 + $0x32c] sm:$0xf] }
 0x18a   :  { %2776 = vmatpush.bf16.msrb.mxu3 %v5557_v54  ;;  %v5478_v54 = vld [vmem:[#allocation4 + $0x338] sm:$0xf0] }
 0x18b   :  { %v5481_v21 = vor.u32 %v6543_v53, %v5478_v54 }
 0x18d   :  { %2818 = vmatpush.bf16.msra.mxu2 %v5385_v45  ;;  %v6596_v45 = vld [vmem:[#allocation6 + $0xcc] sm:$0xf0] }
 0x18e   :  { %2777 = vmatpush.bf16.msrb.mxu3 %v5541_v58  ;;  %v5677_v12 = vor.u32 %v6596_v45, %v5676_v57  ;;  %v5932_v57 = vld [vmem:[#allocation6 + $0x2c0] sm:$0xf]  ;;  %v6660_v45 = vld [vmem:[#allocation6 + $0x2cc] sm:$0xf0] }
 0x18f   :  { %v5933_v50 = vor.u32 %v6660_v45, %v5932_v57 }
 0x190   :  { %3631 = vmatpush.bf16.msrb.mxu0 %v5677_v12 }
 0x191   :  { %2819 = vmatpush.bf16.msra.mxu2 %v5369_v4  ;;  %v5660_v4 = vld [vmem:[#allocation6 + $0xa0] sm:$0xf] }
 0x192   :  { %v2641_v5 = vpop.f32.mrf.mxu0  ;;  %2778 = vmatpush.bf16.msrb.mxu3 %v5525_v20  ;;  %v6592_v20 = vld [vmem:[#allocation6 + $0xac] sm:$0xf0] }
 0x193   :  { %v2642_v26 = vadd.f32 %v2641_v5, %v1984_v18  ;;  %v5661_v2 = vor.u32 %v6592_v20, %v5660_v4  ;;  %v6588_v5 = vld [vmem:[#allocation6 + $0x8c] sm:$0xf0]  ;;  %v5788_v18 = vld [vmem:[#allocation6 + $0x1a0] sm:$0xf] }
 0x194   :  { %v6608_v4 = vld [vmem:[#allocation6 + $0x12c] sm:$0xf0]  ;;  %v5916_v20 = vld [vmem:[#allocation6 + $0x2a0] sm:$0xf] }
 0x195   :  { %2731 = vmatmul.bf16.vlgmr.msra.gmra.mxu3 %v7048_v48  ;;  %2820 = vmatpush.bf16.msra.mxu2 %v5353_v19  ;;  %v5645_v19 = vor.u32 %v6588_v5, %v5644_v3  ;;  %v5725_v3 = vor.u32 %v6608_v4, %v5724_v61  ;;  %v6696_v4 = vld [vmem:[#allocation6 + $0x3ec] sm:$0xf0] }
 0x196   :  { %2779 = vmatpush.bf16.msrb.mxu3 %v5509_v59  ;;  %3632 = vmatpush.bf16.msrb.mxu0 %v5661_v2  ;;  %v5628_v59 = vld [vmem:[#allocation6 + $0x60] sm:$0xf]  ;;  %v5646_v2 = vld [vmem:[#allocation6 + $0x90] sm:$0xf0] }
 0x197   :  { %v5629_v8 = vor.u32 %v6584_v7, %v5628_v59  ;;  %v5708_v59 = vld [vmem:[#allocation6 + $0x100] sm:$0xf]  ;;  %v6604_v7 = vld [vmem:[#allocation6 + $0x10c] sm:$0xf0] }
 0x199   :  { %2821 = vmatpush.bf16.msra.mxu2 %v5337_v10  ;;  %v5821_v10 = vor.u32 %v6632_v9, %v5820_v52  ;;  %v5900_v52 = vld [vmem:[#allocation6 + $0x280] sm:$0xf]  ;;  %v5709_v9 = vor.u32 %v6604_v7, %v5708_v59  ;;  %v6692_v7 = vld [vmem:[#allocation6 + $0x3cc] sm:$0xf0] }
 0x19a   :  { %v2643_v15 = vpop.f32.mrf.mxu0  ;;  %2780 = vmatpush.bf16.msrb.mxu3 %v5493_v33  ;;  %v2654_v27 = vpop.f32.mrf.mxu1  ;;  %3633 = vmatpush.bf16.msrb.mxu0 %v5645_v19  ;;  %v1986_v33 = vperm.slane %v7055_v11, 2  ;;  %v6060_v59 = vld [vmem:[#allocation6 + $0x3c0] sm:$0xf] }
 0x19b   :  { %v7059_v44 = vadd.f32 %v2654_v27, %v2642_v26  ;;  %3643 = vmatpush.bf16.msrb.mxu1 %v5821_v10  ;;  %v5804_v15 = vld [vmem:[#allocation6 + $0x1c0] sm:$0xf]  ;;  %v5789_v26 = vor.u32 %v6624_v24, %v5788_v18  ;;  %v6652_v10 = vld [vmem:[#allocation6 + $0x28c] sm:$0xf0] }
 0x19c   :  { %2822 = vmatmul.bf16.vlgmr.msra.gmra.mxu2 %v7037_v31  ;;  %v5545_v31 = vor.u32 %v6559_v30, %v5542_v6  ;;  %v5805_v25 = vor.u32 %v6628_v41, %v5804_v15  ;;  %v6572_v30 = vld [vmem:[#allocation6 + $0xc] sm:$0xf0]  ;;  %v5772_v6 = vld [vmem:[#allocation6 + $0x180] sm:$0xf]  ;;  %v5822_v41 = vld [vmem:[#allocation6 + $0x1f0] sm:$0xf0] }
 0x19d   :  { %v5773_v36 = vor.u32 %v6620_v32, %v5772_v6  ;;  %v5868_v32 = vld [vmem:[#allocation6 + $0x240] sm:$0xf] }
 0x19e   :  { %2781 = vmatpush.bf16.msrb.mxu3 %v5477_v60  ;;  %3634 = vmatpush.bf16.msrb.mxu0 %v5629_v8  ;;  %v5613_v60 = vor.u32 %v6580_v14, %v5612_v13  ;;  %v5630_v13 = vld [vmem:[#allocation6 + $0x70] sm:$0xf0]  ;;  %v5901_v14 = vor.u32 %v6652_v10, %v5900_v52  ;;  %v6061_v52 = vor.u32 %v6692_v7, %v6060_v59  ;;  %v6694_v7 = vld [vmem:[#allocation6 + $0x3e4] sm:$0xf] }
 0x19f   :  { %3644 = vmatpush.bf16.msrb.mxu1 %v5805_v25  ;;  %v5742_v10 = vld [vmem:[#allocation6 + $0x150] sm:$0xf0] }
 0x1a0   :  { %v5838_v59 = vld [vmem:[#allocation6 + $0x210] sm:$0xf0] }
 0x1a2   :  { %2782 = vmatpush.bf16.msrb.mxu3 %v5461_v22  ;;  %v2656_v40 = vpop.f32.mrf.mxu1  ;;  %3635 = vmatpush.bf16.msrb.mxu0 %v5613_v60  ;;  %v6630_v60 = vld [vmem:[#allocation6 + $0x1e4] sm:$0xf] }
 0x1a3   :  { %3645 = vmatpush.bf16.msrb.mxu1 %v5789_v26  ;;  %v5694_v40 = vld [vmem:[#allocation6 + $0xf0] sm:$0xf0]  ;;  %v5825_v25 = vor.u32 %v6630_v60, %v5822_v41  ;;  %v6044_v60 = vld [vmem:[#allocation6 + $0x3a0] sm:$0xf]  ;;  %v6688_v41 = vld [vmem:[#allocation6 + $0x3ac] sm:$0xf0] }
 0x1a4   :  { %v5697_v38 = vor.u32 %v6598_v34, %v5694_v40  ;;  %v5806_v26 = vld [vmem:[#allocation6 + $0x1d0] sm:$0xf0]  ;;  %v6644_v34 = vld [vmem:[#allocation6 + $0x24c] sm:$0xf0] }
 0x1a5   :  { %2783 = vmatmul.bf16.vlgmr.msrb.gmra.mxu3 %v7048_v48 }
 0x1a6   :  { %2827 = vmatpush.bf16.msra.mxu3 %v5577_v35 }
 0x1a7   :  { %3646 = vmatpush.bf16.msrb.mxu1 %v5773_v36  ;;  %v5598_v36 = vld [vmem:[#allocation6 + $0x30] sm:$0xf0] }
 0x1aa   :  { %2828 = vmatpush.bf16.msra.mxu3 %v5561_v29  ;;  %v5580_v29 = vld [vmem:[#allocation6] sm:$0xf] }
 0x1ae   :  { %2829 = vmatpush.bf16.msra.mxu3 %v5545_v31  ;;  %v5581_v31 = vor.u32 %v6572_v30, %v5580_v29 }
 0x1b2   :  { %v2693_v42 = vpop.f32.mrf.mxu0  ;;  %2830 = vmatpush.bf16.msra.mxu3 %v5529_v23 }
 0x1b3   :  { %v2694_v47 = vadd.f32 %v2693_v42, %v1985_v49  ;;  %v2706_v62 = vpop.f32.mrf.mxu1  ;;  %v5756_v49 = vld [vmem:[#allocation6 + $0x160] sm:$0xf]  ;;  %v6616_v42 = vld [vmem:[#allocation6 + $0x16c] sm:$0xf0] }
 0x1b5   :  { %v7063_v51 = vadd.f32 %v2706_v62, %v2694_v47  ;;  %v6594_v47 = vld [vmem:[#allocation6 + $0xc4] sm:$0xf]  ;;  %v5678_v62 = vld [vmem:[#allocation6 + $0xd0] sm:$0xf0] }
 0x1b6   :  { %2831 = vmatpush.bf16.msra.mxu3 %v5513_v43  ;;  %v5948_v43 = vld [vmem:[#allocation6 + $0x2e0] sm:$0xf]  ;;  %v5681_v54 = vor.u32 %v6594_v47, %v5678_v62  ;;  %v6640_v47 = vld [vmem:[#allocation6 + $0x22c] sm:$0xf0] }
 0x1b7   :  { %v5949_v53 = vor.u32 %v6664_v37, %v5948_v43  ;;  %v5790_v43 = vld [vmem:[#allocation6 + $0x1b0] sm:$0xf0]  ;;  %v5852_v37 = vld [vmem:[#allocation6 + $0x220] sm:$0xf] }
 0x1b8   :  { %v5853_v62 = vor.u32 %v6640_v47, %v5852_v37  ;;  %v5996_v37 = vld [vmem:[#allocation6 + $0x340] sm:$0xf]  ;;  %v6676_v47 = vld [vmem:[#allocation6 + $0x34c] sm:$0xf0] }
 0x1b9   :  { %3656 = vmatpush.bf16.msrb.mxu2 %v5949_v53  ;;  %v5582_v53 = vld [vmem:[#allocation6 + $0x10] sm:$0xf0] }
 0x1ba   :  { %v2695_v58 = vpop.f32.mrf.mxu0  ;;  %2832 = vmatpush.bf16.msra.mxu3 %v5497_v39  ;;  %v5757_v39 = vor.u32 %v6616_v42, %v5756_v49 }
 0x1bb   :  { %v2708_v0 = vpop.f32.mrf.mxu1  ;;  %v6590_v58 = vld [vmem:[#allocation6 + $0xa4] sm:$0xf] }
 0x1bc   :  { %3647 = vmatpush.bf16.msrb.mxu1 %v5757_v39  ;;  %v6656_v0 = vld [vmem:[#allocation6 + $0x2ac] sm:$0xf0]  ;;  %v6570_v39 = vld [vmem:[#allocation6 + $0x4] sm:$0xf] }
 0x1bd   :  { %3657 = vmatpush.bf16.msrb.mxu2 %v5933_v50  ;;  %v5917_v5 = vor.u32 %v6656_v0, %v5916_v20  ;;  %v5585_v55 = vor.u32 %v6570_v39, %v5582_v53  ;;  %v6076_v50 = vld [vmem:[#allocation6 + $0x3e0] sm:$0xf]  ;;  %v6614_v20 = vld [vmem:[#allocation6 + $0x164] sm:$0xf]  ;;  %v5758_v0 = vld [vmem:[#allocation6 + $0x170] sm:$0xf0] }
 0x1be   :  { %2833 = vmatpush.bf16.msra.mxu3 %v5481_v21  ;;  %v5662_v21 = vld [vmem:[#allocation6 + $0xb0] sm:$0xf0]  ;;  %v6642_v39 = vld [vmem:[#allocation6 + $0x244] sm:$0xf] }
 0x1bf   :  { %v5665_v12 = vor.u32 %v6590_v58, %v5662_v21  ;;  %v5836_v58 = vld [vmem:[#allocation6 + $0x200] sm:$0xf]  ;;  %v6636_v21 = vld [vmem:[#allocation6 + $0x20c] sm:$0xf0]  ;;  %v5870_v53 = vld [vmem:[#allocation6 + $0x250] sm:$0xf0] }
 0x1c0   :  { %3648 = vmatpush.bf16.msrb.mxu1 %v5741_v63  ;;  %v5837_v61 = vor.u32 %v6636_v21, %v5836_v58 }
 0x1c1   :  { %3658 = vmatpush.bf16.msrb.mxu2 %v5917_v5  ;;  %v5950_v5 = vld [vmem:[#allocation6 + $0x2f0] sm:$0xf0] }
 0x1c2   :  { %2834 = vmatpush.bf16.msra.mxu3 %v5465_v1  ;;  %v6586_v1 = vld [vmem:[#allocation6 + $0x84] sm:$0xf] }
 0x1c3   :  { %v5649_v19 = vor.u32 %v6586_v1, %v5646_v2  ;;  %v6077_v1 = vor.u32 %v6696_v4, %v6076_v50  ;;  %v5761_v2 = vor.u32 %v6614_v20, %v5758_v0  ;;  %v6638_v50 = vld [vmem:[#allocation6 + $0x224] sm:$0xf]  ;;  %v5700_v20 = vld [vmem:[#allocation6 + $0xe8] sm:$0xf]  ;;  %v6601_v0 = vld [vmem:[#allocation6 + $0xf4] sm:$0xf0] }
 0x1c4   :  { %3649 = vmatpush.bf16.msrb.mxu1 %v5725_v3  ;;  %v6662_v3 = vld [vmem:[#allocation6 + $0x2e4] sm:$0xf] }
 0x1c5   :  { %2835 = vmatmul.bf16.vlgmr.msra.gmra.mxu3 %v7048_v48  ;;  %v5596_v48 = vld [vmem:[#allocation6 + $0x20] sm:$0xf]  ;;  %3659 = vmatpush.bf16.msrb.mxu2 %v5901_v14  ;;  %v5934_v14 = vld [vmem:[#allocation6 + $0x2d0] sm:$0xf0] }
 0x1c6   :  { %v5597_v28 = vor.u32 %v6576_v17, %v5596_v48  ;;  %v6648_v48 = vld [vmem:[#allocation6 + $0x26c] sm:$0xf0]  ;;  %v1987_v17 = vperm.slane %v7055_v11, 3  ;;  %v5869_v11 = vor.u32 %v6644_v34, %v5868_v32  ;;  %3669 = vmatpush.bf16.msrb.mxu3 %v6077_v1  ;;  %v5902_v34 = vld [vmem:[#allocation6 + $0x290] sm:$0xf0] }
 0x1c8   :  { %3636 = vmatpush.bf16.msrb.mxu0 %v5597_v28  ;;  %3650 = vmatpush.bf16.msrb.mxu1 %v5709_v9  ;;  %v6626_v28 = vld [vmem:[#allocation6 + $0x1c4] sm:$0xf] }
 0x1c9   :  { %v5809_v30 = vor.u32 %v6626_v28, %v5806_v26  ;;  %v6610_v9 = vld [vmem:[#allocation6 + $0x144] sm:$0xf]  ;;  %v6684_v26 = vld [vmem:[#allocation6 + $0x38c] sm:$0xf0] }
 0x1ca   :  { %3670 = vmatpush.bf16.msrb.mxu3 %v6061_v52 }
 0x1cc   :  { %3637 = vmatpush.bf16.msrb.mxu0 %v5581_v31  ;;  %3695 = vmatpush.bf16.msra.mxu1 %v5825_v25  ;;  %v6045_v25 = vor.u32 %v6688_v41, %v6044_v60  ;;  %v5668_v41 = vld [vmem:[#allocation6 + $0xa8] sm:$0xf] }
 0x1ce   :  { %3671 = vmatpush.bf16.msrb.mxu3 %v6045_v25  ;;  %v6690_v25 = vld [vmem:[#allocation6 + $0x3c4] sm:$0xf] }
 0x1d0   :  { %3682 = vmatpush.bf16.msra.mxu0 %v5697_v38  ;;  %3696 = vmatpush.bf16.msra.mxu1 %v5809_v30  ;;  %v6622_v38 = vld [vmem:[#allocation6 + $0x1a4] sm:$0xf] }
 0x1d1   :  { %v6602_v30 = vld [vmem:[#allocation6 + $0x104] sm:$0xf] }
 0x1d2   :  { %v2745_v16 = vpop.f32.mrf.mxu0 }
 0x1d3   :  { %v2746_v22 = vadd.f32 %v2745_v16, %v1986_v33  ;;  %v2758_v35 = vpop.f32.mrf.mxu1  ;;  %v6582_v33 = vld [vmem:[#allocation6 + $0x64] sm:$0xf]  ;;  %v5884_v16 = vld [vmem:[#allocation6 + $0x260] sm:$0xf] }
 0x1d4   :  { %3683 = vmatpush.bf16.msra.mxu0 %v5681_v54  ;;  %v5633_v15 = vor.u32 %v6582_v33, %v5630_v13  ;;  %v5885_v18 = vor.u32 %v6648_v48, %v5884_v16  ;;  %v6618_v54 = vld [vmem:[#allocation6 + $0x184] sm:$0xf]  ;;  %v5745_v13 = vor.u32 %v6610_v9, %v5742_v10  ;;  %v5684_v9 = vld [vmem:[#allocation6 + $0xc8] sm:$0xf]  ;;  %v6597_v10 = vld [vmem:[#allocation6 + $0xd4] sm:$0xf0] }
 0x1d5   :  { %v7067_v27 = vadd.f32 %v2758_v35, %v2746_v22  ;;  %v6578_v22 = vld [vmem:[#allocation6 + $0x44] sm:$0xf]  ;;  %v5614_v35 = vld [vmem:[#allocation6 + $0x50] sm:$0xf0]  ;;  %v5777_v63 = vor.u32 %v6618_v54, %v5774_v56  ;;  %v5685_v60 = vor.u32 %v6597_v10, %v5684_v9 }
 0x1d6   :  { %v5617_v24 = vor.u32 %v6578_v22, %v5614_v35  ;;  %3660 = vmatpush.bf16.msrb.mxu2 %v5885_v18  ;;  %v6658_v33 = vld [vmem:[#allocation6 + $0x2c4] sm:$0xf]  ;;  %v5918_v35 = vld [vmem:[#allocation6 + $0x2b0] sm:$0xf0] }
 0x1d7   :  { %v6606_v48 = vld [vmem:[#allocation6 + $0x124] sm:$0xf]  ;;  %v5982_v10 = vld [vmem:[#allocation6 + $0x330] sm:$0xf0] }
 0x1d8   :  { %3684 = vmatpush.bf16.msra.mxu0 %v5665_v12  ;;  %v6654_v18 = vld [vmem:[#allocation6 + $0x2a4] sm:$0xf] }
 0x1d9   :  { %v5921_v28 = vor.u32 %v6654_v18, %v5918_v35  ;;  %v6670_v9 = vld [vmem:[#allocation6 + $0x324] sm:$0xf] }
 0x1da   :  { %v2747_v23 = vpop.f32.mrf.mxu0  ;;  %3661 = vmatpush.bf16.msrb.mxu2 %v5869_v11  ;;  %v6012_v11 = vld [vmem:[#allocation6 + $0x360] sm:$0xf] }
 0x1db   :  { %v2760_v46 = vpop.f32.mrf.mxu1  ;;  %v6574_v23 = vld [vmem:[#allocation6 + $0x24] sm:$0xf] }
 0x1dc   :  { %3685 = vmatpush.bf16.msra.mxu0 %v5649_v19  ;;  %v5601_v42 = vor.u32 %v6574_v23, %v5598_v36  ;;  %v5793_v46 = vor.u32 %v6622_v38, %v5790_v43  ;;  %v5953_v19 = vor.u32 %v6662_v3, %v5950_v5  ;;  %v6680_v23 = vld [vmem:[#allocation6 + $0x36c] sm:$0xf0]  ;;  %v5886_v43 = vld [vmem:[#allocation6 + $0x270] sm:$0xf0]  ;;  %v5964_v3 = vld [vmem:[#allocation6 + $0x300] sm:$0xf] }
 0x1dd   :  { %v6013_v38 = vor.u32 %v6680_v23, %v6012_v11  ;;  %v6668_v5 = vld [vmem:[#allocation6 + $0x30c] sm:$0xf0]  ;;  %v6633_v11 = vld [vmem:[#allocation6 + $0x1f4] sm:$0xf0] }
 0x1de   :  { %3697 = vmatpush.bf16.msra.mxu1 %v5793_v46  ;;  %3662 = vmatpush.bf16.msrb.mxu2 %v5853_v62  ;;  %v5997_v62 = vor.u32 %v6676_v47, %v5996_v37  ;;  %v5620_v37 = vld [vmem:[#allocation6 + $0x48] sm:$0xf]  ;;  %v6581_v47 = vld [vmem:[#allocation6 + $0x54] sm:$0xf0] }
 0x1df   :  { %v7069_v8 = vpop.f32.mrf.mxu2 }
 0x1e0   :  { %3686 = vmatpush.bf16.msra.mxu0 %v5633_v15  ;;  %v5937_v15 = vor.u32 %v6658_v33, %v5934_v14  ;;  %v2668_v54 = vadd.f32 %v7069_v8, %v7059_v44  ;;  %v5701_v44 = vor.u32 %v6601_v0, %v5700_v20  ;;  %v5965_v8 = vor.u32 %v6668_v5, %v5964_v3  ;;  %v6674_v20 = vld [vmem:[#allocation6 + $0x344] sm:$0xf]  ;;  %v5998_v0 = vld [vmem:[#allocation6 + $0x350] sm:$0xf0]  ;;  %v5588_v5 = vld [vmem:[#allocation6 + $0x8] sm:$0xf] }
 0x1e2   :  { %3698 = vmatpush.bf16.msra.mxu1 %v5777_v63  ;;  %3663 = vmatpush.bf16.msrb.mxu2 %v5837_v61  ;;  %v5980_v63 = vld [vmem:[#allocation6 + $0x320] sm:$0xf]  ;;  %v5854_v61 = vld [vmem:[#allocation6 + $0x230] sm:$0xf0] }
 0x1e3   :  { %v5857_v1 = vor.u32 %v6638_v50, %v5854_v61  ;;  %v6577_v50 = vld [vmem:[#allocation6 + $0x34] sm:$0xf0]  ;;  %v5796_v61 = vld [vmem:[#allocation6 + $0x1a8] sm:$0xf] }
 0x1e4   :  { %3687 = vmatpush.bf16.msra.mxu0 %v5617_v24  ;;  %v6028_v24 = vld [vmem:[#allocation6 + $0x380] sm:$0xf] }
 0x1e6   :  { %3699 = vmatpush.bf16.msra.mxu1 %v5761_v2  ;;  %3708 = vmatpush.bf16.msra.mxu2 %v5953_v19  ;;  %v6634_v19 = vld [vmem:[#allocation6 + $0x204] sm:$0xf] }
 0x1e7   :  { %v2669_v40 = vpop.f32.mrf.mxu2  ;;  %v5841_v33 = vor.u32 %v6634_v19, %v5838_v59 }
 0x1e8   :  { %3688 = vmatpush.bf16.msra.mxu0 %v5601_v42  ;;  %v6646_v42 = vld [vmem:[#allocation6 + $0x264] sm:$0xf] }
 0x1e9   :  { %v5889_v46 = vor.u32 %v6646_v42, %v5886_v43  ;;  %v6030_v42 = vld [vmem:[#allocation6 + $0x390] sm:$0xf0] }
 0x1ea   :  { %3700 = vmatpush.bf16.msra.mxu1 %v5745_v13  ;;  %3709 = vmatpush.bf16.msra.mxu2 %v5937_v15  ;;  %v6078_v13 = vld [vmem:[#allocation6 + $0x3f0] sm:$0xf0] }
 0x1eb   :  { %v6081_v15 = vor.u32 %v6694_v7, %v6078_v13  ;;  %v6621_v7 = vld [vmem:[#allocation6 + $0x194] sm:$0xf0]  ;;  %v6599_v13 = vld [vmem:[#allocation6 + $0xec] sm:$0xf] }
 0x1ec   :  { %3689 = vmatpush.bf16.msra.mxu0 %v5585_v55  ;;  %v5873_v55 = vor.u32 %v6642_v39, %v5870_v53 }
 0x1ee   :  { %3710 = vmatpush.bf16.msra.mxu2 %v5921_v28  ;;  %v6589_v28 = vld [vmem:[#allocation6 + $0x94] sm:$0xf0] }
 0x1ef   :  { %v7074_v12 = vpop.f32.mrf.mxu2 }
 0x1f0   :  { %v2720_v35 = vadd.f32 %v7074_v12, %v7063_v51 }
 0x1f2   :  { %v2797_v29 = vpop.f32.mrf.mxu0 }
 0x1f3   :  { %v2798_v6 = vadd.f32 %v2797_v29, %v1987_v17  ;;  %v2810_v31 = vpop.f32.mrf.mxu1  ;;  %v5726_v17 = vld [vmem:[#allocation6 + $0x130] sm:$0xf0]  ;;  %v6029_v29 = vor.u32 %v6684_v26, %v6028_v24  ;;  %v6686_v24 = vld [vmem:[#allocation6 + $0x3a4] sm:$0xf] }
 0x1f4   :  { %v5729_v22 = vor.u32 %v6606_v48, %v5726_v17  ;;  %v6062_v48 = vld [vmem:[#allocation6 + $0x3d0] sm:$0xf0] }
 0x1f5   :  { %v7072_v49 = vadd.f32 %v2810_v31, %v2798_v6  ;;  %v5710_v6 = vld [vmem:[#allocation6 + $0x110] sm:$0xf0]  ;;  %v6650_v31 = vld [vmem:[#allocation6 + $0x284] sm:$0xf]  ;;  %3672 = vmatpush.bf16.msrb.mxu3 %v6029_v29  ;;  %v6065_v17 = vor.u32 %v6690_v25, %v6062_v48  ;;  %v5764_v25 = vld [vmem:[#allocation6 + $0x168] sm:$0xf] }
 0x1f6   :  { %3701 = vmatpush.bf16.msra.mxu1 %v5729_v22  ;;  %v5713_v32 = vor.u32 %v6602_v30, %v5710_v6  ;;  %v5905_v40 = vor.u32 %v6650_v31, %v5902_v34  ;;  %v5652_v22 = vld [vmem:[#allocation6 + $0x88] sm:$0xf]  ;;  %v6046_v26 = vld [vmem:[#allocation6 + $0x3b0] sm:$0xf0]  ;;  %v6585_v34 = vld [vmem:[#allocation6 + $0x74] sm:$0xf0] }
 0x1f7   :  { %v2721_v16 = vpop.f32.mrf.mxu2  ;;  %v6049_v30 = vor.u32 %v6686_v24, %v6046_v26  ;;  %v5636_v31 = vld [vmem:[#allocation6 + $0x68] sm:$0xf]  ;;  %v6617_v48 = vld [vmem:[#allocation6 + $0x174] sm:$0xf0]  ;;  %v5686_v24 = vld [vmem:[#allocation6 + $0xd8] sm:$0xf0] }
 0x1f8   :  { %3711 = vmatpush.bf16.msra.mxu2 %v5905_v40  ;;  %v6593_v16 = vld [vmem:[#allocation6 + $0xb4] sm:$0xf0]  ;;  %v5828_v40 = vld [vmem:[#allocation6 + $0x1e8] sm:$0xf]  ;;  %v5637_v51 = vor.u32 %v6585_v34, %v5636_v31 }
 0x1f9   :  { %3673 = vmatpush.bf16.msrb.mxu3 %v6013_v38  ;;  %v5669_v18 = vor.u32 %v6593_v16, %v5668_v41  ;;  %v6682_v38 = vld [vmem:[#allocation6 + $0x384] sm:$0xf]  ;;  %v5829_v12 = vor.u32 %v6633_v11, %v5828_v40  ;;  %v5748_v34 = vld [vmem:[#allocation6 + $0x148] sm:$0xf]  ;;  %v6613_v40 = vld [vmem:[#allocation6 + $0x154] sm:$0xf0] }
 0x1fa   :  { %v2799_v57 = vpop.f32.mrf.mxu0  ;;  %3702 = vmatpush.bf16.msra.mxu1 %v5713_v32  ;;  %v5653_v32 = vor.u32 %v6589_v28, %v5652_v22  ;;  %v6033_v43 = vor.u32 %v6682_v38, %v6030_v42  ;;  %v6595_v28 = vld [vmem:[#allocation6 + $0xcc] sm:$0xf]  ;;  %v5940_v11 = vld [vmem:[#allocation6 + $0x2c8] sm:$0xf]  ;;  %v6661_v38 = vld [vmem:[#allocation6 + $0x2d4] sm:$0xf0] }
 0x1fb   :  { %v2812_v45 = vpop.f32.mrf.mxu1  ;;  %v6591_v42 = vld [vmem:[#allocation6 + $0xac] sm:$0xf] }
 0x1fc   :  { %3712 = vmatpush.bf16.msra.mxu2 %v5889_v46  ;;  %v6672_v45 = vld [vmem:[#allocation6 + $0x32c] sm:$0xf0] }
 0x1fd   :  { %3674 = vmatpush.bf16.msrb.mxu3 %v5997_v62  ;;  %v5981_v21 = vor.u32 %v6672_v45, %v5980_v63  ;;  %v5812_v62 = vld [vmem:[#allocation6 + $0x1c8] sm:$0xf]  ;;  %v5621_v45 = vor.u32 %v6581_v47, %v5620_v37  ;;  %v6609_v47 = vld [vmem:[#allocation6 + $0x134] sm:$0xf0] }
 0x1fe   :  { %v5732_v37 = vld [vmem:[#allocation6 + $0x128] sm:$0xf] }
 0x1ff   :  { %v7076_v36 = vpop.f32.mrf.mxu2 }
 0x200   :  { %3713 = vmatpush.bf16.msra.mxu2 %v5873_v55  ;;  %v6678_v55 = vld [vmem:[#allocation6 + $0x364] sm:$0xf]  ;;  %v2772_v19 = vadd.f32 %v7076_v36, %v7067_v27  ;;  %v5966_v36 = vld [vmem:[#allocation6 + $0x310] sm:$0xf0] }
 0x201   :  { %3675 = vmatpush.bf16.msrb.mxu3 %v5981_v21  ;;  %v5604_v21 = vld [vmem:[#allocation6 + $0x28] sm:$0xf]  ;;  %v6666_v27 = vld [vmem:[#allocation6 + $0x304] sm:$0xf] }
 0x202   :  { %v5969_v26 = vor.u32 %v6666_v27, %v5966_v36 }
 0x204   :  { %3714 = vmatpush.bf16.msra.mxu2 %v5857_v1  ;;  %v6001_v1 = vor.u32 %v6674_v20, %v5998_v0  ;;  %v5638_v20 = vld [vmem:[#allocation6 + $0x78] sm:$0xf0]  ;;  %v6631_v0 = vld [vmem:[#allocation6 + $0x1ec] sm:$0xf] }
 0x205   :  { %3676 = vmatpush.bf16.msrb.mxu3 %v5965_v8  ;;  %v5780_v8 = vld [vmem:[#allocation6 + $0x188] sm:$0xf] }
 0x206   :  { %v5781_v16 = vor.u32 %v6621_v7, %v5780_v8  ;;  %v5622_v7 = vld [vmem:[#allocation6 + $0x58] sm:$0xf0] }
 0x207   :  { %v2773_v58 = vpop.f32.mrf.mxu2 }
 0x208   :  { %v2680_v56 = vpop.f32.mrf.mxu3  ;;  %3715 = vmatpush.bf16.msra.mxu2 %v5841_v33 }
 0x209   :  { %v2681_v57 = vadd.f32 %v2680_v56, %v2668_v54  ;;  %3721 = vmatpush.bf16.msra.mxu3 %v6081_v15  ;;  %v6629_v54 = vld [vmem:[#allocation6 + $0x1d4] sm:$0xf0]  ;;  %v6014_v56 = vld [vmem:[#allocation6 + $0x370] sm:$0xf0]  ;;  %v5985_v15 = vor.u32 %v6670_v9, %v5982_v10  ;;  %v6627_v9 = vld [vmem:[#allocation6 + $0x1cc] sm:$0xf] }
 0x20a   :  { %v6017_v63 = vor.u32 %v6678_v55, %v6014_v56  ;;  %v5813_v58 = vor.u32 %v6629_v54, %v5812_v62  ;;  %v5924_v62 = vld [vmem:[#allocation6 + $0x2a8] sm:$0xf]  ;;  %v6657_v54 = vld [vmem:[#allocation6 + $0x2b4] sm:$0xf0]  ;;  %v6587_v55 = vld [vmem:[#allocation6 + $0x8c] sm:$0xf] }
 0x20b   :  { %v2840_v4 = vmul.f32 0.2, %v2681_v57  ;;  %v5654_v56 = vld [vmem:[#allocation6 + $0x98] sm:$0xf0] }
 0x20c   :  { %v5814_v10 = vld [vmem:[#allocation6 + $0x1d8] sm:$0xf0] }
 0x20d   :  { %v2844_v2 = vmax.f32 %v2681_v57, %v2840_v4  ;;  %3722 = vmatpush.bf16.msra.mxu3 %v6065_v17  ;;  %v6625_v4 = vld [vmem:[#allocation6 + $0x1b4] sm:$0xf0]  ;;  %v5956_v17 = vld [vmem:[#allocation6 + $0x2e8] sm:$0xf] }
 0x20e   :  { %v5797_v3 = vor.u32 %v6625_v4, %v5796_v61  ;;  %v6653_v61 = vld [vmem:[#allocation6 + $0x294] sm:$0xf0]  ;;  %v6583_v4 = vld [vmem:[#allocation6 + $0x6c] sm:$0xf] }
 0x20f   :  { %v7080_v52 = vpack.c.bf16 %v2844_v2, %v2844_v2  ;;  %v5605_v2 = vor.u32 %v6577_v50, %v5604_v21  ;;  %v6605_v21 = vld [vmem:[#allocation6 + $0x114] sm:$0xf0]  ;;  %v5908_v50 = vld [vmem:[#allocation6 + $0x288] sm:$0xf] }
 0x210   :  { %v2682_v14 = vpop.f32.mrf.mxu3 }
 0x211   :  { %3638 = vmatmul.bf16.vlgmr.msrb.gmra.mxu0 %v7080_v52  ;;  %3723 = vmatpush.bf16.msra.mxu3 %v6049_v30  ;;  %v5702_v14 = vld [vmem:[#allocation6 + $0xf8] sm:$0xf0]  ;;  %v5765_v30 = vor.u32 %v6617_v48, %v5764_v25  ;;  %v6623_v25 = vld [vmem:[#allocation6 + $0x1ac] sm:$0xf] }
 0x212   :  { %3734 = vmatpush.bf16.msrb.mxu0 %v5701_v44  ;;  %v6573_v44 = vld [vmem:[#allocation6 + $0x14] sm:$0xf0]  ;;  %v5705_v22 = vor.u32 %v6599_v13, %v5702_v14  ;;  %v5876_v14 = vld [vmem:[#allocation6 + $0x248] sm:$0xf]  ;;  %v5798_v48 = vld [vmem:[#allocation6 + $0x1b8] sm:$0xf0] }
 0x213   :  { %v5589_v41 = vor.u32 %v6573_v44, %v5588_v5  ;;  %v5641_v5 = vor.u32 %v6583_v4, %v5638_v20  ;;  %v5892_v44 = vld [vmem:[#allocation6 + $0x268] sm:$0xf]  ;;  %v5801_v36 = vor.u32 %v6623_v25, %v5798_v48  ;;  %v6647_v25 = vld [vmem:[#allocation6 + $0x26c] sm:$0xf]  ;;  %v5894_v48 = vld [vmem:[#allocation6 + $0x278] sm:$0xf0] }
 0x215   :  { %3724 = vmatpush.bf16.msra.mxu3 %v6033_v43  ;;  %v5670_v43 = vld [vmem:[#allocation6 + $0xb8] sm:$0xf0] }
 0x216   :  { %3735 = vmatpush.bf16.msrb.mxu0 %v5685_v60 }
 0x218   :  { %v2732_v29 = vpop.f32.mrf.mxu3 }
 0x219   :  { %v2733_v6 = vadd.f32 %v2732_v29, %v2720_v35  ;;  %3725 = vmatpush.bf16.msra.mxu3 %v6017_v63  ;;  %v6665_v35 = vld [vmem:[#allocation6 + $0x2f4] sm:$0xf0]  ;;  %v5925_v63 = vor.u32 %v6657_v54, %v5924_v62 }
 0x21a   :  { %3736 = vmatpush.bf16.msrb.mxu0 %v5669_v18  ;;  %v5957_v31 = vor.u32 %v6665_v35, %v5956_v17  ;;  %v6641_v35 = vld [vmem:[#allocation6 + $0x234] sm:$0xf0] }
 0x21b   :  { %v2841_v23 = vmul.f32 0.2, %v2733_v6 }
 0x21d   :  { %v2845_v46 = vmax.f32 %v2733_v6, %v2841_v23  ;;  %3726 = vmatpush.bf16.msra.mxu3 %v6001_v1  ;;  %v5830_v1 = vld [vmem:[#allocation6 + $0x1f8] sm:$0xf0] }
 0x21e   :  { %3737 = vmatpush.bf16.msrb.mxu0 %v5653_v32  ;;  %v5689_v32 = vor.u32 %v6595_v28, %v5686_v24  ;;  %v5833_v8 = vor.u32 %v6631_v0, %v5830_v1  ;;  %v6571_v28 = vld [vmem:[#allocation6 + $0xc] sm:$0xf]  ;;  %v5590_v24 = vld [vmem:[#allocation6 + $0x18] sm:$0xf0]  ;;  %v6052_v0 = vld [vmem:[#allocation6 + $0x3a8] sm:$0xf] }
 0x21f   :  { %v7085_v39 = vpack.c.bf16 %v2845_v46, %v2845_v46  ;;  %v7087_v53 = vpop.f32.mrf.mxu2  ;;  %v5749_v46 = vor.u32 %v6613_v40, %v5748_v34  ;;  %v5593_v34 = vor.u32 %v6571_v28, %v5590_v24  ;;  %v5844_v40 = vld [vmem:[#allocation6 + $0x208] sm:$0xf]  ;;  %v6689_v1 = vld [vmem:[#allocation6 + $0x3b4] sm:$0xf0] }
 0x220   :  { %v2734_v57 = vpop.f32.mrf.mxu3  ;;  %v2824_v27 = vadd.f32 %v7087_v53, %v7072_v49  ;;  %v6697_v49 = vld [vmem:[#allocation6 + $0x3f4] sm:$0xf0]  ;;  %v6615_v53 = vld [vmem:[#allocation6 + $0x16c] sm:$0xf] }
 0x221   :  { %3651 = vmatmul.bf16.vlgmr.msrb.gmra.mxu1 %v7085_v39  ;;  %3690 = vmatmul.bf16.vlgmr.msra.gmra.mxu0 %v7080_v52  ;;  %v5733_v57 = vor.u32 %v6609_v47, %v5732_v37 }
 0x222   :  { %3738 = vmatpush.bf16.msrb.mxu0 %v5637_v51  ;;  %3747 = vmatpush.bf16.msrb.mxu1 %v5829_v12  ;;  %v5941_v51 = vor.u32 %v6661_v38, %v5940_v11  ;;  %v5673_v12 = vor.u32 %v6591_v42, %v5670_v43  ;;  %v6637_v11 = vld [vmem:[#allocation6 + $0x214] sm:$0xf0]  ;;  %v5766_v43 = vld [vmem:[#allocation6 + $0x178] sm:$0xf0] }
 0x223   :  { %3727 = vmatpush.bf16.msra.mxu3 %v5985_v15  ;;  %v5817_v15 = vor.u32 %v6627_v9, %v5814_v10  ;;  %v5845_v37 = vor.u32 %v6637_v11, %v5844_v40  ;;  %v5769_v54 = vor.u32 %v6615_v53, %v5766_v43  ;;  %v6603_v9 = vld [vmem:[#allocation6 + $0x10c] sm:$0xf]  ;;  %v5718_v10 = vld [vmem:[#allocation6 + $0x118] sm:$0xf0]  ;;  %v5972_v40 = vld [vmem:[#allocation6 + $0x308] sm:$0xf] }
 0x224   :  { %v6669_v11 = vld [vmem:[#allocation6 + $0x314] sm:$0xf0] }
 0x225   :  { %v5973_v53 = vor.u32 %v6669_v11, %v5972_v40  ;;  %v6706_v40 = vld [vmem:[#allocation7 + $0x40] sm:$0xff] }
 0x226   :  { %3739 = vmatpush.bf16.msrb.mxu0 %v5621_v45  ;;  %3748 = vmatpush.bf16.msrb.mxu1 %v5813_v58  ;;  %v5657_v45 = vor.u32 %v6587_v55, %v5654_v56  ;;  %v5716_v58 = vld [vmem:[#allocation6 + $0x108] sm:$0xf]  ;;  %v6718_v11 = vld [vmem:[#allocation7 + $0xa0] sm:$0xff] }
 0x227   :  { %v2825_v59 = vpop.f32.mrf.mxu2  ;;  %3728 = vmatpush.bf16.msra.mxu3 %v5969_v26  ;;  %v6068_v56 = vld [vmem:[#allocation6 + $0x3c8] sm:$0xf] }
 0x228   :  { %v2784_v33 = vpop.f32.mrf.mxu3  ;;  %v6579_v59 = vld [vmem:[#allocation6 + $0x4c] sm:$0xf] }
 0x229   :  { %v2785_v60 = vadd.f32 %v2784_v33, %v2772_v19  ;;  %v6649_v19 = vld [vmem:[#allocation6 + $0x274] sm:$0xf0]  ;;  %v5625_v13 = vor.u32 %v6579_v59, %v5622_v7  ;;  %v6036_v59 = vld [vmem:[#allocation6 + $0x388] sm:$0xf] }
 0x22a   :  { %3740 = vmatpush.bf16.msrb.mxu0 %v5605_v2  ;;  %3749 = vmatpush.bf16.msrb.mxu1 %v5797_v3  ;;  %v5717_v2 = vor.u32 %v6605_v21, %v5716_v58  ;;  %v5909_v3 = vor.u32 %v6653_v61, %v5908_v50  ;;  %v5893_v33 = vor.u32 %v6649_v19, %v5892_v44  ;;  %v5750_v58 = vld [vmem:[#allocation6 + $0x158] sm:$0xf0]  ;;  %v6659_v21 = vld [vmem:[#allocation6 + $0x2cc] sm:$0xf]  ;;  %v6685_v7 = vld [vmem:[#allocation6 + $0x394] sm:$0xf0] }
 0x22b   :  { %v2842_v18 = vmul.f32 0.2, %v2785_v60  ;;  %v5942_v50 = vld [vmem:[#allocation6 + $0x2d8] sm:$0xf0] }
 0x22c   :  { %v5945_v20 = vor.u32 %v6659_v21, %v5942_v50  ;;  %v5926_v44 = vld [vmem:[#allocation6 + $0x2b8] sm:$0xf0]  ;;  %v6675_v21 = vld [vmem:[#allocation6 + $0x34c] sm:$0xf] }
 0x22d   :  { %v2846_v29 = vmax.f32 %v2785_v60, %v2842_v18  ;;  %v6645_v60 = vld [vmem:[#allocation6 + $0x254] sm:$0xf0]  ;;  %v6006_v50 = vld [vmem:[#allocation6 + $0x358] sm:$0xf0] }
 0x22e   :  { %3741 = vmatpush.bf16.msrb.mxu0 %v5589_v41  ;;  %3750 = vmatpush.bf16.msrb.mxu1 %v5781_v16  ;;  %v6575_v41 = vld [vmem:[#allocation6 + $0x2c] sm:$0xf]  ;;  %v5606_v16 = vld [vmem:[#allocation6 + $0x38] sm:$0xf0]  ;;  %v5877_v17 = vor.u32 %v6645_v60, %v5876_v14  ;;  %v6037_v14 = vor.u32 %v6685_v7, %v6036_v59 }
 0x22f   :  { %v7093_v6 = vpack.c.bf16 %v2846_v29, %v2846_v29  ;;  %v5609_v18 = vor.u32 %v6575_v41, %v5606_v16  ;;  %v6619_v29 = vld [vmem:[#allocation6 + $0x18c] sm:$0xf]  ;;  %v6020_v41 = vld [vmem:[#allocation6 + $0x368] sm:$0xf]  ;;  %v6681_v16 = vld [vmem:[#allocation6 + $0x374] sm:$0xf0] }
 0x230   :  { %v2786_v23 = vpop.f32.mrf.mxu3  ;;  %v6703_v59 = vld [vmem:[#allocation7 + $0x28] sm:$0xff] }
 0x231   :  { %3664 = vmatmul.bf16.vlgmr.msrb.gmra.mxu2 %v7093_v6  ;;  %3703 = vmatmul.bf16.vlgmr.msra.gmra.mxu1 %v7085_v39  ;;  %v6084_v23 = vld [vmem:[#allocation6 + $0x3e8] sm:$0xf] }
 0x232   :  { %3786 = vmatpush.bf16.msra.mxu0 %v5705_v22  ;;  %3751 = vmatpush.bf16.msrb.mxu1 %v5765_v30  ;;  %v5860_v22 = vld [vmem:[#allocation6 + $0x228] sm:$0xf]  ;;  %v5782_v30 = vld [vmem:[#allocation6 + $0x198] sm:$0xf0]  ;;  %v6085_v47 = vor.u32 %v6697_v49, %v6084_v23  ;;  %v6635_v23 = vld [vmem:[#allocation6 + $0x20c] sm:$0xf] }
 0x233   :  { %3742 = vmatmul.bf16.vlgmr.msrb.gmra.mxu0 %v7080_v52  ;;  %3760 = vmatpush.bf16.msrb.mxu2 %v5957_v31  ;;  %v5785_v42 = vor.u32 %v6619_v29, %v5782_v30  ;;  %v6673_v29 = vld [vmem:[#allocation6 + $0x334] sm:$0xf0]  ;;  %v6639_v30 = vld [vmem:[#allocation6 + $0x22c] sm:$0xf]  ;;  %v6086_v49 = vld [vmem:[#allocation6 + $0x3f8] sm:$0xf0] }
 0x236   :  { %3787 = vmatpush.bf16.msra.mxu0 %v5689_v32  ;;  %3752 = vmatpush.bf16.msrb.mxu1 %v5749_v46  ;;  %v5861_v32 = vor.u32 %v6641_v35, %v5860_v22  ;;  %v6663_v46 = vld [vmem:[#allocation6 + $0x2ec] sm:$0xf]  ;;  %v6004_v22 = vld [vmem:[#allocation6 + $0x348] sm:$0xf]  ;;  %v5878_v35 = vld [vmem:[#allocation6 + $0x258] sm:$0xf0] }
 0x237   :  { %3761 = vmatpush.bf16.msrb.mxu2 %v5941_v51  ;;  %v5958_v51 = vld [vmem:[#allocation6 + $0x2f8] sm:$0xf0] }
 0x238   :  { %v5961_v55 = vor.u32 %v6663_v46, %v5958_v51  ;;  %v6691_v46 = vld [vmem:[#allocation6 + $0x3cc] sm:$0xf]  ;;  %v6070_v51 = vld [vmem:[#allocation6 + $0x3d8] sm:$0xf0] }
 0x23a   :  { %3788 = vmatpush.bf16.msra.mxu0 %v5673_v12  ;;  %3753 = vmatpush.bf16.msrb.mxu1 %v5733_v57  ;;  %v6693_v57 = vld [vmem:[#allocation6 + $0x3d4] sm:$0xf0] }
 0x23b   :  { %3762 = vmatpush.bf16.msrb.mxu2 %v5925_v63  ;;  %v6611_v63 = vld [vmem:[#allocation6 + $0x14c] sm:$0xf]  ;;  %v6069_v61 = vor.u32 %v6693_v57, %v6068_v56  ;;  %v6038_v56 = vld [vmem:[#allocation6 + $0x398] sm:$0xf0] }
 0x23c   :  { %v5753_v4 = vor.u32 %v6611_v63, %v5750_v58  ;;  %v6679_v63 = vld [vmem:[#allocation6 + $0x36c] sm:$0xf] }
 0x23e   :  { %3789 = vmatpush.bf16.msra.mxu0 %v5657_v45  ;;  %3754 = vmatpush.bf16.msrb.mxu1 %v5717_v2  ;;  %v6607_v2 = vld [vmem:[#allocation6 + $0x12c] sm:$0xf] }
 0x23f   :  { %3763 = vmatpush.bf16.msrb.mxu2 %v5909_v3  ;;  %v5734_v3 = vld [vmem:[#allocation6 + $0x138] sm:$0xf0] }
 0x241   :  { %3716 = vmatmul.bf16.vlgmr.msra.gmra.mxu2 %v7093_v6  ;;  %3755 = vmatmul.bf16.vlgmr.msrb.gmra.mxu1 %v7085_v39 }
 0x242   :  { %3790 = vmatpush.bf16.msra.mxu0 %v5641_v5  ;;  %3799 = vmatpush.bf16.msra.mxu1 %v5833_v8  ;;  %v6655_v5 = vld [vmem:[#allocation6 + $0x2ac] sm:$0xf]  ;;  %v6053_v8 = vor.u32 %v6689_v1, %v6052_v0 }
 0x243   :  { %3764 = vmatpush.bf16.msrb.mxu2 %v5893_v33  ;;  %v5929_v19 = vor.u32 %v6655_v5, %v5926_v44  ;;  %v6651_v33 = vld [vmem:[#allocation6 + $0x28c] sm:$0xf]  ;;  %v6705_v44 = vld [vmem:[#allocation7 + $0x38] sm:$0xff] }
 0x244   :  { %v6667_v1 = vld [vmem:[#allocation6 + $0x30c] sm:$0xf] }
 0x246   :  { %3791 = vmatpush.bf16.msra.mxu0 %v5625_v13  ;;  %3800 = vmatpush.bf16.msra.mxu1 %v5817_v15  ;;  %v5910_v13 = vld [vmem:[#allocation6 + $0x298] sm:$0xf0]  ;;  %v5721_v15 = vor.u32 %v6603_v9, %v5718_v10  ;;  %v6702_v10 = vld [vmem:[#allocation7 + $0x20] sm:$0xff] }
 0x247   :  { %3765 = vmatpush.bf16.msrb.mxu2 %v5877_v17  ;;  %v5913_v60 = vor.u32 %v6651_v33, %v5910_v13  ;;  %v6021_v17 = vor.u32 %v6681_v16, %v6020_v41  ;;  %v6701_v33 = vld [vmem:[#allocation7 + $0x18] sm:$0xff]  ;;  %v6699_v41 = vld [vmem:[#allocation7 + $0x8] sm:$0xff] }
 0x248   :  { %v2836_v26 = vpop.f32.mrf.mxu3  ;;  %v6713_v13 = vld [vmem:[#allocation7 + $0x78] sm:$0xff]  ;;  %v6711_v16 = vld [vmem:[#allocation7 + $0x68] sm:$0xff] }
 0x249   :  { %v2837_v31 = vadd.f32 %v2836_v26, %v2824_v27  ;;  %v6677_v27 = vld [vmem:[#allocation6 + $0x354] sm:$0xf0]  ;;  %v5988_v26 = vld [vmem:[#allocation6 + $0x328] sm:$0xf] }
 0x24a   :  { %3792 = vmatpush.bf16.msra.mxu0 %v5609_v18  ;;  %3801 = vmatpush.bf16.msra.mxu1 %v5801_v36  ;;  %v5897_v18 = vor.u32 %v6647_v25, %v5894_v48  ;;  %v6643_v36 = vld [vmem:[#allocation6 + $0x24c] sm:$0xf]  ;;  %v6005_v28 = vor.u32 %v6677_v27, %v6004_v22  ;;  %v6709_v27 = vld [vmem:[#allocation7 + $0x58] sm:$0xff] }
 0x24b   :  { %v2843_v38 = vmul.f32 0.2, %v2837_v31  ;;  %3766 = vmatpush.bf16.msrb.mxu2 %v5861_v32  ;;  %v5881_v24 = vor.u32 %v6643_v36, %v5878_v35  ;;  %v5989_v32 = vor.u32 %v6673_v29, %v5988_v26  ;;  %v6721_v36 = vld [vmem:[#allocation7 + $0xb8] sm:$0xff]  ;;  %v6707_v29 = vld [vmem:[#allocation7 + $0x48] sm:$0xff] }
 0x24d   :  { %v2847_v12 = vmax.f32 %v2837_v31, %v2843_v38  ;;  %v5862_v31 = vld [vmem:[#allocation6 + $0x238] sm:$0xf0] }
 0x24e   :  { %3793 = vmatpush.bf16.msra.mxu0 %v5593_v34  ;;  %3802 = vmatpush.bf16.msra.mxu1 %v5785_v42  ;;  %v5865_v34 = vor.u32 %v6639_v30, %v5862_v31  ;;  %v5846_v38 = vld [vmem:[#allocation6 + $0x218] sm:$0xf0]  ;;  %v6695_v42 = vld [vmem:[#allocation6 + $0x3ec] sm:$0xf] }
 0x24f   :  { %v7102_v62 = vpack.c.bf16 %v2847_v12, %v2847_v12  ;;  %3767 = vmatpush.bf16.msrb.mxu2 %v5845_v37  ;;  %v6089_v43 = vor.u32 %v6695_v42, %v6086_v49  ;;  %v6073_v12 = vor.u32 %v6691_v46, %v6070_v51  ;;  %v6687_v37 = vld [vmem:[#allocation6 + $0x3ac] sm:$0xf] }
 0x250   :  { %v2838_v45 = vpop.f32.mrf.mxu3  ;;  %v6719_v30 = vld [vmem:[#allocation7 + $0xa8] sm:$0xff] }
 0x251   :  { %3677 = vmatmul.bf16.vlgmr.msrb.gmra.mxu3 %v7102_v62  ;;  %3794 = vmatmul.bf16.vlgmr.msra.gmra.mxu0 %v7080_v52  ;;  %v5737_v52 = vor.u32 %v6607_v2, %v5734_v3  ;;  %v6022_v45 = vld [vmem:[#allocation6 + $0x378] sm:$0xf0] }
 0x252   :  { %3773 = vmatpush.bf16.msrb.mxu3 %v6085_v47  ;;  %3803 = vmatpush.bf16.msra.mxu1 %v5769_v54  ;;  %v6054_v47 = vld [vmem:[#allocation6 + $0x3b8] sm:$0xf0]  ;;  %v6025_v58 = vor.u32 %v6679_v63, %v6022_v45 }
 0x253   :  { %3812 = vmatpush.bf16.msra.mxu2 %v5961_v55  ;;  %v6057_v54 = vor.u32 %v6687_v37, %v6054_v47  ;;  %v6683_v55 = vld [vmem:[#allocation6 + $0x38c] sm:$0xf]  ;;  %4110 = vmatpush.bf16.msrb.mxu0 %v6705_v44  ;;  %v6729_v63 = vld [vmem:[#allocation7 + $0xf8] sm:$0xff] }
 0x254   :  { %3768 = vmatmul.bf16.vlgmr.msrb.gmra.mxu2 %v7093_v6  ;;  %v6041_v57 = vor.u32 %v6683_v55, %v6038_v56  ;;  %v6715_v37 = vld [vmem:[#allocation7 + $0x88] sm:$0xff] }
 0x256   :  { %3774 = vmatpush.bf16.msrb.mxu3 %v6069_v61  ;;  %3804 = vmatpush.bf16.msra.mxu1 %v5753_v4  ;;  %v6009_v61 = vor.u32 %v6675_v21, %v6006_v50  ;;  %v6671_v4 = vld [vmem:[#allocation6 + $0x32c] sm:$0xf]  ;;  %v6728_v50 = vld [vmem:[#allocation7 + $0xf0] sm:$0xff] }
 0x257   :  { %3813 = vmatpush.bf16.msra.mxu2 %v5945_v20  ;;  %v5990_v20 = vld [vmem:[#allocation6 + $0x338] sm:$0xf0] }
 0x258   :  { %v5993_v0 = vor.u32 %v6671_v4, %v5990_v20  ;;  %v6727_v20 = vld [vmem:[#allocation7 + $0xe8] sm:$0xff] }
 0x25a   :  { %3775 = vmatpush.bf16.msrb.mxu3 %v6053_v8  ;;  %3805 = vmatpush.bf16.msra.mxu1 %v5737_v52 }
 0x25b   :  { %3814 = vmatpush.bf16.msra.mxu2 %v5929_v19  ;;  %v6704_v19 = vld [vmem:[#allocation7 + $0x30] sm:$0xff] }
 0x25c   :  { %4111 = vmatpush.bf16.msrb.mxu0 %v6704_v19  ;;  %v6725_v19 = vld [vmem:[#allocation7 + $0xd8] sm:$0xff] }
 0x25e   :  { %3776 = vmatpush.bf16.msrb.mxu3 %v6037_v14  ;;  %3806 = vmatpush.bf16.msra.mxu1 %v5721_v15  ;;  %v6712_v14 = vld [vmem:[#allocation7 + $0x70] sm:$0xff] }
 0x25f   :  { %3815 = vmatpush.bf16.msra.mxu2 %v5913_v60 }
 0x260   :  { %4112 = vmatpush.bf16.msrb.mxu0 %v6703_v59 }
 0x261   :  { %3729 = vmatmul.bf16.vlgmr.msra.gmra.mxu3 %v7102_v62  ;;  %3807 = vmatmul.bf16.vlgmr.msra.gmra.mxu1 %v7085_v39  ;;  %v5849_v39 = vor.u32 %v6635_v23, %v5846_v38  ;;  %v6717_v38 = vld [vmem:[#allocation7 + $0x98] sm:$0xff] }
 0x262   :  { %3777 = vmatpush.bf16.msrb.mxu3 %v6021_v17  ;;  %4123 = vmatpush.bf16.msrb.mxu1 %v6713_v13  ;;  %v6698_v17 = vld [vmem:[#allocation7] sm:$0xff] }
 0x263   :  { %3816 = vmatpush.bf16.msra.mxu2 %v5897_v18  ;;  %v6710_v18 = vld [vmem:[#allocation7 + $0x60] sm:$0xff] }
 0x264   :  { %4113 = vmatpush.bf16.msrb.mxu0 %v6702_v10 }
 0x266   :  { %3778 = vmatpush.bf16.msrb.mxu3 %v6005_v28  ;;  %4124 = vmatpush.bf16.msrb.mxu1 %v6712_v14  ;;  %v6708_v28 = vld [vmem:[#allocation7 + $0x50] sm:$0xff] }
 0x267   :  { %3817 = vmatpush.bf16.msra.mxu2 %v5881_v24  ;;  %v6720_v24 = vld [vmem:[#allocation7 + $0xb0] sm:$0xff] }
 0x268   :  { %4114 = vmatpush.bf16.msrb.mxu0 %v6701_v33 }
 0x26a   :  { %3779 = vmatpush.bf16.msrb.mxu3 %v5989_v32  ;;  %4125 = vmatpush.bf16.msrb.mxu1 %v6711_v16  ;;  %v7123_v32 = vld [vmem:[%s7148_s6] sm:$0xf] }
 0x26b   :  { %3818 = vmatpush.bf16.msra.mxu2 %v5865_v34  ;;  %v2982_v23 = vperm.slane %v7123_v32, 0  ;;  %v2983_v45 = vperm.slane %v7123_v32, 1 }
 0x26e   :  { %3780 = vmatpush.bf16.msrb.mxu3 %v5973_v53  ;;  %4126 = vmatpush.bf16.msrb.mxu1 %v6710_v18 }
 0x26f   :  { %3819 = vmatpush.bf16.msra.mxu2 %v5849_v39  ;;  %v6716_v39 = vld [vmem:[#allocation7 + $0x90] sm:$0xff] }
 0x271   :  { %3781 = vmatmul.bf16.vlgmr.msrb.gmra.mxu3 %v7102_v62 }
 0x272   :  { %3825 = vmatpush.bf16.msra.mxu3 %v6089_v43  ;;  %3820 = vmatmul.bf16.vlgmr.msra.gmra.mxu2 %v7093_v6  ;;  %v5974_v6 = vld [vmem:[#allocation6 + $0x318] sm:$0xf0] }
 0x273   :  { %v5977_v2 = vor.u32 %v6667_v1, %v5974_v6  ;;  %4127 = vmatpush.bf16.msrb.mxu1 %v6709_v27  ;;  %4136 = vmatpush.bf16.msrb.mxu2 %v6721_v36  ;;  %v2985_v36 = vperm.slane %v7123_v32, 3 }
 0x276   :  { %3826 = vmatpush.bf16.msra.mxu3 %v6073_v12 }
 0x277   :  { %4128 = vmatpush.bf16.msrb.mxu1 %v6708_v28  ;;  %4137 = vmatpush.bf16.msrb.mxu2 %v6720_v24 }
 0x27a   :  { %3827 = vmatpush.bf16.msra.mxu3 %v6057_v54 }
 0x27b   :  { %4129 = vmatpush.bf16.msrb.mxu1 %v6707_v29  ;;  %4138 = vmatpush.bf16.msrb.mxu2 %v6719_v30 }
 0x27e   :  { %3828 = vmatpush.bf16.msra.mxu3 %v6041_v57  ;;  %v6714_v57 = vld [vmem:[#allocation7 + $0x80] sm:$0xff] }
 0x27f   :  { %4130 = vmatpush.bf16.msrb.mxu1 %v6706_v40  ;;  %4139 = vmatpush.bf16.msrb.mxu2 %v6718_v11 }
 0x282   :  { %3829 = vmatpush.bf16.msra.mxu3 %v6025_v58 }
 0x283   :  { %4140 = vmatpush.bf16.msrb.mxu2 %v6717_v38 }
 0x286   :  { %3830 = vmatpush.bf16.msra.mxu3 %v6009_v61 }
 0x287   :  { %4141 = vmatpush.bf16.msrb.mxu2 %v6716_v39 }
 0x28a   :  { %3831 = vmatpush.bf16.msra.mxu3 %v5993_v0 }
 0x28b   :  { %4142 = vmatpush.bf16.msrb.mxu2 %v6715_v37 }
 0x28e   :  { %3832 = vmatpush.bf16.msra.mxu3 %v5977_v2  ;;  %v3639_v3 = vpop.f32.mrf.mxu0  ;;  %v6726_v2 = vld [vmem:[#allocation7 + $0xe0] sm:$0xff] }
 0x28f   :  { %v3640_v49 = vadd.f32 %v3639_v3, %v2982_v23  ;;  %4143 = vmatpush.bf16.msrb.mxu2 %v6714_v57 }
 0x291   :  { %3833 = vmatmul.bf16.vlgmr.msra.gmra.mxu3 %v7102_v62  ;;  %v6700_v62 = vld [vmem:[#allocation7 + $0x10] sm:$0xff] }
 0x292   :  { %4115 = vmatpush.bf16.msrb.mxu0 %v6700_v62  ;;  %4149 = vmatpush.bf16.msrb.mxu3 %v6729_v63  ;;  %v6723_v62 = vld [vmem:[#allocation7 + $0xc8] sm:$0xff] }
 0x296   :  { %v3641_v5 = vpop.f32.mrf.mxu0  ;;  %4116 = vmatpush.bf16.msrb.mxu0 %v6699_v41  ;;  %4150 = vmatpush.bf16.msrb.mxu3 %v6728_v50 }
 0x29a   :  { %4117 = vmatpush.bf16.msrb.mxu0 %v6698_v17  ;;  %4151 = vmatpush.bf16.msrb.mxu3 %v6727_v20 }
 0x29e   :  { %v3652_v8 = vpop.f32.mrf.mxu1  ;;  %v7112_v52 = vpop.f32.mrf.mxu0  ;;  %4152 = vmatpush.bf16.msrb.mxu3 %v6726_v2 }
 0x29f   :  { %v3653_v43 = vadd.f32 %v3652_v8, %v3640_v49  ;;  %v3692_v61 = vadd.f32 %v7112_v52, %v2983_v45  ;;  %v6724_v52 = vld [vmem:[#allocation7 + $0xd0] sm:$0xff] }
 0x2a2   :  { %4153 = vmatpush.bf16.msrb.mxu3 %v6725_v19 }
 0x2a6   :  { %v3654_v7 = vpop.f32.mrf.mxu1  ;;  %v3693_v9 = vpop.f32.mrf.mxu0  ;;  %4154 = vmatpush.bf16.msrb.mxu3 %v6724_v52 }
 0x2a7   :  { %v2984_v7 = vperm.slane %v7123_v32, 2  ;;  %v6738_v32 = vld [vmem:[%s7150_s8] ss:$0 sm:$0xff] }
 0x2aa   :  { %4155 = vmatpush.bf16.msrb.mxu3 %v6723_v62 }
 0x2ae   :  { %v7114_v15 = vpop.f32.mrf.mxu1 }
 0x2af   :  { %v3705_v1 = vadd.f32 %v7114_v15, %v3692_v61 }
 0x2b0   :  { %v7116_v60 = vpop.f32.mrf.mxu0 }
 0x2b1   :  { %v3744_v33 = vadd.f32 %v7116_v60, %v2984_v7 }
 0x2b4   :  { %v3665_v25 = vpop.f32.mrf.mxu2 }
 0x2b5   :  { %v3666_v46 = vadd.f32 %v3665_v25, %v3653_v43  ;;  %v6722_v25 = vld [vmem:[#allocation7 + $0xc0] sm:$0xff] }
 0x2b6   :  { %v3706_v48 = vpop.f32.mrf.mxu1  ;;  %4156 = vmatpush.bf16.msrb.mxu3 %v6722_v25 }
 0x2b8   :  { %v3745_v22 = vpop.f32.mrf.mxu0 }
 0x2bc   :  { %v3667_v35 = vpop.f32.mrf.mxu2 }
 0x2be   :  { %v7118_v26 = vpop.f32.mrf.mxu1 }
 0x2bf   :  { %v3757_v13 = vadd.f32 %v7118_v26, %v3744_v33 }
 0x2c4   :  { %v3717_v31 = vpop.f32.mrf.mxu2 }
 0x2c5   :  { %v3718_v6 = vadd.f32 %v3717_v31, %v3705_v1 }
 0x2c6   :  { %v3758_v34 = vpop.f32.mrf.mxu1 }
 0x2cc   :  { %v3719_v53 = vpop.f32.mrf.mxu2 }
 0x2ce   :  { %v7126_v42 = vpop.f32.mrf.mxu0 }
 0x2cf   :  { %v3796_v60 = vadd.f32 %v7126_v42, %v2985_v36 }
 0x2d4   :  { %v3678_v51 = vpop.f32.mrf.mxu3 }
 0x2d5   :  { %v3679_v12 = vadd.f32 %v3678_v51, %v3666_v46 }
 0x2d6   :  { %v3797_v47 = vpop.f32.mrf.mxu0 }
 0x2d7   :  { %v3838_v54 = vmul.f32 0.2, %v3679_v12  ;;  %v3769_v55 = vpop.f32.mrf.mxu2 }
 0x2d8   :  { %v3770_v14 = vadd.f32 %v3769_v55, %v3757_v13 }
 0x2d9   :  { %v3842_v56 = vmax.f32 %v3679_v12, %v3838_v54 }
 0x2db   :  { %v3846_v58 = vpack.c.bf16 %v3842_v56, %v3842_v56 }
 0x2dc   :  { %v3680_v21 = vpop.f32.mrf.mxu3 }
 0x2dd   :  { %4118 = vmatmul.bf16.vlgmr.msrb.gmra.mxu0 %v3846_v58 }
 0x2de   :  { %v3808_v4 = vpop.f32.mrf.mxu1 }
 0x2df   :  { %v3771_v0 = vpop.f32.mrf.mxu2  ;;  %v3809_v35 = vadd.f32 %v3808_v4, %v3796_v60 }
 0x2e4   :  { %v3730_v3 = vpop.f32.mrf.mxu3 }
 0x2e5   :  { %v3731_v5 = vadd.f32 %v3730_v3, %v3718_v6 }
 0x2e6   :  { %v3810_v8 = vpop.f32.mrf.mxu1 }
 0x2e7   :  { %v3839_v44 = vmul.f32 0.2, %v3731_v5 }
 0x2e9   :  { %v3843_v59 = vmax.f32 %v3731_v5, %v3839_v44 }
 0x2eb   :  { %v3847_v9 = vpack.c.bf16 %v3843_v59, %v3843_v59 }
 0x2ec   :  { %v3732_v10 = vpop.f32.mrf.mxu3 }
 0x2ed   :  { %4131 = vmatmul.bf16.vlgmr.msrb.gmra.mxu1 %v3847_v9 }
 0x2f4   :  { %v3782_v15 = vpop.f32.mrf.mxu3 }
 0x2f5   :  { %v3783_v41 = vadd.f32 %v3782_v15, %v3770_v14  ;;  %v3821_v16 = vpop.f32.mrf.mxu2 }
 0x2f6   :  { %v3822_v28 = vadd.f32 %v3821_v16, %v3809_v35 }
 0x2f7   :  { %v3840_v48 = vmul.f32 0.2, %v3783_v41 }
 0x2f9   :  { %v3844_v17 = vmax.f32 %v3783_v41, %v3840_v48 }
 0x2fb   :  { %v3848_v18 = vpack.c.bf16 %v3844_v17, %v3844_v17 }
 0x2fc   :  { %v3784_v22 = vpop.f32.mrf.mxu3 }
 0x2fd   :  { %v3823_v27 = vpop.f32.mrf.mxu2  ;;  %4144 = vmatmul.bf16.vlgmr.msrb.gmra.mxu2 %v3848_v18 }
 0x314   :  { %v3834_v24 = vpop.f32.mrf.mxu3 }
 0x315   :  { %v3835_v26 = vadd.f32 %v3834_v24, %v3822_v28 }
 0x317   :  { %v3841_v29 = vmul.f32 0.2, %v3835_v26 }
 0x319   :  { %v3845_v30 = vmax.f32 %v3835_v26, %v3841_v29 }
 0x31b   :  { %v3849_v31 = vpack.c.bf16 %v3845_v30, %v3845_v30 }
 0x31c   :  { %v3836_v34 = vpop.f32.mrf.mxu3 }
 0x31d   :  { %4157 = vmatmul.bf16.vlgmr.msrb.gmra.mxu3 %v3849_v31 }
 0x35a   :  { %v4119_v40 = vpop.f32.mrf.mxu0 }
 0x35b   :  { %v4120_v42 = vadd.f32 %v6738_v32, %v4119_v40 }
 0x362   :  { %v4121_v11 = vpop.f32.mrf.mxu0 }
 0x36a   :  { %v4132_v23 = vpop.f32.mrf.mxu1 }
 0x36b   :  { %v4133_v39 = vadd.f32 %v4132_v23, %v4120_v42 }
 0x372   :  { %v4134_v38 = vpop.f32.mrf.mxu1 }
 0x380   :  { %v4145_v49 = vpop.f32.mrf.mxu2 }
 0x381   :  { %v4146_v43 = vadd.f32 %v4145_v49, %v4133_v39 }
 0x388   :  { %v4147_v53 = vpop.f32.mrf.mxu2 }
 0x3a0   :  { %v4158_v46 = vpop.f32.mrf.mxu3 }
 0x3a1   :  { %v4159_v51 = vadd.f32 %v4158_v46, %v4146_v43 }
 0x3a3   :  { %4162 = vst [vmem:[%s7151_s9] sm:$0xff] %v4159_v51 }
 0x3a8   :  { %v4160_v12 = vpop.f32.mrf.mxu3 }
 0x3a9   :  { %4167 = vsyncpa [#allocation3], 1 }
 0x3aa   :  { %4168 = vsyncpa [#allocation5], 1 }
 0x3ab   :  { %4169 = vsyncpa [#allocation8], 1 }

</bundles_post_ra>
